<compile_context>
chip_gen: v5e
topology: v5e:2x2
jax: 0.10.0
libtpu: 0.0.40
codegen_flags: <defaults>
</compile_context>

<pallas_src>
import functools
import math

import jax
import jax.numpy as jnp
from jax.experimental import pallas as pl
from jax.experimental.pallas import tpu as pltpu

# ----------------------------- config ---------------------------------------
VOCAB = 512
MAX_POS = 32
TYPES = 2
HIDDEN = 128
NUM_HEADS = 2
HEAD_DIM = HIDDEN // NUM_HEADS
INTERMEDIATE = 256
NUM_LAYERS = 2
BERT_NUM_LABELS = 768           # width of `outputs.logits` (input of the 768-in heads)
NUM_CATEGORIES = 5
NUM_SUB_CATEGORIES = 7
HEAD_PAD = 128                  # lane-dense padded width of the fused cat|sub head
LN_EPS = 1e-12
ATTN_SCALE = 1.0 / math.sqrt(HEAD_DIM)
WDTYPE = jnp.bfloat16           # matmul weight dtype (f32 accumulation on MXU)


# ----------------------------- in-kernel helpers -----------------------------
def _layer_norm(x, g, b):
    mu = jnp.mean(x, axis=-1, keepdims=True)
    xc = x - mu
    var = jnp.mean(xc * xc, axis=-1, keepdims=True)
    return xc * jax.lax.rsqrt(var + LN_EPS) * g + b


def _gelu(y):
    # TODO(synk): HF BERT default is exact erf GELU; tanh approximation differs at ~1e-3.
    return 0.5 * y * (1.0 + jnp.tanh(0.7978845608028654 * (y + 0.044715 * y * y * y)))


def _mm(x, w, b):
    """bf16 x bf16 -> f32 MXU matmul with f32 bias add."""
    return jnp.dot(x.astype(WDTYPE), w, preferred_element_type=jnp.float32) + b


# ----------------------------- fused kernel ----------------------------------
def _bert_fused_kernel(
    ids_ref, mask_ref,
    wemb_ref, pt_emb_ref, emb_g_ref, emb_b_ref,
    wqkv_ref, bqkv_ref, wo_ref, bo_ref, ln1g_ref, ln1b_ref,
    wi_ref, bi_ref, wf_ref, bf_ref, ln2g_ref, ln2b_ref,
    poolw_ref, poolb_ref, headw_ref, headb_ref,
    out_ref,
    x_scratch,
):
    B, S = ids_ref.shape
    M = B * S
    H, nH, dh = HIDDEN, NUM_HEADS, HEAD_DIM

    # ---- fused embedding gather + position/type add + LayerNorm -------------
    # input_ids are SMEM scalars; word-embedding rows are gathered with dynamic
    # sublane slices from the VMEM-resident table (static unroll: M is tiny).
    for t in range(M):
        tok = ids_ref[t // S, t % S]
        x_scratch[pl.ds(t, 1), :] = wemb_ref[pl.ds(tok, 1), :]
    pos_type = pt_emb_ref[...]                                   # (S, H) f32
    x = x_scratch[...] + jnp.concatenate([pos_type] * B, axis=0)  # (M, H)
    x = _layer_norm(x, emb_g_ref[...], emb_b_ref[...])

    # additive key mask: (B, S) -> (B, 1, S), broadcast over query positions
    neg = ((1.0 - mask_ref[...]) * -10000.0)[:, None, :]

    for l in range(NUM_LAYERS):                 # static unroll (small L)
        # ---- fused Q|K|V projection over all B*S tokens (scale pre-folded) --
        qkv = _mm(x, wqkv_ref[l], bqkv_ref[l])                   # (M, 3H) f32

        wo_l = wo_ref[l]                                         # (H, H) bf16
        attn = None
        for h in range(nH):                     # static unroll (small nH)
            qh = qkv[:, h * dh:(h + 1) * dh].reshape(B, S, dh)
            kh = qkv[:, H + h * dh:H + (h + 1) * dh].reshape(B, S, dh)
            vh = qkv[:, 2 * H + h * dh:2 * H + (h + 1) * dh].reshape(B, S, dh)
            s = jnp.einsum("bqd,bkd->bqk", qh, kh,
                           preferred_element_type=jnp.float32)   # (B, S, S)
            s = s + neg
            s = s - jnp.max(s, axis=-1, keepdims=True)
            p = jnp.exp(s)
            p = p / jnp.sum(p, axis=-1, keepdims=True)           # exact softmax
            ctx = jnp.einsum("bqk,bkd->bqd", p, vh,
                             preferred_element_type=jnp.float32)  # (B, S, dh)
            # fold head-concat into the output projection: accumulate
            # ctx_h @ wo[h*dh:(h+1)*dh, :] instead of concatenating heads.
            part = jnp.dot(ctx.reshape(M, dh).astype(WDTYPE),
                           wo_l[h * dh:(h + 1) * dh, :],
                           preferred_element_type=jnp.float32)   # (M, H)
            attn = part if attn is None else attn + part
        attn = attn + bo_ref[l]
        x = _layer_norm(attn + x, ln1g_ref[l], ln1b_ref[l])

        # ---- feed-forward (GELU) + residual LayerNorm ------------------------
        inter = _gelu(_mm(x, wi_ref[l], bi_ref[l]))
        ff = _mm(inter, wf_ref[l], bf_ref[l])
        x = _layer_norm(ff + x, ln2g_ref[l], ln2b_ref[l])

    # ---- batched pooler + pre-folded (seq-cls head @ cat|sub heads) ----------
    cls = jnp.concatenate([x[b * S:b * S + 1, :] for b in range(B)], axis=0)  # (B, H)
    pooled = jnp.tanh(_mm(cls, poolw_ref[...], poolb_ref[...]))               # (B, H)
    # Dropout(0.1) between the 768-wide logits and the category heads is
    # identity in eval mode, so cls_w @ [cat_w | sub_w] was pre-folded on host.
    # TODO(synk): training-mode stochastic dropout would invalidate the pre-fold.
    logits = _mm(pooled, headw_ref[...], headb_ref[...])                       # (B, 128)
    out_ref[...] = logits.astype(out_ref.dtype)


# ----------------------------- parameters ------------------------------------
def init_params(key):
    keys = iter(jax.random.split(key, 64))

    def nrm(shape, dtype=jnp.float32):
        return (0.02 * jax.random.normal(next(keys), shape, jnp.float32)).astype(dtype)

    L, H, I = NUM_LAYERS, HIDDEN, INTERMEDIATE

    # fused QKV weights with the attention scale 1/sqrt(head_dim) folded into Q
    wqkv = nrm((L, H, 3 * H))
    bqkv = jnp.zeros((L, 1, 3 * H), jnp.float32)
    q_scale = jnp.concatenate([jnp.full((H,), ATTN_SCALE, jnp.float32),
                               jnp.ones((2 * H,), jnp.float32)])
    wqkv = wqkv * q_scale[None, None, :]
    bqkv = bqkv * q_scale[None, None, :]

    p = {
        "word_emb": nrm((VOCAB, H)),                    # f32: gathered in-kernel
        "pos_emb": nrm((MAX_POS, H)),
        "type_emb": nrm((TYPES, H)),
        "emb_ln_g": jnp.ones((1, H), jnp.float32),
        "emb_ln_b": jnp.zeros((1, H), jnp.float32),
        "wqkv": wqkv.astype(WDTYPE),
        "bqkv": bqkv,
        "wo": nrm((L, H, H), WDTYPE),
        "bo": jnp.zeros((L, 1, H), jnp.float32),
        "ln1_g": jnp.ones((L, 1, H), jnp.float32),
        "ln1_b": jnp.zeros((L, 1, H), jnp.float32),
        "wi": nrm((L, H, I), WDTYPE),
        "bi": jnp.zeros((L, 1, I), jnp.float32),
        "wf": nrm((L, I, H), WDTYPE),
        "bf": jnp.zeros((L, 1, H), jnp.float32),
        "ln2_g": jnp.ones((L, 1, H), jnp.float32),
        "ln2_b": jnp.zeros((L, 1, H), jnp.float32),
        "pool_w": nrm((H, H), WDTYPE),
        "pool_b": jnp.zeros((1, H), jnp.float32),
    }

    # Eval-mode pre-fold (dropout identity):
    #   logits = (pooled @ cls_w + cls_b) @ [cat_w|sub_w] + [cat_b|sub_b]
    #          = pooled @ (cls_w @ head_w) + (cls_b @ head_w + head_b)
    # Columns [0:5) = category, [5:12) = sub-category, rest zero lane padding.
    cls_w = nrm((H, BERT_NUM_LABELS))
    cls_b = jnp.zeros((1, BERT_NUM_LABELS), jnp.float32)
    cat_w = nrm((BERT_NUM_LABELS, NUM_CATEGORIES))
    sub_w = nrm((BERT_NUM_LABELS, NUM_SUB_CATEGORIES))
    head_w = jnp.zeros((BERT_NUM_LABELS, HEAD_PAD), jnp.float32)
    head_w = head_w.at[:, :NUM_CATEGORIES].set(cat_w)
    head_w = head_w.at[:, NUM_CATEGORIES:NUM_CATEGORIES + NUM_SUB_CATEGORIES].set(sub_w)
    head_b = jnp.zeros((1, HEAD_PAD), jnp.float32)
    p["fused_head_w"] = (cls_w @ head_w).astype(WDTYPE)          # (H, 128)
    p["fused_head_b"] = cls_b @ head_w + head_b                  # (1, 128)
    return p


# ----------------------------- forward ---------------------------------------
def bert_forward(params, input_ids, attention_mask):
    B, S = input_ids.shape
    H = HIDDEN

    # Static (position + token-type) embedding slab, added per-sequence in-kernel.
    pos_type = params["pos_emb"][:S] + params["type_emb"][0][None, :]   # (S, H) f32
    mask = attention_mask.astype(jnp.float32).reshape(B, S)

    smem = pl.BlockSpec(memory_space=pltpu.MemorySpace.SMEM)
    vmem = pl.BlockSpec(memory_space=pltpu.MemorySpace.VMEM)

    fused = pl.pallas_call(
        _bert_fused_kernel,
        out_shape=jax.ShapeDtypeStruct((B, HEAD_PAD), jnp.float32),
        in_specs=[smem] + [vmem] * 21,       # whole batch, single program, no grid
        out_specs=vmem,
        scratch_shapes=[pltpu.VMEM((B * S, H), jnp.float32)],
    )

    logits = fused(
        input_ids.astype(jnp.int32), mask,
        params["word_emb"], pos_type,
        params["emb_ln_g"], params["emb_ln_b"],
        params["wqkv"], params["bqkv"],
        params["wo"], params["bo"],
        params["ln1_g"], params["ln1_b"],
        params["wi"], params["bi"],
        params["wf"], params["bf"],
        params["ln2_g"], params["ln2_b"],
        params["pool_w"], params["pool_b"],
        params["fused_head_w"], params["fused_head_b"],
    )

    category_logits = logits[:, :NUM_CATEGORIES]
    sub_category_logits = logits[:, NUM_CATEGORIES:NUM_CATEGORIES + NUM_SUB_CATEGORIES]
    return category_logits, sub_category_logits


# ----------------------------- main -------------------------------------------
if __name__ == "__main__":
    key = jax.random.PRNGKey(0)
    pkey, ikey = jax.random.split(key)
    params = init_params(pkey)

    B, S = 2, 8
    input_ids = jax.random.randint(ikey, (B, S), 0, VOCAB, dtype=jnp.int32)
    attention_mask = jnp.array([[1, 1, 1, 1, 1, 1, 1, 1],
                                [1, 1, 1, 1, 1, 1, 0, 0]], dtype=jnp.float32)

    fwd = jax.jit(functools.partial(bert_forward, params))
    category_logits, sub_category_logits = fwd(input_ids, attention_mask)
    jax.block_until_ready((category_logits, sub_category_logits))

    assert category_logits.shape == (B, NUM_CATEGORIES)
    assert sub_category_logits.shape == (B, NUM_SUB_CATEGORIES)
    assert jnp.all(jnp.isfinite(category_logits))
    assert jnp.all(jnp.isfinite(sub_category_logits))
    print("KERNEL_OK")
</pallas_src>

<mosaic_0001>
module attributes {stable_mosaic.version = 11 : i64} {
  func.func @_bert_fused_kernel(%arg0: memref<2x8xi32, #tpu.memory_space<smem>>, %arg1: memref<2x8xf32, #tpu.memory_space<vmem>>, %arg2: memref<512x128xf32, #tpu.memory_space<vmem>>, %arg3: memref<8x128xf32, #tpu.memory_space<vmem>>, %arg4: memref<1x128xf32, #tpu.memory_space<vmem>>, %arg5: memref<1x128xf32, #tpu.memory_space<vmem>>, %arg6: memref<2x128x384xbf16, #tpu.memory_space<vmem>>, %arg7: memref<2x1x384xf32, #tpu.memory_space<vmem>>, %arg8: memref<2x128x128xbf16, #tpu.memory_space<vmem>>, %arg9: memref<2x1x128xf32, #tpu.memory_space<vmem>>, %arg10: memref<2x1x128xf32, #tpu.memory_space<vmem>>, %arg11: memref<2x1x128xf32, #tpu.memory_space<vmem>>, %arg12: memref<2x128x256xbf16, #tpu.memory_space<vmem>>, %arg13: memref<2x1x256xf32, #tpu.memory_space<vmem>>, %arg14: memref<2x256x128xbf16, #tpu.memory_space<vmem>>, %arg15: memref<2x1x128xf32, #tpu.memory_space<vmem>>, %arg16: memref<2x1x128xf32, #tpu.memory_space<vmem>>, %arg17: memref<2x1x128xf32, #tpu.memory_space<vmem>>, %arg18: memref<128x128xbf16, #tpu.memory_space<vmem>>, %arg19: memref<1x128xf32, #tpu.memory_space<vmem>>, %arg20: memref<128x128xbf16, #tpu.memory_space<vmem>>, %arg21: memref<1x128xf32, #tpu.memory_space<vmem>>, %arg22: memref<2x128xf32, #tpu.memory_space<vmem>>, %arg23: memref<16x128xf32, #tpu.memory_space<vmem>>) attributes {dimension_semantics = [], scalar_prefetch = 0 : i64, scratch_operands = 1 : i64, tpu.core_type = #tpu.core_type<tc>} {
    %c0 = arith.constant 0 : index
    %c0_0 = arith.constant 0 : index
    %0 = memref.load %arg0[%c0, %c0_0] : memref<2x8xi32, #tpu.memory_space<smem>>
    %1 = arith.index_cast %0 : i32 to index
    %c0_1 = arith.constant 0 : index
    %2 = vector.load %arg2[%1, %c0_1] : memref<512x128xf32, #tpu.memory_space<vmem>>, vector<1x128xf32>
    %c0_2 = arith.constant 0 : index
    %c0_3 = arith.constant 0 : index
    %3 = vector.load %arg23[%c0_2, %c0_3] : memref<16x128xf32, #tpu.memory_space<vmem>>, vector<1x128xf32>
    tpu.vector_store %arg23[%c0_2, %c0_3], %2 {strides = array<i32>} : memref<16x128xf32, #tpu.memory_space<vmem>>, vector<1x128xf32>,
    %c0_4 = arith.constant 0 : index
    %c1 = arith.constant 1 : index
    %4 = memref.load %arg0[%c0_4, %c1] : memref<2x8xi32, #tpu.memory_space<smem>>
    %5 = arith.index_cast %4 : i32 to index
    %c0_5 = arith.constant 0 : index
    %6 = vector.load %arg2[%5, %c0_5] : memref<512x128xf32, #tpu.memory_space<vmem>>, vector<1x128xf32>
    %c1_6 = arith.constant 1 : index
    %c0_7 = arith.constant 0 : index
    %7 = vector.load %arg23[%c1_6, %c0_7] : memref<16x128xf32, #tpu.memory_space<vmem>>, vector<1x128xf32>
    tpu.vector_store %arg23[%c1_6, %c0_7], %6 {strides = array<i32>} : memref<16x128xf32, #tpu.memory_space<vmem>>, vector<1x128xf32>,
    %c0_8 = arith.constant 0 : index
    %c2 = arith.constant 2 : index
    %8 = memref.load %arg0[%c0_8, %c2] : memref<2x8xi32, #tpu.memory_space<smem>>
    %9 = arith.index_cast %8 : i32 to index
    %c0_9 = arith.constant 0 : index
    %10 = vector.load %arg2[%9, %c0_9] : memref<512x128xf32, #tpu.memory_space<vmem>>, vector<1x128xf32>
    %c2_10 = arith.constant 2 : index
    %c0_11 = arith.constant 0 : index
    %11 = vector.load %arg23[%c2_10, %c0_11] : memref<16x128xf32, #tpu.memory_space<vmem>>, vector<1x128xf32>
    tpu.vector_store %arg23[%c2_10, %c0_11], %10 {strides = array<i32>} : memref<16x128xf32, #tpu.memory_space<vmem>>, vector<1x128xf32>,
    %c0_12 = arith.constant 0 : index
    %c3 = arith.constant 3 : index
    %12 = memref.load %arg0[%c0_12, %c3] : memref<2x8xi32, #tpu.memory_space<smem>>
    %13 = arith.index_cast %12 : i32 to index
    %c0_13 = arith.constant 0 : index
    %14 = vector.load %arg2[%13, %c0_13] : memref<512x128xf32, #tpu.memory_space<vmem>>, vector<1x128xf32>
    %c3_14 = arith.constant 3 : index
    %c0_15 = arith.constant 0 : index
    %15 = vector.load %arg23[%c3_14, %c0_15] : memref<16x128xf32, #tpu.memory_space<vmem>>, vector<1x128xf32>
    tpu.vector_store %arg23[%c3_14, %c0_15], %14 {strides = array<i32>} : memref<16x128xf32, #tpu.memory_space<vmem>>, vector<1x128xf32>,
    %c0_16 = arith.constant 0 : index
    %c4 = arith.constant 4 : index
    %16 = memref.load %arg0[%c0_16, %c4] : memref<2x8xi32, #tpu.memory_space<smem>>
    %17 = arith.index_cast %16 : i32 to index
    %c0_17 = arith.constant 0 : index
    %18 = vector.load %arg2[%17, %c0_17] : memref<512x128xf32, #tpu.memory_space<vmem>>, vector<1x128xf32>
    %c4_18 = arith.constant 4 : index
    %c0_19 = arith.constant 0 : index
    %19 = vector.load %arg23[%c4_18, %c0_19] : memref<16x128xf32, #tpu.memory_space<vmem>>, vector<1x128xf32>
    tpu.vector_store %arg23[%c4_18, %c0_19], %18 {strides = array<i32>} : memref<16x128xf32, #tpu.memory_space<vmem>>, vector<1x128xf32>,
    %c0_20 = arith.constant 0 : index
    %c5 = arith.constant 5 : index
    %20 = memref.load %arg0[%c0_20, %c5] : memref<2x8xi32, #tpu.memory_space<smem>>
    %21 = arith.index_cast %20 : i32 to index
    %c0_21 = arith.constant 0 : index
    %22 = vector.load %arg2[%21, %c0_21] : memref<512x128xf32, #tpu.memory_space<vmem>>, vector<1x128xf32>
    %c5_22 = arith.constant 5 : index
    %c0_23 = arith.constant 0 : index
    %23 = vector.load %arg23[%c5_22, %c0_23] : memref<16x128xf32, #tpu.memory_space<vmem>>, vector<1x128xf32>
    tpu.vector_store %arg23[%c5_22, %c0_23], %22 {strides = array<i32>} : memref<16x128xf32, #tpu.memory_space<vmem>>, vector<1x128xf32>,
    %c0_24 = arith.constant 0 : index
    %c6 = arith.constant 6 : index
    %24 = memref.load %arg0[%c0_24, %c6] : memref<2x8xi32, #tpu.memory_space<smem>>
    %25 = arith.index_cast %24 : i32 to index
    %c0_25 = arith.constant 0 : index
    %26 = vector.load %arg2[%25, %c0_25] : memref<512x128xf32, #tpu.memory_space<vmem>>, vector<1x128xf32>
    %c6_26 = arith.constant 6 : index
    %c0_27 = arith.constant 0 : index
    %27 = vector.load %arg23[%c6_26, %c0_27] : memref<16x128xf32, #tpu.memory_space<vmem>>, vector<1x128xf32>
    tpu.vector_store %arg23[%c6_26, %c0_27], %26 {strides = array<i32>} : memref<16x128xf32, #tpu.memory_space<vmem>>, vector<1x128xf32>,
    %c0_28 = arith.constant 0 : index
    %c7 = arith.constant 7 : index
    %28 = memref.load %arg0[%c0_28, %c7] : memref<2x8xi32, #tpu.memory_space<smem>>
    %29 = arith.index_cast %28 : i32 to index
    %c0_29 = arith.constant 0 : index
    %30 = vector.load %arg2[%29, %c0_29] : memref<512x128xf32, #tpu.memory_space<vmem>>, vector<1x128xf32>
    %c7_30 = arith.constant 7 : index
    %c0_31 = arith.constant 0 : index
    %31 = vector.load %arg23[%c7_30, %c0_31] : memref<16x128xf32, #tpu.memory_space<vmem>>, vector<1x128xf32>
    tpu.vector_store %arg23[%c7_30, %c0_31], %30 {strides = array<i32>} : memref<16x128xf32, #tpu.memory_space<vmem>>, vector<1x128xf32>,
    %c1_32 = arith.constant 1 : index
    %c0_33 = arith.constant 0 : index
    %32 = memref.load %arg0[%c1_32, %c0_33] : memref<2x8xi32, #tpu.memory_space<smem>>
    %33 = arith.index_cast %32 : i32 to index
    %c0_34 = arith.constant 0 : index
    %34 = vector.load %arg2[%33, %c0_34] : memref<512x128xf32, #tpu.memory_space<vmem>>, vector<1x128xf32>
    %c8 = arith.constant 8 : index
    %c0_35 = arith.constant 0 : index
    %35 = vector.load %arg23[%c8, %c0_35] : memref<16x128xf32, #tpu.memory_space<vmem>>, vector<1x128xf32>
    tpu.vector_store %arg23[%c8, %c0_35], %34 {strides = array<i32>} : memref<16x128xf32, #tpu.memory_space<vmem>>, vector<1x128xf32>,
    %c1_36 = arith.constant 1 : index
    %c1_37 = arith.constant 1 : index
    %36 = memref.load %arg0[%c1_36, %c1_37] : memref<2x8xi32, #tpu.memory_space<smem>>
    %37 = arith.index_cast %36 : i32 to index
    %c0_38 = arith.constant 0 : index
    %38 = vector.load %arg2[%37, %c0_38] : memref<512x128xf32, #tpu.memory_space<vmem>>, vector<1x128xf32>
    %c9 = arith.constant 9 : index
    %c0_39 = arith.constant 0 : index
    %39 = vector.load %arg23[%c9, %c0_39] : memref<16x128xf32, #tpu.memory_space<vmem>>, vector<1x128xf32>
    tpu.vector_store %arg23[%c9, %c0_39], %38 {strides = array<i32>} : memref<16x128xf32, #tpu.memory_space<vmem>>, vector<1x128xf32>,
    %c1_40 = arith.constant 1 : index
    %c2_41 = arith.constant 2 : index
    %40 = memref.load %arg0[%c1_40, %c2_41] : memref<2x8xi32, #tpu.memory_space<smem>>
    %41 = arith.index_cast %40 : i32 to index
    %c0_42 = arith.constant 0 : index
    %42 = vector.load %arg2[%41, %c0_42] : memref<512x128xf32, #tpu.memory_space<vmem>>, vector<1x128xf32>
    %c10 = arith.constant 10 : index
    %c0_43 = arith.constant 0 : index
    %43 = vector.load %arg23[%c10, %c0_43] : memref<16x128xf32, #tpu.memory_space<vmem>>, vector<1x128xf32>
    tpu.vector_store %arg23[%c10, %c0_43], %42 {strides = array<i32>} : memref<16x128xf32, #tpu.memory_space<vmem>>, vector<1x128xf32>,
    %c1_44 = arith.constant 1 : index
    %c3_45 = arith.constant 3 : index
    %44 = memref.load %arg0[%c1_44, %c3_45] : memref<2x8xi32, #tpu.memory_space<smem>>
    %45 = arith.index_cast %44 : i32 to index
    %c0_46 = arith.constant 0 : index
    %46 = vector.load %arg2[%45, %c0_46] : memref<512x128xf32, #tpu.memory_space<vmem>>, vector<1x128xf32>
    %c11 = arith.constant 11 : index
    %c0_47 = arith.constant 0 : index
    %47 = vector.load %arg23[%c11, %c0_47] : memref<16x128xf32, #tpu.memory_space<vmem>>, vector<1x128xf32>
    tpu.vector_store %arg23[%c11, %c0_47], %46 {strides = array<i32>} : memref<16x128xf32, #tpu.memory_space<vmem>>, vector<1x128xf32>,
    %c1_48 = arith.constant 1 : index
    %c4_49 = arith.constant 4 : index
    %48 = memref.load %arg0[%c1_48, %c4_49] : memref<2x8xi32, #tpu.memory_space<smem>>
    %49 = arith.index_cast %48 : i32 to index
    %c0_50 = arith.constant 0 : index
    %50 = vector.load %arg2[%49, %c0_50] : memref<512x128xf32, #tpu.memory_space<vmem>>, vector<1x128xf32>
    %c12 = arith.constant 12 : index
    %c0_51 = arith.constant 0 : index
    %51 = vector.load %arg23[%c12, %c0_51] : memref<16x128xf32, #tpu.memory_space<vmem>>, vector<1x128xf32>
    tpu.vector_store %arg23[%c12, %c0_51], %50 {strides = array<i32>} : memref<16x128xf32, #tpu.memory_space<vmem>>, vector<1x128xf32>,
    %c1_52 = arith.constant 1 : index
    %c5_53 = arith.constant 5 : index
    %52 = memref.load %arg0[%c1_52, %c5_53] : memref<2x8xi32, #tpu.memory_space<smem>>
    %53 = arith.index_cast %52 : i32 to index
    %c0_54 = arith.constant 0 : index
    %54 = vector.load %arg2[%53, %c0_54] : memref<512x128xf32, #tpu.memory_space<vmem>>, vector<1x128xf32>
    %c13 = arith.constant 13 : index
    %c0_55 = arith.constant 0 : index
    %55 = vector.load %arg23[%c13, %c0_55] : memref<16x128xf32, #tpu.memory_space<vmem>>, vector<1x128xf32>
    tpu.vector_store %arg23[%c13, %c0_55], %54 {strides = array<i32>} : memref<16x128xf32, #tpu.memory_space<vmem>>, vector<1x128xf32>,
    %c1_56 = arith.constant 1 : index
    %c6_57 = arith.constant 6 : index
    %56 = memref.load %arg0[%c1_56, %c6_57] : memref<2x8xi32, #tpu.memory_space<smem>>
    %57 = arith.index_cast %56 : i32 to index
    %c0_58 = arith.constant 0 : index
    %58 = vector.load %arg2[%57, %c0_58] : memref<512x128xf32, #tpu.memory_space<vmem>>, vector<1x128xf32>
    %c14 = arith.constant 14 : index
    %c0_59 = arith.constant 0 : index
    %59 = vector.load %arg23[%c14, %c0_59] : memref<16x128xf32, #tpu.memory_space<vmem>>, vector<1x128xf32>
    tpu.vector_store %arg23[%c14, %c0_59], %58 {strides = array<i32>} : memref<16x128xf32, #tpu.memory_space<vmem>>, vector<1x128xf32>,
    %c1_60 = arith.constant 1 : index
    %c7_61 = arith.constant 7 : index
    %60 = memref.load %arg0[%c1_60, %c7_61] : memref<2x8xi32, #tpu.memory_space<smem>>
    %61 = arith.index_cast %60 : i32 to index
    %c0_62 = arith.constant 0 : index
    %62 = vector.load %arg2[%61, %c0_62] : memref<512x128xf32, #tpu.memory_space<vmem>>, vector<1x128xf32>
    %c15 = arith.constant 15 : index
    %c0_63 = arith.constant 0 : index
    %63 = vector.load %arg23[%c15, %c0_63] : memref<16x128xf32, #tpu.memory_space<vmem>>, vector<1x128xf32>
    tpu.vector_store %arg23[%c15, %c0_63], %62 {strides = array<i32>} : memref<16x128xf32, #tpu.memory_space<vmem>>, vector<1x128xf32>,
    %c0_64 = arith.constant 0 : index
    %c0_65 = arith.constant 0 : index
    %64 = vector.load %arg3[%c0_64, %c0_65] : memref<8x128xf32, #tpu.memory_space<vmem>>, vector<8x128xf32>
    %c0_66 = arith.constant 0 : index
    %c0_67 = arith.constant 0 : index
    %65 = vector.load %arg23[%c0_66, %c0_67] : memref<16x128xf32, #tpu.memory_space<vmem>>, vector<16x128xf32>
    %66 = tpu.concatenate %64, %64 in 0 : vector<8x128xf32>, vector<8x128xf32> -> vector<16x128xf32>
    %67 = arith.addf %65, %66 : vector<16x128xf32>
    %c0_68 = arith.constant 0 : index
    %c0_69 = arith.constant 0 : index
    %68 = vector.load %arg4[%c0_68, %c0_69] : memref<1x128xf32, #tpu.memory_space<vmem>>, vector<1x128xf32>
    %c0_70 = arith.constant 0 : index
    %c0_71 = arith.constant 0 : index
    %69 = vector.load %arg5[%c0_70, %c0_71] : memref<1x128xf32, #tpu.memory_space<vmem>>, vector<1x128xf32>
    %cst = arith.constant dense<0.000000e+00> : vector<16xf32>
    %70 = vector.multi_reduction <add>, %67, %cst [1] : vector<16x128xf32> to vector<16xf32>
    %71 = vector.shape_cast %70 : vector<16xf32> to vector<16x1xf32>
    %cst_72 = arith.constant 1.280000e+02 : f32
    %72 = vector.broadcast %cst_72 : f32 to vector<16x1xf32>
    %73 = arith.divf %71, %72 : vector<16x1xf32>
    %74 = vector.broadcast %73 : vector<16x1xf32> to vector<16x128xf32>
    %75 = arith.subf %67, %74 : vector<16x128xf32>
    %76 = arith.mulf %75, %75 : vector<16x128xf32>
    %cst_73 = arith.constant dense<0.000000e+00> : vector<16xf32>
    %77 = vector.multi_reduction <add>, %76, %cst_73 [1] : vector<16x128xf32> to vector<16xf32>
    %78 = vector.shape_cast %77 : vector<16xf32> to vector<16x1xf32>
    %cst_74 = arith.constant 1.280000e+02 : f32
    %79 = vector.broadcast %cst_74 : f32 to vector<16x1xf32>
    %80 = arith.divf %78, %79 : vector<16x1xf32>
    %cst_75 = arith.constant 9.99999996E-13 : f32
    %81 = vector.broadcast %cst_75 : f32 to vector<16x1xf32>
    %82 = arith.addf %80, %81 : vector<16x1xf32>
    %83 = math.rsqrt %82 : vector<16x1xf32>
    %84 = vector.broadcast %83 : vector<16x1xf32> to vector<16x128xf32>
    %85 = arith.mulf %75, %84 : vector<16x128xf32>
    %86 = vector.broadcast %68 : vector<1x128xf32> to vector<16x128xf32>
    %87 = arith.mulf %85, %86 : vector<16x128xf32>
    %88 = vector.broadcast %69 : vector<1x128xf32> to vector<16x128xf32>
    %89 = arith.addf %87, %88 : vector<16x128xf32>
    %c0_76 = arith.constant 0 : index
    %c0_77 = arith.constant 0 : index
    %90 = vector.load %arg1[%c0_76, %c0_77] : memref<2x8xf32, #tpu.memory_space<vmem>>, vector<2x8xf32>
    %cst_78 = arith.constant 1.000000e+00 : f32
    %91 = vector.broadcast %cst_78 : f32 to vector<2x8xf32>
    %92 = arith.subf %91, %90 : vector<2x8xf32>
    %cst_79 = arith.constant -1.000000e+04 : f32
    %93 = vector.broadcast %cst_79 : f32 to vector<2x8xf32>
    %94 = arith.mulf %92, %93 : vector<2x8xf32>
    %95 = vector.shape_cast %94 : vector<2x8xf32> to vector<2x1x8xf32>
    %c0_80 = arith.constant 0 : index
    %c0_81 = arith.constant 0 : index
    %c0_82 = arith.constant 0 : index
    %96 = vector.load %arg6[%c0_80, %c0_81, %c0_82] : memref<2x128x384xbf16, #tpu.memory_space<vmem>>, vector<1x128x384xbf16>
    %97 = vector.shape_cast %96 : vector<1x128x384xbf16> to vector<128x384xbf16>
    %c0_83 = arith.constant 0 : index
    %c0_84 = arith.constant 0 : index
    %c0_85 = arith.constant 0 : index
    %98 = vector.load %arg7[%c0_83, %c0_84, %c0_85] : memref<2x1x384xf32, #tpu.memory_space<vmem>>, vector<1x1x384xf32>
    %99 = vector.shape_cast %98 : vector<1x1x384xf32> to vector<1x384xf32>
    %100 = arith.truncf %89 : vector<16x128xf32> to vector<16x128xbf16>
    %cst_86 = arith.constant dense<0.000000e+00> : vector<16x384xf32>
    %101 = tpu.matmul %100, %97, %cst_86 {dimension_numbers = #tpu.dot_dimension_numbers<[1], [0], [0], [1], [0, 0, 1, 1], [], []>} : vector<16x128xbf16>, vector<128x384xbf16>, vector<16x384xf32> -> vector<16x384xf32>
    %102 = vector.broadcast %99 : vector<1x384xf32> to vector<16x384xf32>
    %103 = arith.addf %101, %102 : vector<16x384xf32>
    %c0_87 = arith.constant 0 : index
    %c0_88 = arith.constant 0 : index
    %c0_89 = arith.constant 0 : index
    %104 = vector.load %arg8[%c0_87, %c0_88, %c0_89] : memref<2x128x128xbf16, #tpu.memory_space<vmem>>, vector<1x128x128xbf16>
    %105 = vector.shape_cast %104 : vector<1x128x128xbf16> to vector<128x128xbf16>
    %106 = vector.extract_strided_slice %103 {offsets = [0, 0], sizes = [16, 64], strides = [1, 1]} : vector<16x384xf32> to vector<16x64xf32>
    %107 = vector.shape_cast %106 : vector<16x64xf32> to vector<2x8x64xf32>
    %108 = vector.extract_strided_slice %103 {offsets = [0, 128], sizes = [16, 64], strides = [1, 1]} : vector<16x384xf32> to vector<16x64xf32>
    %109 = vector.shape_cast %108 : vector<16x64xf32> to vector<2x8x64xf32>
    %110 = vector.extract_strided_slice %103 {offsets = [0, 256], sizes = [16, 64], strides = [1, 1]} : vector<16x384xf32> to vector<16x64xf32>
    %111 = vector.shape_cast %110 : vector<16x64xf32> to vector<2x8x64xf32>
    "tpu.trace_start"() <{level = 10 : i32, message = "bqd,bkd->bqk"}> : () -> ()
    %cst_90 = arith.constant dense<0.000000e+00> : vector<2x8x8xf32>
    %112 = tpu.matmul %107, %109, %cst_90 {dimension_numbers = #tpu.dot_dimension_numbers<[2], [2], [1], [1], [0, 0, 0, 1, 1, 1], [0], [0]>} : vector<2x8x64xf32>, vector<2x8x64xf32>, vector<2x8x8xf32> -> vector<2x8x8xf32>
    "tpu.trace_stop"() : () -> ()
    %113 = vector.broadcast %95 : vector<2x1x8xf32> to vector<2x8x8xf32>
    %114 = arith.addf %112, %113 : vector<2x8x8xf32>
    %cst_91 = arith.constant dense<0xFF800000> : vector<2x8xf32>
    %115 = vector.multi_reduction <maximumf>, %114, %cst_91 [2] : vector<2x8x8xf32> to vector<2x8xf32>
    %116 = vector.shape_cast %115 : vector<2x8xf32> to vector<2x8x1xf32>
    %117 = vector.broadcast %116 : vector<2x8x1xf32> to vector<2x8x8xf32>
    %118 = arith.subf %114, %117 : vector<2x8x8xf32>
    %119 = math.exp %118 : vector<2x8x8xf32>
    %cst_92 = arith.constant dense<0.000000e+00> : vector<2x8xf32>
    %120 = vector.multi_reduction <add>, %119, %cst_92 [2] : vector<2x8x8xf32> to vector<2x8xf32>
    %121 = vector.shape_cast %120 : vector<2x8xf32> to vector<2x8x1xf32>
    %122 = vector.broadcast %121 : vector<2x8x1xf32> to vector<2x8x8xf32>
    %123 = arith.divf %119, %122 : vector<2x8x8xf32>
    "tpu.trace_start"() <{level = 10 : i32, message = "bqk,bkd->bqd"}> : () -> ()
    %cst_93 = arith.constant dense<0.000000e+00> : vector<2x8x64xf32>
    %124 = tpu.matmul %123, %111, %cst_93 {dimension_numbers = #tpu.dot_dimension_numbers<[2], [1], [1], [2], [0, 0, 0, 1, 1, 2], [0], [0]>} : vector<2x8x8xf32>, vector<2x8x64xf32>, vector<2x8x64xf32> -> vector<2x8x64xf32>
    "tpu.trace_stop"() : () -> ()
    %125 = vector.shape_cast %124 : vector<2x8x64xf32> to vector<16x64xf32>
    %126 = arith.truncf %125 : vector<16x64xf32> to vector<16x64xbf16>
    %127 = vector.extract_strided_slice %105 {offsets = [0, 0], sizes = [64, 128], strides = [1, 1]} : vector<128x128xbf16> to vector<64x128xbf16>
    %cst_94 = arith.constant dense<0.000000e+00> : vector<16x128xf32>
    %128 = tpu.matmul %126, %127, %cst_94 {dimension_numbers = #tpu.dot_dimension_numbers<[1], [0], [0], [1], [0, 0, 1, 1], [], []>} : vector<16x64xbf16>, vector<64x128xbf16>, vector<16x128xf32> -> vector<16x128xf32>
    %129 = vector.extract_strided_slice %103 {offsets = [0, 64], sizes = [16, 64], strides = [1, 1]} : vector<16x384xf32> to vector<16x64xf32>
    %130 = vector.shape_cast %129 : vector<16x64xf32> to vector<2x8x64xf32>
    %131 = vector.extract_strided_slice %103 {offsets = [0, 192], sizes = [16, 64], strides = [1, 1]} : vector<16x384xf32> to vector<16x64xf32>
    %132 = vector.shape_cast %131 : vector<16x64xf32> to vector<2x8x64xf32>
    %133 = vector.extract_strided_slice %103 {offsets = [0, 320], sizes = [16, 64], strides = [1, 1]} : vector<16x384xf32> to vector<16x64xf32>
    %134 = vector.shape_cast %133 : vector<16x64xf32> to vector<2x8x64xf32>
    "tpu.trace_start"() <{level = 10 : i32, message = "bqd,bkd->bqk"}> : () -> ()
    %cst_95 = arith.constant dense<0.000000e+00> : vector<2x8x8xf32>
    %135 = tpu.matmul %130, %132, %cst_95 {dimension_numbers = #tpu.dot_dimension_numbers<[2], [2], [1], [1], [0, 0, 0, 1, 1, 1], [0], [0]>} : vector<2x8x64xf32>, vector<2x8x64xf32>, vector<2x8x8xf32> -> vector<2x8x8xf32>
    "tpu.trace_stop"() : () -> ()
    %136 = vector.broadcast %95 : vector<2x1x8xf32> to vector<2x8x8xf32>
    %137 = arith.addf %135, %136 : vector<2x8x8xf32>
    %cst_96 = arith.constant dense<0xFF800000> : vector<2x8xf32>
    %138 = vector.multi_reduction <maximumf>, %137, %cst_96 [2] : vector<2x8x8xf32> to vector<2x8xf32>
    %139 = vector.shape_cast %138 : vector<2x8xf32> to vector<2x8x1xf32>
    %140 = vector.broadcast %139 : vector<2x8x1xf32> to vector<2x8x8xf32>
    %141 = arith.subf %137, %140 : vector<2x8x8xf32>
    %142 = math.exp %141 : vector<2x8x8xf32>
    %cst_97 = arith.constant dense<0.000000e+00> : vector<2x8xf32>
    %143 = vector.multi_reduction <add>, %142, %cst_97 [2] : vector<2x8x8xf32> to vector<2x8xf32>
    %144 = vector.shape_cast %143 : vector<2x8xf32> to vector<2x8x1xf32>
    %145 = vector.broadcast %144 : vector<2x8x1xf32> to vector<2x8x8xf32>
    %146 = arith.divf %142, %145 : vector<2x8x8xf32>
    "tpu.trace_start"() <{level = 10 : i32, message = "bqk,bkd->bqd"}> : () -> ()
    %cst_98 = arith.constant dense<0.000000e+00> : vector<2x8x64xf32>
    %147 = tpu.matmul %146, %134, %cst_98 {dimension_numbers = #tpu.dot_dimension_numbers<[2], [1], [1], [2], [0, 0, 0, 1, 1, 2], [0], [0]>} : vector<2x8x8xf32>, vector<2x8x64xf32>, vector<2x8x64xf32> -> vector<2x8x64xf32>
    "tpu.trace_stop"() : () -> ()
    %148 = vector.shape_cast %147 : vector<2x8x64xf32> to vector<16x64xf32>
    %149 = arith.truncf %148 : vector<16x64xf32> to vector<16x64xbf16>
    %150 = vector.extract_strided_slice %105 {offsets = [64, 0], sizes = [64, 128], strides = [1, 1]} : vector<128x128xbf16> to vector<64x128xbf16>
    %cst_99 = arith.constant dense<0.000000e+00> : vector<16x128xf32>
    %151 = tpu.matmul %149, %150, %cst_99 {dimension_numbers = #tpu.dot_dimension_numbers<[1], [0], [0], [1], [0, 0, 1, 1], [], []>} : vector<16x64xbf16>, vector<64x128xbf16>, vector<16x128xf32> -> vector<16x128xf32>
    %152 = arith.addf %128, %151 : vector<16x128xf32>
    %c0_100 = arith.constant 0 : index
    %c0_101 = arith.constant 0 : index
    %c0_102 = arith.constant 0 : index
    %153 = vector.load %arg9[%c0_100, %c0_101, %c0_102] : memref<2x1x128xf32, #tpu.memory_space<vmem>>, vector<1x1x128xf32>
    %154 = vector.shape_cast %153 : vector<1x1x128xf32> to vector<1x128xf32>
    %155 = vector.broadcast %154 : vector<1x128xf32> to vector<16x128xf32>
    %156 = arith.addf %152, %155 : vector<16x128xf32>
    %157 = arith.addf %156, %89 : vector<16x128xf32>
    %c0_103 = arith.constant 0 : index
    %c0_104 = arith.constant 0 : index
    %c0_105 = arith.constant 0 : index
    %158 = vector.load %arg10[%c0_103, %c0_104, %c0_105] : memref<2x1x128xf32, #tpu.memory_space<vmem>>, vector<1x1x128xf32>
    %159 = vector.shape_cast %158 : vector<1x1x128xf32> to vector<1x128xf32>
    %c0_106 = arith.constant 0 : index
    %c0_107 = arith.constant 0 : index
    %c0_108 = arith.constant 0 : index
    %160 = vector.load %arg11[%c0_106, %c0_107, %c0_108] : memref<2x1x128xf32, #tpu.memory_space<vmem>>, vector<1x1x128xf32>
    %161 = vector.shape_cast %160 : vector<1x1x128xf32> to vector<1x128xf32>
    %cst_109 = arith.constant dense<0.000000e+00> : vector<16xf32>
    %162 = vector.multi_reduction <add>, %157, %cst_109 [1] : vector<16x128xf32> to vector<16xf32>
    %163 = vector.shape_cast %162 : vector<16xf32> to vector<16x1xf32>
    %cst_110 = arith.constant 1.280000e+02 : f32
    %164 = vector.broadcast %cst_110 : f32 to vector<16x1xf32>
    %165 = arith.divf %163, %164 : vector<16x1xf32>
    %166 = vector.broadcast %165 : vector<16x1xf32> to vector<16x128xf32>
    %167 = arith.subf %157, %166 : vector<16x128xf32>
    %168 = arith.mulf %167, %167 : vector<16x128xf32>
    %cst_111 = arith.constant dense<0.000000e+00> : vector<16xf32>
    %169 = vector.multi_reduction <add>, %168, %cst_111 [1] : vector<16x128xf32> to vector<16xf32>
    %170 = vector.shape_cast %169 : vector<16xf32> to vector<16x1xf32>
    %cst_112 = arith.constant 1.280000e+02 : f32
    %171 = vector.broadcast %cst_112 : f32 to vector<16x1xf32>
    %172 = arith.divf %170, %171 : vector<16x1xf32>
    %cst_113 = arith.constant 9.99999996E-13 : f32
    %173 = vector.broadcast %cst_113 : f32 to vector<16x1xf32>
    %174 = arith.addf %172, %173 : vector<16x1xf32>
    %175 = math.rsqrt %174 : vector<16x1xf32>
    %176 = vector.broadcast %175 : vector<16x1xf32> to vector<16x128xf32>
    %177 = arith.mulf %167, %176 : vector<16x128xf32>
    %178 = vector.broadcast %159 : vector<1x128xf32> to vector<16x128xf32>
    %179 = arith.mulf %177, %178 : vector<16x128xf32>
    %180 = vector.broadcast %161 : vector<1x128xf32> to vector<16x128xf32>
    %181 = arith.addf %179, %180 : vector<16x128xf32>
    %c0_114 = arith.constant 0 : index
    %c0_115 = arith.constant 0 : index
    %c0_116 = arith.constant 0 : index
    %182 = vector.load %arg12[%c0_114, %c0_115, %c0_116] : memref<2x128x256xbf16, #tpu.memory_space<vmem>>, vector<1x128x256xbf16>
    %183 = vector.shape_cast %182 : vector<1x128x256xbf16> to vector<128x256xbf16>
    %c0_117 = arith.constant 0 : index
    %c0_118 = arith.constant 0 : index
    %c0_119 = arith.constant 0 : index
    %184 = vector.load %arg13[%c0_117, %c0_118, %c0_119] : memref<2x1x256xf32, #tpu.memory_space<vmem>>, vector<1x1x256xf32>
    %185 = vector.shape_cast %184 : vector<1x1x256xf32> to vector<1x256xf32>
    %186 = arith.truncf %181 : vector<16x128xf32> to vector<16x128xbf16>
    %cst_120 = arith.constant dense<0.000000e+00> : vector<16x256xf32>
    %187 = tpu.matmul %186, %183, %cst_120 {dimension_numbers = #tpu.dot_dimension_numbers<[1], [0], [0], [1], [0, 0, 1, 1], [], []>} : vector<16x128xbf16>, vector<128x256xbf16>, vector<16x256xf32> -> vector<16x256xf32>
    %188 = vector.broadcast %185 : vector<1x256xf32> to vector<16x256xf32>
    %189 = arith.addf %187, %188 : vector<16x256xf32>
    %cst_121 = arith.constant 5.000000e-01 : f32
    %190 = vector.broadcast %cst_121 : f32 to vector<16x256xf32>
    %191 = arith.mulf %190, %189 : vector<16x256xf32>
    %cst_122 = arith.constant 4.471500e-02 : f32
    %192 = vector.broadcast %cst_122 : f32 to vector<16x256xf32>
    %193 = arith.mulf %192, %189 : vector<16x256xf32>
    %194 = arith.mulf %193, %189 : vector<16x256xf32>
    %195 = arith.mulf %194, %189 : vector<16x256xf32>
    %196 = arith.addf %189, %195 : vector<16x256xf32>
    %cst_123 = arith.constant 0.797884583 : f32
    %197 = vector.broadcast %cst_123 : f32 to vector<16x256xf32>
    %198 = arith.mulf %197, %196 : vector<16x256xf32>
    %199 = math.tanh %198 : vector<16x256xf32>
    %cst_124 = arith.constant 1.000000e+00 : f32
    %200 = vector.broadcast %cst_124 : f32 to vector<16x256xf32>
    %201 = arith.addf %200, %199 : vector<16x256xf32>
    %202 = arith.mulf %191, %201 : vector<16x256xf32>
    %c0_125 = arith.constant 0 : index
    %c0_126 = arith.constant 0 : index
    %c0_127 = arith.constant 0 : index
    %203 = vector.load %arg14[%c0_125, %c0_126, %c0_127] : memref<2x256x128xbf16, #tpu.memory_space<vmem>>, vector<1x256x128xbf16>
    %204 = vector.shape_cast %203 : vector<1x256x128xbf16> to vector<256x128xbf16>
    %c0_128 = arith.constant 0 : index
    %c0_129 = arith.constant 0 : index
    %c0_130 = arith.constant 0 : index
    %205 = vector.load %arg15[%c0_128, %c0_129, %c0_130] : memref<2x1x128xf32, #tpu.memory_space<vmem>>, vector<1x1x128xf32>
    %206 = vector.shape_cast %205 : vector<1x1x128xf32> to vector<1x128xf32>
    %207 = arith.truncf %202 : vector<16x256xf32> to vector<16x256xbf16>
    %cst_131 = arith.constant dense<0.000000e+00> : vector<16x128xf32>
    %208 = tpu.matmul %207, %204, %cst_131 {dimension_numbers = #tpu.dot_dimension_numbers<[1], [0], [0], [1], [0, 0, 1, 1], [], []>} : vector<16x256xbf16>, vector<256x128xbf16>, vector<16x128xf32> -> vector<16x128xf32>
    %209 = vector.broadcast %206 : vector<1x128xf32> to vector<16x128xf32>
    %210 = arith.addf %208, %209 : vector<16x128xf32>
    %211 = arith.addf %210, %181 : vector<16x128xf32>
    %c0_132 = arith.constant 0 : index
    %c0_133 = arith.constant 0 : index
    %c0_134 = arith.constant 0 : index
    %212 = vector.load %arg16[%c0_132, %c0_133, %c0_134] : memref<2x1x128xf32, #tpu.memory_space<vmem>>, vector<1x1x128xf32>
    %213 = vector.shape_cast %212 : vector<1x1x128xf32> to vector<1x128xf32>
    %c0_135 = arith.constant 0 : index
    %c0_136 = arith.constant 0 : index
    %c0_137 = arith.constant 0 : index
    %214 = vector.load %arg17[%c0_135, %c0_136, %c0_137] : memref<2x1x128xf32, #tpu.memory_space<vmem>>, vector<1x1x128xf32>
    %215 = vector.shape_cast %214 : vector<1x1x128xf32> to vector<1x128xf32>
    %cst_138 = arith.constant dense<0.000000e+00> : vector<16xf32>
    %216 = vector.multi_reduction <add>, %211, %cst_138 [1] : vector<16x128xf32> to vector<16xf32>
    %217 = vector.shape_cast %216 : vector<16xf32> to vector<16x1xf32>
    %cst_139 = arith.constant 1.280000e+02 : f32
    %218 = vector.broadcast %cst_139 : f32 to vector<16x1xf32>
    %219 = arith.divf %217, %218 : vector<16x1xf32>
    %220 = vector.broadcast %219 : vector<16x1xf32> to vector<16x128xf32>
    %221 = arith.subf %211, %220 : vector<16x128xf32>
    %222 = arith.mulf %221, %221 : vector<16x128xf32>
    %cst_140 = arith.constant dense<0.000000e+00> : vector<16xf32>
    %223 = vector.multi_reduction <add>, %222, %cst_140 [1] : vector<16x128xf32> to vector<16xf32>
    %224 = vector.shape_cast %223 : vector<16xf32> to vector<16x1xf32>
    %cst_141 = arith.constant 1.280000e+02 : f32
    %225 = vector.broadcast %cst_141 : f32 to vector<16x1xf32>
    %226 = arith.divf %224, %225 : vector<16x1xf32>
    %cst_142 = arith.constant 9.99999996E-13 : f32
    %227 = vector.broadcast %cst_142 : f32 to vector<16x1xf32>
    %228 = arith.addf %226, %227 : vector<16x1xf32>
    %229 = math.rsqrt %228 : vector<16x1xf32>
    %230 = vector.broadcast %229 : vector<16x1xf32> to vector<16x128xf32>
    %231 = arith.mulf %221, %230 : vector<16x128xf32>
    %232 = vector.broadcast %213 : vector<1x128xf32> to vector<16x128xf32>
    %233 = arith.mulf %231, %232 : vector<16x128xf32>
    %234 = vector.broadcast %215 : vector<1x128xf32> to vector<16x128xf32>
    %235 = arith.addf %233, %234 : vector<16x128xf32>
    %c1_143 = arith.constant 1 : index
    %c0_144 = arith.constant 0 : index
    %c0_145 = arith.constant 0 : index
    %236 = vector.load %arg6[%c1_143, %c0_144, %c0_145] : memref<2x128x384xbf16, #tpu.memory_space<vmem>>, vector<1x128x384xbf16>
    %237 = vector.shape_cast %236 : vector<1x128x384xbf16> to vector<128x384xbf16>
    %c1_146 = arith.constant 1 : index
    %c0_147 = arith.constant 0 : index
    %c0_148 = arith.constant 0 : index
    %238 = vector.load %arg7[%c1_146, %c0_147, %c0_148] : memref<2x1x384xf32, #tpu.memory_space<vmem>>, vector<1x1x384xf32>
    %239 = vector.shape_cast %238 : vector<1x1x384xf32> to vector<1x384xf32>
    %240 = arith.truncf %235 : vector<16x128xf32> to vector<16x128xbf16>
    %cst_149 = arith.constant dense<0.000000e+00> : vector<16x384xf32>
    %241 = tpu.matmul %240, %237, %cst_149 {dimension_numbers = #tpu.dot_dimension_numbers<[1], [0], [0], [1], [0, 0, 1, 1], [], []>} : vector<16x128xbf16>, vector<128x384xbf16>, vector<16x384xf32> -> vector<16x384xf32>
    %242 = vector.broadcast %239 : vector<1x384xf32> to vector<16x384xf32>
    %243 = arith.addf %241, %242 : vector<16x384xf32>
    %c1_150 = arith.constant 1 : index
    %c0_151 = arith.constant 0 : index
    %c0_152 = arith.constant 0 : index
    %244 = vector.load %arg8[%c1_150, %c0_151, %c0_152] : memref<2x128x128xbf16, #tpu.memory_space<vmem>>, vector<1x128x128xbf16>
    %245 = vector.shape_cast %244 : vector<1x128x128xbf16> to vector<128x128xbf16>
    %246 = vector.extract_strided_slice %243 {offsets = [0, 0], sizes = [16, 64], strides = [1, 1]} : vector<16x384xf32> to vector<16x64xf32>
    %247 = vector.shape_cast %246 : vector<16x64xf32> to vector<2x8x64xf32>
    %248 = vector.extract_strided_slice %243 {offsets = [0, 128], sizes = [16, 64], strides = [1, 1]} : vector<16x384xf32> to vector<16x64xf32>
    %249 = vector.shape_cast %248 : vector<16x64xf32> to vector<2x8x64xf32>
    %250 = vector.extract_strided_slice %243 {offsets = [0, 256], sizes = [16, 64], strides = [1, 1]} : vector<16x384xf32> to vector<16x64xf32>
    %251 = vector.shape_cast %250 : vector<16x64xf32> to vector<2x8x64xf32>
    "tpu.trace_start"() <{level = 10 : i32, message = "bqd,bkd->bqk"}> : () -> ()
    %cst_153 = arith.constant dense<0.000000e+00> : vector<2x8x8xf32>
    %252 = tpu.matmul %247, %249, %cst_153 {dimension_numbers = #tpu.dot_dimension_numbers<[2], [2], [1], [1], [0, 0, 0, 1, 1, 1], [0], [0]>} : vector<2x8x64xf32>, vector<2x8x64xf32>, vector<2x8x8xf32> -> vector<2x8x8xf32>
    "tpu.trace_stop"() : () -> ()
    %253 = vector.broadcast %95 : vector<2x1x8xf32> to vector<2x8x8xf32>
    %254 = arith.addf %252, %253 : vector<2x8x8xf32>
    %cst_154 = arith.constant dense<0xFF800000> : vector<2x8xf32>
    %255 = vector.multi_reduction <maximumf>, %254, %cst_154 [2] : vector<2x8x8xf32> to vector<2x8xf32>
    %256 = vector.shape_cast %255 : vector<2x8xf32> to vector<2x8x1xf32>
    %257 = vector.broadcast %256 : vector<2x8x1xf32> to vector<2x8x8xf32>
    %258 = arith.subf %254, %257 : vector<2x8x8xf32>
    %259 = math.exp %258 : vector<2x8x8xf32>
    %cst_155 = arith.constant dense<0.000000e+00> : vector<2x8xf32>
    %260 = vector.multi_reduction <add>, %259, %cst_155 [2] : vector<2x8x8xf32> to vector<2x8xf32>
    %261 = vector.shape_cast %260 : vector<2x8xf32> to vector<2x8x1xf32>
    %262 = vector.broadcast %261 : vector<2x8x1xf32> to vector<2x8x8xf32>
    %263 = arith.divf %259, %262 : vector<2x8x8xf32>
    "tpu.trace_start"() <{level = 10 : i32, message = "bqk,bkd->bqd"}> : () -> ()
    %cst_156 = arith.constant dense<0.000000e+00> : vector<2x8x64xf32>
    %264 = tpu.matmul %263, %251, %cst_156 {dimension_numbers = #tpu.dot_dimension_numbers<[2], [1], [1], [2], [0, 0, 0, 1, 1, 2], [0], [0]>} : vector<2x8x8xf32>, vector<2x8x64xf32>, vector<2x8x64xf32> -> vector<2x8x64xf32>
    "tpu.trace_stop"() : () -> ()
    %265 = vector.shape_cast %264 : vector<2x8x64xf32> to vector<16x64xf32>
    %266 = arith.truncf %265 : vector<16x64xf32> to vector<16x64xbf16>
    %267 = vector.extract_strided_slice %245 {offsets = [0, 0], sizes = [64, 128], strides = [1, 1]} : vector<128x128xbf16> to vector<64x128xbf16>
    %cst_157 = arith.constant dense<0.000000e+00> : vector<16x128xf32>
    %268 = tpu.matmul %266, %267, %cst_157 {dimension_numbers = #tpu.dot_dimension_numbers<[1], [0], [0], [1], [0, 0, 1, 1], [], []>} : vector<16x64xbf16>, vector<64x128xbf16>, vector<16x128xf32> -> vector<16x128xf32>
    %269 = vector.extract_strided_slice %243 {offsets = [0, 64], sizes = [16, 64], strides = [1, 1]} : vector<16x384xf32> to vector<16x64xf32>
    %270 = vector.shape_cast %269 : vector<16x64xf32> to vector<2x8x64xf32>
    %271 = vector.extract_strided_slice %243 {offsets = [0, 192], sizes = [16, 64], strides = [1, 1]} : vector<16x384xf32> to vector<16x64xf32>
    %272 = vector.shape_cast %271 : vector<16x64xf32> to vector<2x8x64xf32>
    %273 = vector.extract_strided_slice %243 {offsets = [0, 320], sizes = [16, 64], strides = [1, 1]} : vector<16x384xf32> to vector<16x64xf32>
    %274 = vector.shape_cast %273 : vector<16x64xf32> to vector<2x8x64xf32>
    "tpu.trace_start"() <{level = 10 : i32, message = "bqd,bkd->bqk"}> : () -> ()
    %cst_158 = arith.constant dense<0.000000e+00> : vector<2x8x8xf32>
    %275 = tpu.matmul %270, %272, %cst_158 {dimension_numbers = #tpu.dot_dimension_numbers<[2], [2], [1], [1], [0, 0, 0, 1, 1, 1], [0], [0]>} : vector<2x8x64xf32>, vector<2x8x64xf32>, vector<2x8x8xf32> -> vector<2x8x8xf32>
    "tpu.trace_stop"() : () -> ()
    %276 = vector.broadcast %95 : vector<2x1x8xf32> to vector<2x8x8xf32>
    %277 = arith.addf %275, %276 : vector<2x8x8xf32>
    %cst_159 = arith.constant dense<0xFF800000> : vector<2x8xf32>
    %278 = vector.multi_reduction <maximumf>, %277, %cst_159 [2] : vector<2x8x8xf32> to vector<2x8xf32>
    %279 = vector.shape_cast %278 : vector<2x8xf32> to vector<2x8x1xf32>
    %280 = vector.broadcast %279 : vector<2x8x1xf32> to vector<2x8x8xf32>
    %281 = arith.subf %277, %280 : vector<2x8x8xf32>
    %282 = math.exp %281 : vector<2x8x8xf32>
    %cst_160 = arith.constant dense<0.000000e+00> : vector<2x8xf32>
    %283 = vector.multi_reduction <add>, %282, %cst_160 [2] : vector<2x8x8xf32> to vector<2x8xf32>
    %284 = vector.shape_cast %283 : vector<2x8xf32> to vector<2x8x1xf32>
    %285 = vector.broadcast %284 : vector<2x8x1xf32> to vector<2x8x8xf32>
    %286 = arith.divf %282, %285 : vector<2x8x8xf32>
    "tpu.trace_start"() <{level = 10 : i32, message = "bqk,bkd->bqd"}> : () -> ()
    %cst_161 = arith.constant dense<0.000000e+00> : vector<2x8x64xf32>
    %287 = tpu.matmul %286, %274, %cst_161 {dimension_numbers = #tpu.dot_dimension_numbers<[2], [1], [1], [2], [0, 0, 0, 1, 1, 2], [0], [0]>} : vector<2x8x8xf32>, vector<2x8x64xf32>, vector<2x8x64xf32> -> vector<2x8x64xf32>
    "tpu.trace_stop"() : () -> ()
    %288 = vector.shape_cast %287 : vector<2x8x64xf32> to vector<16x64xf32>
    %289 = arith.truncf %288 : vector<16x64xf32> to vector<16x64xbf16>
    %290 = vector.extract_strided_slice %245 {offsets = [64, 0], sizes = [64, 128], strides = [1, 1]} : vector<128x128xbf16> to vector<64x128xbf16>
    %cst_162 = arith.constant dense<0.000000e+00> : vector<16x128xf32>
    %291 = tpu.matmul %289, %290, %cst_162 {dimension_numbers = #tpu.dot_dimension_numbers<[1], [0], [0], [1], [0, 0, 1, 1], [], []>} : vector<16x64xbf16>, vector<64x128xbf16>, vector<16x128xf32> -> vector<16x128xf32>
    %292 = arith.addf %268, %291 : vector<16x128xf32>
    %c1_163 = arith.constant 1 : index
    %c0_164 = arith.constant 0 : index
    %c0_165 = arith.constant 0 : index
    %293 = vector.load %arg9[%c1_163, %c0_164, %c0_165] : memref<2x1x128xf32, #tpu.memory_space<vmem>>, vector<1x1x128xf32>
    %294 = vector.shape_cast %293 : vector<1x1x128xf32> to vector<1x128xf32>
    %295 = vector.broadcast %294 : vector<1x128xf32> to vector<16x128xf32>
    %296 = arith.addf %292, %295 : vector<16x128xf32>
    %297 = arith.addf %296, %235 : vector<16x128xf32>
    %c1_166 = arith.constant 1 : index
    %c0_167 = arith.constant 0 : index
    %c0_168 = arith.constant 0 : index
    %298 = vector.load %arg10[%c1_166, %c0_167, %c0_168] : memref<2x1x128xf32, #tpu.memory_space<vmem>>, vector<1x1x128xf32>
    %299 = vector.shape_cast %298 : vector<1x1x128xf32> to vector<1x128xf32>
    %c1_169 = arith.constant 1 : index
    %c0_170 = arith.constant 0 : index
    %c0_171 = arith.constant 0 : index
    %300 = vector.load %arg11[%c1_169, %c0_170, %c0_171] : memref<2x1x128xf32, #tpu.memory_space<vmem>>, vector<1x1x128xf32>
    %301 = vector.shape_cast %300 : vector<1x1x128xf32> to vector<1x128xf32>
    %cst_172 = arith.constant dense<0.000000e+00> : vector<16xf32>
    %302 = vector.multi_reduction <add>, %297, %cst_172 [1] : vector<16x128xf32> to vector<16xf32>
    %303 = vector.shape_cast %302 : vector<16xf32> to vector<16x1xf32>
    %cst_173 = arith.constant 1.280000e+02 : f32
    %304 = vector.broadcast %cst_173 : f32 to vector<16x1xf32>
    %305 = arith.divf %303, %304 : vector<16x1xf32>
    %306 = vector.broadcast %305 : vector<16x1xf32> to vector<16x128xf32>
    %307 = arith.subf %297, %306 : vector<16x128xf32>
    %308 = arith.mulf %307, %307 : vector<16x128xf32>
    %cst_174 = arith.constant dense<0.000000e+00> : vector<16xf32>
    %309 = vector.multi_reduction <add>, %308, %cst_174 [1] : vector<16x128xf32> to vector<16xf32>
    %310 = vector.shape_cast %309 : vector<16xf32> to vector<16x1xf32>
    %cst_175 = arith.constant 1.280000e+02 : f32
    %311 = vector.broadcast %cst_175 : f32 to vector<16x1xf32>
    %312 = arith.divf %310, %311 : vector<16x1xf32>
    %cst_176 = arith.constant 9.99999996E-13 : f32
    %313 = vector.broadcast %cst_176 : f32 to vector<16x1xf32>
    %314 = arith.addf %312, %313 : vector<16x1xf32>
    %315 = math.rsqrt %314 : vector<16x1xf32>
    %316 = vector.broadcast %315 : vector<16x1xf32> to vector<16x128xf32>
    %317 = arith.mulf %307, %316 : vector<16x128xf32>
    %318 = vector.broadcast %299 : vector<1x128xf32> to vector<16x128xf32>
    %319 = arith.mulf %317, %318 : vector<16x128xf32>
    %320 = vector.broadcast %301 : vector<1x128xf32> to vector<16x128xf32>
    %321 = arith.addf %319, %320 : vector<16x128xf32>
    %c1_177 = arith.constant 1 : index
    %c0_178 = arith.constant 0 : index
    %c0_179 = arith.constant 0 : index
    %322 = vector.load %arg12[%c1_177, %c0_178, %c0_179] : memref<2x128x256xbf16, #tpu.memory_space<vmem>>, vector<1x128x256xbf16>
    %323 = vector.shape_cast %322 : vector<1x128x256xbf16> to vector<128x256xbf16>
    %c1_180 = arith.constant 1 : index
    %c0_181 = arith.constant 0 : index
    %c0_182 = arith.constant 0 : index
    %324 = vector.load %arg13[%c1_180, %c0_181, %c0_182] : memref<2x1x256xf32, #tpu.memory_space<vmem>>, vector<1x1x256xf32>
    %325 = vector.shape_cast %324 : vector<1x1x256xf32> to vector<1x256xf32>
    %326 = arith.truncf %321 : vector<16x128xf32> to vector<16x128xbf16>
    %cst_183 = arith.constant dense<0.000000e+00> : vector<16x256xf32>
    %327 = tpu.matmul %326, %323, %cst_183 {dimension_numbers = #tpu.dot_dimension_numbers<[1], [0], [0], [1], [0, 0, 1, 1], [], []>} : vector<16x128xbf16>, vector<128x256xbf16>, vector<16x256xf32> -> vector<16x256xf32>
    %328 = vector.broadcast %325 : vector<1x256xf32> to vector<16x256xf32>
    %329 = arith.addf %327, %328 : vector<16x256xf32>
    %cst_184 = arith.constant 5.000000e-01 : f32
    %330 = vector.broadcast %cst_184 : f32 to vector<16x256xf32>
    %331 = arith.mulf %330, %329 : vector<16x256xf32>
    %cst_185 = arith.constant 4.471500e-02 : f32
    %332 = vector.broadcast %cst_185 : f32 to vector<16x256xf32>
    %333 = arith.mulf %332, %329 : vector<16x256xf32>
    %334 = arith.mulf %333, %329 : vector<16x256xf32>
    %335 = arith.mulf %334, %329 : vector<16x256xf32>
    %336 = arith.addf %329, %335 : vector<16x256xf32>
    %cst_186 = arith.constant 0.797884583 : f32
    %337 = vector.broadcast %cst_186 : f32 to vector<16x256xf32>
    %338 = arith.mulf %337, %336 : vector<16x256xf32>
    %339 = math.tanh %338 : vector<16x256xf32>
    %cst_187 = arith.constant 1.000000e+00 : f32
    %340 = vector.broadcast %cst_187 : f32 to vector<16x256xf32>
    %341 = arith.addf %340, %339 : vector<16x256xf32>
    %342 = arith.mulf %331, %341 : vector<16x256xf32>
    %c1_188 = arith.constant 1 : index
    %c0_189 = arith.constant 0 : index
    %c0_190 = arith.constant 0 : index
    %343 = vector.load %arg14[%c1_188, %c0_189, %c0_190] : memref<2x256x128xbf16, #tpu.memory_space<vmem>>, vector<1x256x128xbf16>
    %344 = vector.shape_cast %343 : vector<1x256x128xbf16> to vector<256x128xbf16>
    %c1_191 = arith.constant 1 : index
    %c0_192 = arith.constant 0 : index
    %c0_193 = arith.constant 0 : index
    %345 = vector.load %arg15[%c1_191, %c0_192, %c0_193] : memref<2x1x128xf32, #tpu.memory_space<vmem>>, vector<1x1x128xf32>
    %346 = vector.shape_cast %345 : vector<1x1x128xf32> to vector<1x128xf32>
    %347 = arith.truncf %342 : vector<16x256xf32> to vector<16x256xbf16>
    %cst_194 = arith.constant dense<0.000000e+00> : vector<16x128xf32>
    %348 = tpu.matmul %347, %344, %cst_194 {dimension_numbers = #tpu.dot_dimension_numbers<[1], [0], [0], [1], [0, 0, 1, 1], [], []>} : vector<16x256xbf16>, vector<256x128xbf16>, vector<16x128xf32> -> vector<16x128xf32>
    %349 = vector.broadcast %346 : vector<1x128xf32> to vector<16x128xf32>
    %350 = arith.addf %348, %349 : vector<16x128xf32>
    %351 = arith.addf %350, %321 : vector<16x128xf32>
    %c1_195 = arith.constant 1 : index
    %c0_196 = arith.constant 0 : index
    %c0_197 = arith.constant 0 : index
    %352 = vector.load %arg16[%c1_195, %c0_196, %c0_197] : memref<2x1x128xf32, #tpu.memory_space<vmem>>, vector<1x1x128xf32>
    %353 = vector.shape_cast %352 : vector<1x1x128xf32> to vector<1x128xf32>
    %c1_198 = arith.constant 1 : index
    %c0_199 = arith.constant 0 : index
    %c0_200 = arith.constant 0 : index
    %354 = vector.load %arg17[%c1_198, %c0_199, %c0_200] : memref<2x1x128xf32, #tpu.memory_space<vmem>>, vector<1x1x128xf32>
    %355 = vector.shape_cast %354 : vector<1x1x128xf32> to vector<1x128xf32>
    %cst_201 = arith.constant dense<0.000000e+00> : vector<16xf32>
    %356 = vector.multi_reduction <add>, %351, %cst_201 [1] : vector<16x128xf32> to vector<16xf32>
    %357 = vector.shape_cast %356 : vector<16xf32> to vector<16x1xf32>
    %cst_202 = arith.constant 1.280000e+02 : f32
    %358 = vector.broadcast %cst_202 : f32 to vector<16x1xf32>
    %359 = arith.divf %357, %358 : vector<16x1xf32>
    %360 = vector.broadcast %359 : vector<16x1xf32> to vector<16x128xf32>
    %361 = arith.subf %351, %360 : vector<16x128xf32>
    %362 = arith.mulf %361, %361 : vector<16x128xf32>
    %cst_203 = arith.constant dense<0.000000e+00> : vector<16xf32>
    %363 = vector.multi_reduction <add>, %362, %cst_203 [1] : vector<16x128xf32> to vector<16xf32>
    %364 = vector.shape_cast %363 : vector<16xf32> to vector<16x1xf32>
    %cst_204 = arith.constant 1.280000e+02 : f32
    %365 = vector.broadcast %cst_204 : f32 to vector<16x1xf32>
    %366 = arith.divf %364, %365 : vector<16x1xf32>
    %cst_205 = arith.constant 9.99999996E-13 : f32
    %367 = vector.broadcast %cst_205 : f32 to vector<16x1xf32>
    %368 = arith.addf %366, %367 : vector<16x1xf32>
    %369 = math.rsqrt %368 : vector<16x1xf32>
    %370 = vector.broadcast %369 : vector<16x1xf32> to vector<16x128xf32>
    %371 = arith.mulf %361, %370 : vector<16x128xf32>
    %372 = vector.broadcast %353 : vector<1x128xf32> to vector<16x128xf32>
    %373 = arith.mulf %371, %372 : vector<16x128xf32>
    %374 = vector.broadcast %355 : vector<1x128xf32> to vector<16x128xf32>
    %375 = arith.addf %373, %374 : vector<16x128xf32>
    %376 = vector.extract_strided_slice %375 {offsets = [0, 0], sizes = [1, 128], strides = [1, 1]} : vector<16x128xf32> to vector<1x128xf32>
    %377 = vector.extract_strided_slice %375 {offsets = [8, 0], sizes = [1, 128], strides = [1, 1]} : vector<16x128xf32> to vector<1x128xf32>
    %378 = tpu.concatenate %376, %377 in 0 : vector<1x128xf32>, vector<1x128xf32> -> vector<2x128xf32>
    %c0_206 = arith.constant 0 : index
    %c0_207 = arith.constant 0 : index
    %379 = vector.load %arg18[%c0_206, %c0_207] : memref<128x128xbf16, #tpu.memory_space<vmem>>, vector<128x128xbf16>
    %c0_208 = arith.constant 0 : index
    %c0_209 = arith.constant 0 : index
    %380 = vector.load %arg19[%c0_208, %c0_209] : memref<1x128xf32, #tpu.memory_space<vmem>>, vector<1x128xf32>
    %381 = arith.truncf %378 : vector<2x128xf32> to vector<2x128xbf16>
    %cst_210 = arith.constant dense<0.000000e+00> : vector<2x128xf32>
    %382 = tpu.matmul %381, %379, %cst_210 {dimension_numbers = #tpu.dot_dimension_numbers<[1], [0], [0], [1], [0, 0, 1, 1], [], []>} : vector<2x128xbf16>, vector<128x128xbf16>, vector<2x128xf32> -> vector<2x128xf32>
    %383 = vector.broadcast %380 : vector<1x128xf32> to vector<2x128xf32>
    %384 = arith.addf %382, %383 : vector<2x128xf32>
    %385 = math.tanh %384 : vector<2x128xf32>
    %c0_211 = arith.constant 0 : index
    %c0_212 = arith.constant 0 : index
    %386 = vector.load %arg20[%c0_211, %c0_212] : memref<128x128xbf16, #tpu.memory_space<vmem>>, vector<128x128xbf16>
    %c0_213 = arith.constant 0 : index
    %c0_214 = arith.constant 0 : index
    %387 = vector.load %arg21[%c0_213, %c0_214] : memref<1x128xf32, #tpu.memory_space<vmem>>, vector<1x128xf32>
    %388 = arith.truncf %385 : vector<2x128xf32> to vector<2x128xbf16>
    %cst_215 = arith.constant dense<0.000000e+00> : vector<2x128xf32>
    %389 = tpu.matmul %388, %386, %cst_215 {dimension_numbers = #tpu.dot_dimension_numbers<[1], [0], [0], [1], [0, 0, 1, 1], [], []>} : vector<2x128xbf16>, vector<128x128xbf16>, vector<2x128xf32> -> vector<2x128xf32>
    %390 = vector.broadcast %387 : vector<1x128xf32> to vector<2x128xf32>
    %391 = arith.addf %389, %390 : vector<2x128xf32>
    %c0_216 = arith.constant 0 : index
    %c0_217 = arith.constant 0 : index
    %392 = vector.load %arg22[%c0_216, %c0_217] : memref<2x128xf32, #tpu.memory_space<vmem>>, vector<2x128xf32>
    tpu.vector_store %arg22[%c0_216, %c0_217], %391 {strides = array<i32>} : memref<2x128xf32, #tpu.memory_space<vmem>>, vector<2x128xf32>,
    return
  }
}

</mosaic_0001>

<bundles_post_ra>
// kernel: bert_forward.1
= control target key start
LH: loop header
LB: loop body
LE: loop exit
PB: predicated region body
PF: predicated region fallthrough
CT: control target
= control target key end

     0   :  { %s4138_s0 = inlined_call_operand.vmem [shape: s32[2,8], index: 0, kind: input, shape index: {}]   ;;  %s4139_s1 = inlined_call_operand.vmem [shape: f32[2,8], index: 1, kind: input, shape index: {}]   ;;  %s4140_s2 = inlined_call_operand.hbm [shape: f32[512,128], index: 2, kind: input, shape index: {}]   ;;  %s4141_s3 = inlined_call_operand.vmem [shape: f32[8,128], index: 3, kind: input, shape index: {}]   ;;  %s4142_s4 = inlined_call_operand.vmem [shape: f32[1,128], index: 4, kind: input, shape index: {}]   ;;  %s4143_s5 = inlined_call_operand.vmem [shape: f32[1,128], index: 5, kind: input, shape index: {}, may-alias: {5,19,21}]   ;;  %s4144_s6 = inlined_call_operand.hbm [shape: bf16[2,128,384], index: 6, kind: input, shape index: {}]   ;;  %s4145_s7 = inlined_call_operand.vmem [shape: f32[2,1,384], index: 7, kind: input, shape index: {}]   ;;  %s4146_s8 = inlined_call_operand.hbm [shape: bf16[2,128,128], index: 8, kind: input, shape index: {}]   ;;  %s4147_s9 = inlined_call_operand.vmem [shape: f32[2,1,128], index: 9, kind: input, shape index: {}, may-alias: {9,11,15,17}]   ;;  %s4148_s10 = inlined_call_operand.vmem [shape: f32[2,1,128], index: 10, kind: input, shape index: {}, may-alias: {10,16}]   ;;  %s4149_s11 = inlined_call_operand.vmem [shape: f32[2,1,128], index: 11, kind: input, shape index: {}, may-alias: {9,11,15,17}]   ;;  %s4150_s12 = inlined_call_operand.hbm [shape: bf16[2,128,256], index: 12, kind: input, shape index: {}]   ;;  %s4151_s13 = inlined_call_operand.vmem [shape: f32[2,1,256], index: 13, kind: input, shape index: {}]   ;;  %s4152_s14 = inlined_call_operand.hbm [shape: bf16[2,256,128], index: 14, kind: input, shape index: {}]   ;;  %s4153_s15 = inlined_call_operand.vmem [shape: f32[2,1,128], index: 15, kind: input, shape index: {}, may-alias: {9,11,15,17}]   ;;  %s4154_s16 = inlined_call_operand.vmem [shape: f32[2,1,128], index: 16, kind: input, shape index: {}, may-alias: {10,16}]   ;;  %s4155_s17 = inlined_call_operand.vmem [shape: f32[2,1,128], index: 17, kind: input, shape index: {}, may-alias: {9,11,15,17}]   ;;  %s4156_s18 = inlined_call_operand.hbm [shape: bf16[128,128], index: 18, kind: input, shape index: {}]   ;;  %s4157_s19 = inlined_call_operand.vmem [shape: f32[1,128], index: 19, kind: input, shape index: {}, may-alias: {5,19,21}]   ;;  %s4158_s20 = inlined_call_operand.hbm [shape: bf16[128,128], index: 20, kind: input, shape index: {}]   ;;  %s4159_s21 = inlined_call_operand.vmem [shape: f32[1,128], index: 21, kind: input, shape index: {}, may-alias: {5,19,21}]   ;;  %s4160_s22 = inlined_call_operand.vmem [shape: f32[2,128], index: 22, kind: output, shape index: {}]  }
   0x1   :  { %4161 = sst [smem:[#allocation21_spill]] %s4138_s0 }
   0x2   :  { %4162 = sst [smem:[#allocation22_spill]] %s4139_s1 }
   0x3   :  { %4163 = sst [smem:[#allocation23_spill]] %s4140_s2 }
   0x4   :  { %4164 = sst [smem:[#allocation24_spill]] %s4141_s3 }
   0x5   :  { %4165 = sst [smem:[#allocation25_spill]] %s4142_s4 }
   0x6   :  { %4166 = sst [smem:[#allocation26_spill]] %s4143_s5 }
   0x7   :  { %4167 = sst [smem:[#allocation27_spill]] %s4144_s6 }
   0x8   :  { %4168 = sst [smem:[#allocation28_spill]] %s4159_s21 }
   0x9   :  { %4169 = sst [smem:[#allocation29_spill]] %s4160_s22 }
   0xa   :  { %27 = vsyncpa [#allocation5], 0 }
   0xb   :  { %28 = vsyncpa [#allocation4], 0 }
   0xc   :  { %29 = vsyncpa [#allocation8], 0 }
   0xd   :  { %30 = vsyncpa [#allocation11], 0  ;;  %s4170_s29 = sld [smem:[#allocation27_spill]] }
  0x13   :  { %s66_s30 = sshll.u32 %s4170_s29, 4  ;;  %s67_s30 = int_to_ptr.hbm [resolvable:$true] %s66_s30 }
  0x14   :  { %31 = vsyncpa [#allocation14], 0  ;;  %s3721_s4 = smov [#allocation7]   ;;  %s3722_s23 = smov 192  }
  0x15   :  { %s68_s0 = sshll.u32 %s3721_s4, 4  ;;  %s3723_s1 = smov 12   ;;  %s69_s0 = int_to_ptr.vmem [resolvable:$true] %s68_s0 }
  0x16   :  { %74 = dma.hbm_to_vmem [thread:$0]  %s67_s30, 6144, %s69_s0, [#allocation8], %s3722_s23, %s3722_s23, %s3723_s1  }
  0x17   :  { %s100_s6 = sshll.u32 %s4150_s12, 4  ;;  %s3724_s25 = smov [#allocation10]   ;;  %s101_s6 = int_to_ptr.hbm [resolvable:$true] %s100_s6 }
  0x18   :  { %s102_s26 = sshll.u32 %s3724_s25, 4  ;;  %s3725_s2 = smov 128   ;;  %s103_s26 = int_to_ptr.vmem [resolvable:$true] %s102_s26 }
  0x19   :  { %s3726_s27 = smov 8   ;;  %s134_s29 = sshll.u32 %s4156_s18, 4  ;;  %s135_s29 = int_to_ptr.hbm [resolvable:$true] %s134_s29 }
  0x1a   :  { %108 = dma.hbm_to_vmem [thread:$0]  %s101_s6, 4096, %s103_s26, [#allocation11], %s3725_s2, %s3725_s2, %s3726_s27  }
  0x1b   :  { %s3727_s4 = smov [#allocation13]   ;;  %s4171_s23 = sld [smem:[#allocation21_spill]] }
  0x1c   :  { %s136_s22 = sshll.u32 %s3727_s4, 4  ;;  %s3728_s12 = smov 64   ;;  %s137_s22 = int_to_ptr.vmem [resolvable:$true] %s136_s22 }
  0x1d   :  { %s3729_s5 = smov 4   ;;  %s3730_s24 = smov [#allocation3]  }
  0x1e   :  { %142 = dma.hbm_to_vmem [thread:$0]  %s135_s29, 1024, %s137_s22, [#allocation14], %s3728_s12, %s3728_s12, %s3729_s5  }
  0x1f   :  { %s4172_s18 = sld [smem:[#allocation23_spill]]  ;;  %s3731_s3 = smov [#allocation6]  }
  0x20   :  { %s49_s28 = sshll.u32 %s3731_s3, 4  ;;  %s81_s0 = sshll.u32 %s4146_s8, 4  ;;  %s50_s28 = int_to_ptr.vmem [resolvable:$true] %s49_s28  ;;  %s82_s0 = int_to_ptr.hbm [resolvable:$true] %s81_s0 }
  0x21   :  { %s37_s1 = sshll.u32 %s4171_s23, 4  ;;  %s3732_s23 = smov [#allocation9]   ;;  %s38_s1 = int_to_ptr.vmem [resolvable:$true] %s37_s1 }
  0x22   :  { %40 = dma.vmem_to_smem %s38_s1, 32, %s3730_s24, [#allocation5]  }
  0x23   :  { %s83_s21 = sshll.u32 %s3732_s23, 4  ;;  %s115_s1 = sshll.u32 %s4152_s14, 4  ;;  %s84_s21 = int_to_ptr.vmem [resolvable:$true] %s83_s21  ;;  %s116_s1 = int_to_ptr.hbm [resolvable:$true] %s115_s1 }
  0x24   :  { %89 = dma.hbm_to_vmem [thread:$0]  %s82_s0, 2048, %s84_s21, [#allocation8], %s3728_s12, %s3728_s12, %s3729_s5  }
  0x25   :  { %s47_s26 = sshll.u32 %s4172_s18, 4  ;;  %s149_s25 = sshll.u32 %s4158_s20, 4  ;;  %s48_s26 = int_to_ptr.hbm [resolvable:$true] %s47_s26  ;;  %s150_s25 = int_to_ptr.hbm [resolvable:$true] %s149_s25 }
  0x26   :  { %55 = dma.hbm_to_vmem [thread:$0]  %s48_s26, 8192, %s50_s28, [#allocation4], %s3725_s2, %s3725_s2, %s3726_s27  }
  0x27   :  { %s3733_s18 = smov [#allocation12]   ;;  %s3734_s2 = smov [#allocation15]  }
  0x28   :  { %s117_s8 = sshll.u32 %s3733_s18, 4  ;;  %s151_s14 = sshll.u32 %s3734_s2, 4  ;;  %s118_s8 = int_to_ptr.vmem [resolvable:$true] %s117_s8  ;;  %s152_s14 = int_to_ptr.vmem [resolvable:$true] %s151_s14 }
  0x29   :  { %123 = dma.hbm_to_vmem [thread:$0]  %s116_s1, 4096, %s118_s8, [#allocation11], %s3728_s12, %s3728_s12, %s3729_s5  }
  0x2a   :  { %157 = dma.hbm_to_vmem [thread:$0]  %s150_s25, 1024, %s152_s14, [#allocation14], %s3728_s12, %s3728_s12, %s3729_s5  }
  0x2b   :  { %3711 = dma.done.wait [#allocation5], 32  }
  0x2c   :  { %3712 = vsyncadd [#allocation5], 4294967264 }
  0x2d   :  { %3713 = dma.done.wait [#allocation4], 8192  }
  0x2e   :  { %3714 = vsyncadd [#allocation4], 4294959104 }
  0x2f   :  { %3715 = dma.done.wait [#allocation8], 8192  }
  0x30   :  { %3716 = vsyncadd [#allocation8], 4294959104 }
  0x31   :  { %3717 = dma.done.wait [#allocation11], 8192  }
  0x32   :  { %3718 = vsyncadd [#allocation11], 4294959104 }
  0x33   :  { %3719 = dma.done.wait [#allocation14], 2048  }
  0x34   :  { %3720 = vsyncadd [#allocation14], 4294965248 }
  0x35   :  { %192 = sfence }
  0x36   :  { %s194_s20 = sld [smem:[#allocation3]]  ;;  %v3735_v21 = vmov 128.0   ;;  %v2758_v36 = vld [vmem:[#allocation7 + $0xa8] sm:$0xf]  ;;  %v3306_v37 = vld [vmem:[#allocation7 + $0xb0] sm:$0xf0] }
  0x37   :  { %s2657_s21 = sld [smem:[#allocation3 + $0x1]]  ;;  %3459 = vrcp.f32 %v3735_v21  ;;  %v3305_v38 = vld [vmem:[#allocation7 + $0xac] sm:$0xf]  ;;  %v2759_v39 = vor.u32 %v3306_v37, %v2758_v36  ;;  %v2760_v40 = vld [vmem:[#allocation7 + $0xb4] sm:$0xf0]  ;;  %vm558_vm7 = vcmask 523264  }
  0x38   :  { %s2658_s27 = sld [smem:[#allocation3 + $0x2]]  ;;  %v2766_v41 = vld [vmem:[#allocation7 + $0xb0] sm:$0xf]  ;;  %v3307_v42 = vld [vmem:[#allocation7 + $0xb8] sm:$0xf0]  ;;  %v2763_v43 = vor.u32 %v3305_v38, %v2760_v40  ;;  %vm611_vm8 = vcmask 64512  }
  0x39   :  { %s2659_s26 = sld [smem:[#allocation3 + $0x3]]  ;;  %v2767_v44 = vor.u32 %v3307_v42, %v2766_v41  ;;  %496 = vmatpush.bf16.msra.mxu0 %v2759_v39  ;;  %v2746_v45 = vld [vmem:[#allocation7 + $0x90] sm:$0xf]  ;;  %v3303_v46 = vld [vmem:[#allocation7 + $0x98] sm:$0xf0] }
  0x3a   :  { %s2660_s3 = sld [smem:[#allocation3 + $0x4]]  ;;  %510 = vmatpush.bf16.msra.mxu1 %v2763_v43  ;;  %v3302_v47 = vld [vmem:[#allocation7 + $0x94] sm:$0xf]  ;;  %v2747_v48 = vor.u32 %v3303_v46, %v2746_v45  ;;  %v2748_v49 = vld [vmem:[#allocation7 + $0x9c] sm:$0xf0] }
  0x3b   :  { %s2661_s28 = sld [smem:[#allocation3 + $0x5]]  ;;  %524 = vmatpush.bf16.msra.mxu2 %v2767_v44  ;;  %v2754_v50 = vld [vmem:[#allocation7 + $0x98] sm:$0xf]  ;;  %v3304_v51 = vld [vmem:[#allocation7 + $0xa0] sm:$0xf0]  ;;  %v2751_v52 = vor.u32 %v3302_v47, %v2748_v49 }
  0x3c   :  { %s2662_s4 = sld [smem:[#allocation3 + $0x6]]  ;;  %s195_s30 = scalar_lea.vmem [#allocation6], %s194_s20  ;;  %v2755_v53 = vor.u32 %v3304_v51, %v2754_v50  ;;  %v2734_v54 = vld [vmem:[#allocation7 + $0x78] sm:$0xf]  ;;  %v3300_v55 = vld [vmem:[#allocation7 + $0x80] sm:$0xf0] }
  0x3d   :  { %v196_v0 = vld [vmem:[%s195_s30] sm:$0x1]  ;;  %s2663_s5 = sld [smem:[#allocation3 + $0x7]]  ;;  %s199_s0 = scalar_lea.vmem [#allocation6], %s2657_s21  ;;  %v3460_v22 = vpop.eup %3459  ;;  %497 = vmatpush.bf16.msra.mxu0 %v2747_v48  ;;  %v3299_v56 = vld [vmem:[#allocation7 + $0x7c] sm:$0xf]  ;;  %v2735_v57 = vor.u32 %v3300_v55, %v2734_v54 }
  0x3e   :  { %197 = vst [vmem:[#allocation2] sm:$0x1] %v196_v0  ;;  %v200_v1 = vld [vmem:[%s199_s0] sm:$0x1]  ;;  %s203_s23 = scalar_lea.vmem [#allocation6], %s2658_s27  ;;  %s2664_s25 = sld [smem:[#allocation3 + $0x80]]  ;;  %vm274_vm0 = vweird.f32 %v3460_v22  ;;  %511 = vmatpush.bf16.msra.mxu1 %v2751_v52 }
  0x3f   :  { %201 = vst [vmem:[#allocation2 + $0x1] sm:$0x1] %v200_v1  ;;  %v204_v2 = vld [vmem:[%s203_s23] sm:$0x1]  ;;  %s207_s22 = scalar_lea.vmem [#allocation6], %s2659_s26  ;;  %s2665_s18 = sld [smem:[#allocation3 + $0x81]]  ;;  %525 = vmatpush.bf16.msra.mxu2 %v2755_v53 }
  0x40   :  { %205 = vst [vmem:[#allocation2 + $0x2] sm:$0x1] %v204_v2  ;;  %v208_v3 = vld [vmem:[%s207_s22] sm:$0x1]  ;;  %s211_s29 = scalar_lea.vmem [#allocation6], %s2660_s3  ;;  %s2666_s8 = sld [smem:[#allocation3 + $0x82]] }
  0x41   :  { %209 = vst [vmem:[#allocation2 + $0x3] sm:$0x1] %v208_v3  ;;  %v212_v4 = vld [vmem:[%s211_s29] sm:$0x1]  ;;  %s215_s1 = scalar_lea.vmem [#allocation6], %s2661_s28  ;;  %s2667_s2 = sld [smem:[#allocation3 + $0x83]]  ;;  %498 = vmatpush.bf16.msra.mxu0 %v2735_v57 }
  0x42   :  { %213 = vst [vmem:[#allocation2 + $0x4] sm:$0x1] %v212_v4  ;;  %v216_v5 = vld [vmem:[%s215_s1] sm:$0x1]  ;;  %s219_s24 = scalar_lea.vmem [#allocation6], %s2662_s4  ;;  %s2668_s14 = sld [smem:[#allocation3 + $0x84]] }
  0x43   :  { %217 = vst [vmem:[#allocation2 + $0x5] sm:$0x1] %v216_v5  ;;  %v220_v6 = vld [vmem:[%s219_s24] sm:$0x1]  ;;  %s223_s6 = scalar_lea.vmem [#allocation6], %s2663_s5  ;;  %s2669_s20 = sld [smem:[#allocation3 + $0x85]] }
  0x44   :  { %221 = vst [vmem:[#allocation2 + $0x6] sm:$0x1] %v220_v6  ;;  %v224_v7 = vld [vmem:[%s223_s6] sm:$0x1]  ;;  %s4173_s26 = sld [smem:[#allocation24_spill]]  ;;  %s227_s28 = scalar_lea.vmem [#allocation6], %s2664_s25 }
  0x45   :  { %225 = vst [vmem:[#allocation2 + $0x7] sm:$0x1] %v224_v7  ;;  %s2670_s3 = sld [smem:[#allocation3 + $0x86]]  ;;  %v228_v9 = vld [vmem:[%s227_s28] sm:$0x1]  ;;  %s231_s4 = scalar_lea.vmem [#allocation6], %s2665_s18 }
  0x46   :  { %s2671_s30 = sld [smem:[#allocation3 + $0x87]]  ;;  %229 = vst [vmem:[#allocation2 + $0x8] sm:$0x1] %v228_v9  ;;  %v232_v11 = vld [vmem:[%s231_s4] sm:$0x1]  ;;  %s235_s5 = scalar_lea.vmem [#allocation6], %s2666_s8 }
  0x47   :  { %233 = vst [vmem:[#allocation2 + $0x9] sm:$0x1] %v232_v11  ;;  %v236_v13 = vld [vmem:[%s235_s5] sm:$0x1]  ;;  %s239_s0 = scalar_lea.vmem [#allocation6], %s2667_s2  ;;  %v270_v23 = vmul.f32 128.0, %v3460_v22 }
  0x48   :  { %237 = vst [vmem:[#allocation2 + $0xa] sm:$0x1] %v236_v13  ;;  %v240_v14 = vld [vmem:[%s239_s0] sm:$0x1]  ;;  %s243_s23 = scalar_lea.vmem [#allocation6], %s2668_s14  ;;  %s4174_s25 = sld [smem:[#allocation25_spill]] }
  0x49   :  { %241 = vst [vmem:[#allocation2 + $0xb] sm:$0x1] %v240_v14  ;;  %v244_v15 = vld [vmem:[%s243_s23] sm:$0x1]  ;;  %s247_s22 = scalar_lea.vmem [#allocation6], %s2669_s20  ;;  %v271_v24 = vsub.f32 1.0, %v270_v23 }
  0x4a   :  { %v258_v8 = vld [vmem:[%s4173_s26] sm:$0xff]  ;;  %245 = vst [vmem:[#allocation2 + $0xc] sm:$0x1] %v244_v15  ;;  %v2736_v58 = vld [vmem:[#allocation7 + $0x84] sm:$0xf0]  ;;  %s4175_s2 = sld [smem:[#allocation26_spill]] }
  0x4b   :  { %v248_v16 = vld [vmem:[%s247_s22] sm:$0x1]  ;;  %s251_s29 = scalar_lea.vmem [#allocation6], %s2670_s3  ;;  %v272_v25 = vmul.f32 %v3460_v22, %v271_v24  ;;  %v2742_v59 = vld [vmem:[#allocation7 + $0x80] sm:$0xf]  ;;  %v2739_v61 = vor.u32 %v3299_v56, %v2736_v58  ;;  %s4176_s26 = sld [smem:[#allocation22_spill]] }
  0x4c   :  { %v259_v10 = vld [vmem:[#allocation2] sm:$0xff]  ;;  %249 = vst [vmem:[#allocation2 + $0xd] sm:$0x1] %v248_v16  ;;  %s255_s1 = scalar_lea.vmem [#allocation6], %s2671_s30  ;;  %v3301_v60 = vld [vmem:[#allocation7 + $0x88] sm:$0xf0] }
  0x4d   :  { %v261_v12 = vadd.f32 %v259_v10, %v258_v8  ;;  %v252_v17 = vld [vmem:[%s251_s29] sm:$0x1]  ;;  %v273_v26 = vadd.f32 %v3460_v22, %v272_v25  ;;  %v2743_v62 = vor.u32 %v3301_v60, %v2742_v59  ;;  %512 = vmatpush.bf16.msra.mxu1 %v2739_v61  ;;  %v2722_v63 = vld [vmem:[#allocation7 + $0x60] sm:$0xf]  ;;  %v3297_v0 = vld [vmem:[#allocation7 + $0x68] sm:$0xf0] }
  0x4e   :  { %253 = vst [vmem:[#allocation2 + $0xe] sm:$0x1] %v252_v17  ;;  %v256_v18 = vld [vmem:[%s255_s1] sm:$0x1]  ;;  %v3296_v1 = vld [vmem:[#allocation7 + $0x64] sm:$0xf]  ;;  %v2723_v2 = vor.u32 %v3297_v0, %v2722_v63 }
  0x4f   :  { %265 = vadd.xlane.f32.xlu0 %v261_v12  ;;  %257 = vst [vmem:[#allocation2 + $0xf] sm:$0x1] %v256_v18  ;;  %v3890_v27 = vsel %vm274_vm0, %v3460_v22, %v273_v26  ;;  %526 = vmatpush.bf16.msra.mxu2 %v2743_v62  ;;  %v2724_v3 = vld [vmem:[#allocation7 + $0x6c] sm:$0xf0]  ;;  %v2730_v4 = vld [vmem:[#allocation7 + $0x68] sm:$0xf] }
  0x50   :  { %v3298_v5 = vld [vmem:[#allocation7 + $0x70] sm:$0xf0]  ;;  %v2727_v6 = vor.u32 %v3296_v1, %v2724_v3  ;;  %499 = vmatpush.bf16.msra.mxu0 %v2723_v2  ;;  %v3293_v10 = vld [vmem:[#allocation7 + $0x4c] sm:$0xf]  ;;  %v2718_v13 = vld [vmem:[#allocation7 + $0x50] sm:$0xf] }
  0x51   :  { %v2731_v7 = vor.u32 %v3298_v5, %v2730_v4  ;;  %v3294_v9 = vld [vmem:[#allocation7 + $0x50] sm:$0xf0]  ;;  %v3295_v14 = vld [vmem:[#allocation7 + $0x58] sm:$0xf0]  ;;  %v2698_v17 = vld [vmem:[#allocation7 + $0x30] sm:$0xf] }
  0x52   :  { %513 = vmatpush.bf16.msra.mxu1 %v2727_v6  ;;  %v2719_v16 = vor.u32 %v3295_v14, %v2718_v13  ;;  %v3291_v18 = vld [vmem:[#allocation7 + $0x38] sm:$0xf0]  ;;  %v2700_v22 = vld [vmem:[#allocation7 + $0x3c] sm:$0xf0]  ;;  %v2706_v23 = vld [vmem:[#allocation7 + $0x38] sm:$0xf] }
  0x53   :  { %527 = vmatpush.bf16.msra.mxu2 %v2731_v7  ;;  %v2699_v21 = vor.u32 %v3291_v18, %v2698_v17  ;;  %v3292_v24 = vld [vmem:[#allocation7 + $0x40] sm:$0xf0]  ;;  %v2688_v36 = vld [vmem:[#allocation7 + $0x24] sm:$0xf0]  ;;  %v2694_v37 = vld [vmem:[#allocation7 + $0x20] sm:$0xf] }
  0x54   :  { %v3289_v39 = vld [vmem:[#allocation7 + $0x28] sm:$0xf0]  ;;  %v2674_v40 = vld [vmem:[#allocation7] sm:$0xf]  ;;  %v3284_v44 = vld [vmem:[#allocation7 + $0x4] sm:$0xf] }
  0x55   :  { %v3285_v41 = vld [vmem:[#allocation7 + $0x8] sm:$0xf0]  ;;  %v2695_v42 = vor.u32 %v3289_v39, %v2694_v37  ;;  %v2676_v45 = vld [vmem:[#allocation7 + $0xc] sm:$0xf0]  ;;  %v2682_v46 = vld [vmem:[#allocation7 + $0x8] sm:$0xf] }
  0x56   :  { %v260_v19 = vld [vmem:[#allocation2 + $0x8] sm:$0xff]  ;;  %v2675_v43 = vor.u32 %v3285_v41, %v2674_v40  ;;  %v2679_v47 = vor.u32 %v3284_v44, %v2676_v45  ;;  %v3286_v48 = vld [vmem:[#allocation7 + $0x10] sm:$0xf0]  ;;  %v3443_v2 = vld [vmem:[%s4174_s25] ss:$0 sm:$0xff]  ;;  %s4177_s5 = sld [smem:[#allocation28_spill]] }
  0x57   :  { %v262_v20 = vadd.f32 %v260_v19, %v258_v8  ;;  %v2710_v8 = vld [vmem:[#allocation7 + $0x48] sm:$0xf]  ;;  %528 = vmatpush.bf16.msra.mxu2 %v2719_v16  ;;  %v3290_v19 = vld [vmem:[#allocation7 + $0x34] sm:$0xf]  ;;  %v2683_v49 = vor.u32 %v3286_v48, %v2682_v46  ;;  %v3444_v7 = vld [vmem:[%s4175_s2] ss:$0 sm:$0xff] }
  0x58   :  { %v2711_v11 = vor.u32 %v3294_v9, %v2710_v8  ;;  %v2703_v26 = vor.u32 %v3290_v19, %v2700_v22  ;;  %s4178_s22 = sld [smem:[#allocation29_spill]] }
  0x59   :  { %267 = vadd.xlane.f32.xlu0 %v262_v20 }
  0x5a   :  { %500 = vmatpush.bf16.msra.mxu0 %v2711_v11 }
  0x5e   :  { %501 = vmatpush.bf16.msra.mxu0 %v2699_v21 }
  0xc2   :  { %v266_v28 = vpop.xlane.xlu0 %265 }
  0xc3   :  { %v276_v29 = vmul.f32 %v3890_v27, %v266_v28  ;;  %v2707_v28 = vor.u32 %v3292_v24, %v2706_v23 }
  0xc5   :  { %v3893_v30 = vsub.f32 %v261_v12, %v276_v29  ;;  %v2712_v12 = vld [vmem:[#allocation7 + $0x54] sm:$0xf0]  ;;  %529 = vmatpush.bf16.msra.mxu2 %v2707_v28 }
  0xc6   :  { %v2715_v15 = vor.u32 %v3293_v10, %v2712_v12 }
  0xc7   :  { %v280_v31 = vmul.f32 %v3893_v30, %v3893_v30 }
  0xc8   :  { %514 = vmatpush.bf16.msra.mxu1 %v2715_v15 }
  0xc9   :  { %282 = vadd.xlane.f32.xlu1 %v280_v31  ;;  %v2686_v31 = vld [vmem:[#allocation7 + $0x18] sm:$0xf]  ;;  %530 = vmatpush.bf16.msra.mxu2 %v2695_v42 }
  0xcc   :  { %v268_v32 = vpop.xlane.xlu0 %267  ;;  %515 = vmatpush.bf16.msra.mxu1 %v2703_v26  ;;  %v322_v26 = vld [vmem:[%s4176_s26] sm:$0x3] }
  0xcd   :  { %v277_v33 = vmul.f32 %v3890_v27, %v268_v32  ;;  %v3288_v32 = vld [vmem:[#allocation7 + $0x20] sm:$0xf0]  ;;  %531 = vmatpush.bf16.msra.mxu2 %v2683_v49  ;;  %v323_v28 = vsub.f32 1.0, %v322_v26 }
  0xcf   :  { %v3898_v34 = vsub.f32 %v262_v20, %v277_v33  ;;  %v2687_v33 = vor.u32 %v3288_v32, %v2686_v31 }
  0xd1   :  { %v281_v35 = vmul.f32 %v3898_v34, %v3898_v34  ;;  %502 = vmatpush.bf16.msra.mxu0 %v2687_v33 }
  0xd3   :  { %284 = vadd.xlane.f32.xlu1 %v281_v35  ;;  %v3287_v35 = vld [vmem:[#allocation7 + $0x1c] sm:$0xf] }
  0xd4   :  { %v2691_v38 = vor.u32 %v3287_v35, %v2688_v36 }
  0xd5   :  { %503 = vmatpush.bf16.msra.mxu0 %v2675_v43 }
  0xd6   :  { %516 = vmatpush.bf16.msra.mxu1 %v2691_v38 }
  0xda   :  { %517 = vmatpush.bf16.msra.mxu1 %v2679_v47 }
 0x13c   :  { %v283_v20 = vpop.xlane.xlu1 %282 }
 0x13d   :  { %v286_v25 = vmul.f32 %v283_v20, %v3890_v27 }
 0x13f   :  { %v288_v29 = vadd.f32 1e-12, %v286_v25 }
 0x141   :  { %3461 = vrsqrt.f32 %v288_v29  ;;  %vm296_vm2 = vweird.f32 %v288_v29 }
 0x146   :  { %v285_v53 = vpop.xlane.xlu1 %284 }
 0x147   :  { %v3462_v50 = vpop.eup %3461  ;;  %v287_v54 = vmul.f32 %v285_v53, %v3890_v27 }
 0x148   :  { %v291_v51 = vmul.f32 %v3462_v50, %v288_v29  ;;  %vm297_vm1 = vweird.f32 %v3462_v50  ;;  %v324_v29 = vmul.f32 -10000.0, %v323_v28 }
 0x149   :  { %v289_v55 = vadd.f32 1e-12, %v287_v54  ;;  %vm298_vm3 = vmor %vm296_vm2, %vm297_vm1 }
 0x14a   :  { %v292_v52 = vmul.f32 %v3462_v50, %v291_v51  ;;  %v3934_v31 = vperm.slane %v324_v29, 0  ;;  %v326_v35 = vrot.slane %v324_v29, 1 }
 0x14b   :  { %3463 = vrsqrt.f32 %v289_v55  ;;  %vm306_vm5 = vweird.f32 %v289_v55 }
 0x14c   :  { %v293_v56 = vmul.f32 0.5, %v292_v52  ;;  %v3938_v37 = vperm.slane %v326_v35, 0 }
 0x14e   :  { %v294_v57 = vsub.f32 1.5, %v293_v56 }
 0x150   :  { %v295_v59 = vmul.f32 %v3462_v50, %v294_v57 }
 0x151   :  { %v3464_v58 = vpop.eup %3463 }
 0x152   :  { %v301_v60 = vmul.f32 %v3464_v58, %v289_v55  ;;  %v299_v62 = vsel %vm298_vm3, %v3462_v50, %v295_v59  ;;  %vm307_vm4 = vweird.f32 %v3464_v58 }
 0x153   :  { %v310_v1 = vmul.f32 %v299_v62, %v3893_v30  ;;  %vm308_vm6 = vmor %vm306_vm5, %vm307_vm4 }
 0x154   :  { %v302_v61 = vmul.f32 %v3464_v58, %v301_v60 }
 0x155   :  { %v315_v6 = vmul.f32 %v3443_v2, %v310_v1 }
 0x156   :  { %v303_v63 = vmul.f32 0.5, %v302_v61 }
 0x157   :  { %v3912_v9 = vadd.f32 %v3444_v7, %v315_v6 }
 0x158   :  { %v304_v0 = vsub.f32 1.5, %v303_v63 }
 0x15a   :  { %v305_v3 = vmul.f32 %v3464_v58, %v304_v0 }
 0x15c   :  { %v309_v4 = vsel %vm308_vm6, %v3464_v58, %v305_v3 }
 0x15d   :  { %v311_v5 = vmul.f32 %v309_v4, %v3898_v34  ;;  %v359_v34 = vld [vmem:[%s4145_s7] sm:$0x7] }
 0x15e   :  { %v363_v11 = vperm.slane %v359_v34, 1  ;;  %v362_v12 = vperm.slane %v359_v34, 0  ;;  %v364_v17 = vperm.slane %v359_v34, 2 }
 0x15f   :  { %v316_v8 = vmul.f32 %v3443_v2, %v311_v5 }
 0x161   :  { %v3914_v10 = vadd.f32 %v3444_v7, %v316_v8 }
 0x163   :  { %v360_v30 = vpack.c.bf16 %v3914_v10, %v3912_v9 }
 0x165   :  { %504 = vmatmul.bf16.vlgmr.msra.gmra.mxu0 %v360_v30  ;;  %518 = vmatmul.bf16.vlgmr.msra.gmra.mxu1 %v360_v30 }
 0x166   :  { %532 = vmatmul.bf16.vlgmr.msra.gmra.mxu2 %v360_v30 }
 0x1e2   :  { %v505_v13 = vpop.f32.mrf.mxu0  ;;  %v519_v14 = vpop.f32.mrf.mxu1 }
 0x1e3   :  { %v520_v15 = vadd.f32 %v519_v14, %v363_v11  ;;  %v506_v16 = vadd.f32 %v505_v13, %v362_v12  ;;  %v3311_v13 = vld [vmem:[#allocation9 + $0x18] sm:$0xff] }
 0x1e5   :  { %2768 = vmatpush.xpose.msk.msra.mxu3 %vm558_vm7, %v520_v15 }
 0x1e8   :  { %2769 = vmatmul.msk.f32.vlgmr.msra.gmra.mxu3 %vm558_vm7, %v506_v16 }
 0x1e9   :  { %v533_v18 = vpop.f32.mrf.mxu2 }
 0x1ea   :  { %v521_v19 = vpop.f32.mrf.mxu1  ;;  %v507_v20 = vpop.f32.mrf.mxu0  ;;  %v3923_v22 = vadd.f32 %v533_v18, %v364_v17  ;;  %v3308_v18 = vld [vmem:[#allocation9] sm:$0xff] }
 0x1eb   :  { %v522_v21 = vadd.f32 %v521_v19, %v363_v11  ;;  %v508_v23 = vadd.f32 %v507_v20, %v362_v12 }
 0x1ed   :  { %2770 = vmatpush.xpose.msk.msrb.mxu3 %vm558_vm7, %v522_v21 }
 0x1f0   :  { %2771 = vmatmul.msk.f32.vlgmr.msrb.gmra.mxu3 %vm558_vm7, %v508_v23 }
 0x1f1   :  { %678 = vmatpush.msra.mxu3 %v3923_v22  ;;  %v535_v24 = vpop.f32.mrf.mxu2 }
 0x1f2   :  { %v3928_v25 = vadd.f32 %v535_v24, %v364_v17  ;;  %v3309_v17 = vld [vmem:[#allocation9 + $0x8] sm:$0xff] }
 0x1f4   :  { %701 = vmatpush.msrb.mxu3 %v3928_v25 }
 0x26b   :  { %v582_v32 = vpop.f32.mrf.mxu3 }
 0x26c   :  { %v583_v33 = vadd.f32 %v582_v32, %v3934_v31 }
 0x26e   :  { %v612_v36 = vsel %vm611_vm8, %v583_v33, -inf }
 0x26f   :  { %613 = vmax.xlane.f32.xlu2 %v612_v36 }
 0x273   :  { %v608_v38 = vpop.f32.mrf.mxu3 }
 0x274   :  { %v609_v39 = vadd.f32 %v608_v38, %v3938_v37 }
 0x276   :  { %v615_v40 = vsel %vm611_vm8, %v609_v39, -inf }
 0x277   :  { %616 = vmax.xlane.f32.xlu2 %v615_v40 }
 0x28f   :  { %709 = vrot.lane.b32.xlu2 %v520_v15, %s3728_s12 }
 0x297   :  { %735 = vrot.lane.b32.xlu2 %v508_v23, %s3728_s12 }
 0x2e2   :  { %v614_v41 = vpop.xlane.xlu2 %613 }
 0x2e3   :  { %v618_v42 = vsub.f32 %v583_v33, %v614_v41 }
 0x2e5   :  { %v620_v43 = vmul.f32 1.442695, %v618_v42 }
 0x2e7   :  { %3465 = vpow2.f32 %v620_v43 }
 0x2ea   :  { %v617_v44 = vpop.xlane.xlu2 %616 }
 0x2eb   :  { %v619_v45 = vsub.f32 %v609_v39, %v617_v44 }
 0x2ed   :  { %v3466_v46 = vpop.eup %3465  ;;  %v622_v47 = vmul.f32 1.442695, %v619_v45 }
 0x2ee   :  { %v624_v48 = vsel %vm611_vm8, %v3466_v46, 0.0 }
 0x2ef   :  { %3467 = vpow2.f32 %v622_v47  ;;  %625 = vadd.xlane.f32.xlu0 %v624_v48 }
 0x2f2   :  { %v710_v4 = vpop.permute.xlu2 %709 }
 0x2f5   :  { %v3468_v49 = vpop.eup %3467 }
 0x2f6   :  { %v627_v50 = vsel %vm611_vm8, %v3468_v49, 0.0 }
 0x2f7   :  { %628 = vadd.xlane.f32.xlu1 %v627_v50 }
 0x2fa   :  { %v736_v15 = vpop.permute.xlu2 %735 }
 0x303   :  { %707 = vrot.lane.b32.xlu0 %v506_v16, %s3728_s12  ;;  %v3310_v16 = vld [vmem:[#allocation9 + $0x10] sm:$0xff] }
 0x310   :  { %737 = vrot.lane.b32.xlu1 %v522_v21, %s3728_s12 }
 0x362   :  { %v626_v51 = vpop.xlane.xlu0 %625 }
 0x363   :  { %3469 = vrcp.f32 %v626_v51  ;;  %v641_v56 = vand.u32 2147483648, %v626_v51  ;;  %v639_v58 = vand.u32 2147483647, %v626_v51  ;;  %vm635_vm10 = vweird.f32 %v626_v51 }
 0x365   :  { %v642_v61 = vor.u32 1.1754944e-38, %v641_v56  ;;  %vm640_vm12 = vcmp.eq.f32.partialorder %v639_v58, 8.507059e+37 }
 0x369   :  { %v3470_v52 = vpop.eup %3469 }
 0x36a   :  { %v631_v53 = vmul.f32 %v3470_v52, %v626_v51  ;;  %v629_v54 = vpop.xlane.xlu1 %628  ;;  %vm636_vm9 = vweird.f32 %v3470_v52 }
 0x36b   :  { %3471 = vrcp.f32 %v629_v54  ;;  %vm637_vm11 = vmor %vm635_vm10, %vm636_vm9  ;;  %v656_v3 = vand.u32 2147483648, %v629_v54  ;;  %v654_v6 = vand.u32 2147483647, %v629_v54  ;;  %vm650_vm14 = vweird.f32 %v629_v54 }
 0x36c   :  { %v632_v55 = vsub.f32 1.0, %v631_v53 }
 0x36d   :  { %v657_v8 = vor.u32 1.1754944e-38, %v656_v3  ;;  %vm655_vm0 = vcmp.eq.f32.partialorder %v654_v6, 8.507059e+37  ;;  %v3314_v6 = vld [vmem:[#allocation9 + $0x30] sm:$0xff] }
 0x36e   :  { %v633_v57 = vmul.f32 %v3470_v52, %v632_v55 }
 0x370   :  { %v634_v59 = vadd.f32 %v3470_v52, %v633_v57 }
 0x371   :  { %v3472_v60 = vpop.eup %3471 }
 0x372   :  { %v638_v62 = vsel %vm637_vm11, %v3470_v52, %v634_v59  ;;  %v646_v63 = vmul.f32 %v3472_v60, %v629_v54  ;;  %vm651_vm13 = vweird.f32 %v3472_v60 }
 0x373   :  { %v643_v0 = vsel %vm640_vm12, %v642_v61, %v638_v62  ;;  %vm652_vm15 = vmor %vm650_vm14, %vm651_vm13 }
 0x374   :  { %v647_v1 = vsub.f32 1.0, %v646_v63  ;;  %v644_v2 = vmul.f32 %v3466_v46, %v643_v0 }
 0x375   :  { %v708_v14 = vpop.permute.xlu0 %707 }
 0x376   :  { %v648_v5 = vmul.f32 %v3472_v60, %v647_v1  ;;  %2772 = vmatmul.msk.f32.vlgmr.msra.gmra.mxu3 %vm611_vm8, %v644_v2 }
 0x377   :  { %2774 = vmatpush.xpose.msk.msra.mxu3 %vm558_vm7, %v710_v4 }
 0x378   :  { %v649_v7 = vadd.f32 %v3472_v60, %v648_v5 }
 0x37a   :  { %v653_v30 = vsel %vm652_vm15, %v3472_v60, %v649_v7  ;;  %v3313_v7 = vld [vmem:[#allocation9 + $0x28] sm:$0xff] }
 0x37b   :  { %v658_v34 = vsel %vm655_vm0, %v657_v8, %v653_v30  ;;  %v3312_v8 = vld [vmem:[#allocation9 + $0x20] sm:$0xff] }
 0x37c   :  { %v659_v11 = vmul.f32 %v3468_v49, %v658_v34 }
 0x37e   :  { %2773 = vmatmul.msk.f32.vlgmr.msrb.gmra.mxu3 %vm611_vm8, %v659_v11 }
 0x382   :  { %v738_v12 = vpop.permute.xlu1 %737 }
 0x383   :  { %2776 = vmatpush.xpose.msk.msrb.mxu3 %vm558_vm7, %v738_v12 }
 0x386   :  { %2775 = vmatmul.msk.f32.vlgmr.msra.gmra.mxu3 %vm558_vm7, %v708_v14 }
 0x387   :  { %938 = vmatpush.bf16.msra.mxu3 %v3311_v13  ;;  %v3445_v13 = vld [vmem:[%s4147_s9] ss:$0 sm:$0xff] }
 0x38b   :  { %939 = vmatpush.bf16.msra.mxu3 %v3310_v16 }
 0x38e   :  { %2777 = vmatmul.msk.f32.vlgmr.msrb.gmra.mxu3 %vm558_vm7, %v736_v15 }
 0x38f   :  { %940 = vmatpush.bf16.msra.mxu3 %v3309_v17 }
 0x393   :  { %941 = vmatpush.bf16.msra.mxu3 %v3308_v18 }
 0x3f9   :  { %v680_v19 = vpop.f32.mrf.mxu3 }
 0x401   :  { %v703_v20 = vpop.f32.mrf.mxu3 }
 0x402   :  { %v706_v21 = vpack.c.bf16 %v703_v20, %v680_v19 }
 0x404   :  { %2813 = vmatmul.msk.bf16.vlgmr.msra.gmra.mxu3 %vm558_vm7, %v706_v21 }
 0x409   :  { %v732_v23 = vpop.f32.mrf.mxu3 }
 0x40a   :  { %v733_v24 = vadd.f32 %v732_v23, %v3934_v31 }
 0x40c   :  { %v763_v26 = vsel %vm611_vm8, %v733_v24, -inf }
 0x40d   :  { %764 = vmax.xlane.f32.xlu0 %v763_v26 }
 0x411   :  { %v760_v28 = vpop.f32.mrf.mxu3 }
 0x412   :  { %v761_v29 = vadd.f32 %v760_v28, %v3938_v37 }
 0x414   :  { %v766_v32 = vsel %vm611_vm8, %v761_v29, -inf }
 0x415   :  { %767 = vmax.xlane.f32.xlu2 %v766_v32 }
 0x42d   :  { %812 = vrot.lane.b32.xlu2 %v3923_v22, %s3728_s12  ;;  %v3315_v22 = vld [vmem:[#allocation9 + $0x38] sm:$0xff] }
 0x42e   :  { %897 = vmatpush.bf16.msrb.mxu2 %v3315_v22  ;;  %v2866_v22 = vld [vmem:[#allocation10 + $0x68] sm:$0xf0] }
 0x432   :  { %898 = vmatpush.bf16.msrb.mxu2 %v3314_v6  ;;  %v2824_v6 = vld [vmem:[#allocation10 + $0x10] sm:$0xf] }
 0x436   :  { %899 = vmatpush.bf16.msrb.mxu2 %v3313_v7  ;;  %v3319_v7 = vld [vmem:[#allocation10 + $0x14] sm:$0xf0] }
 0x43a   :  { %900 = vmatpush.bf16.msrb.mxu2 %v3312_v8  ;;  %v3318_v8 = vld [vmem:[#allocation10 + $0x14] sm:$0xf] }
 0x480   :  { %v765_v33 = vpop.xlane.xlu0 %764 }
 0x481   :  { %v769_v35 = vsub.f32 %v733_v24, %v765_v33 }
 0x483   :  { %v771_v36 = vmul.f32 1.442695, %v769_v35 }
 0x485   :  { %3473 = vpow2.f32 %v771_v36  ;;  %v3331_v36 = vld [vmem:[#allocation10 + $0x74] sm:$0xf0] }
 0x487   :  { %v943_v12 = vpop.f32.mrf.mxu3 }
 0x488   :  { %v768_v38 = vpop.xlane.xlu2 %767 }
 0x489   :  { %v770_v39 = vsub.f32 %v761_v29, %v768_v38  ;;  %v3330_v38 = vld [vmem:[#allocation10 + $0x74] sm:$0xf] }
 0x48b   :  { %v3474_v40 = vpop.eup %3473  ;;  %v773_v41 = vmul.f32 1.442695, %v770_v39 }
 0x48c   :  { %v775_v42 = vsel %vm611_vm8, %v3474_v40, 0.0 }
 0x48d   :  { %3475 = vpow2.f32 %v773_v41  ;;  %776 = vadd.xlane.f32.xlu1 %v775_v42  ;;  %v2864_v42 = vld [vmem:[#allocation10 + $0x60] sm:$0xf] }
 0x48f   :  { %v945_v18 = vpop.f32.mrf.mxu3 }
 0x490   :  { %v813_v43 = vpop.permute.xlu2 %812 }
 0x491   :  { %833 = vmatpush.msrb.mxu1 %v813_v43  ;;  %v3329_v43 = vld [vmem:[#allocation10 + $0x64] sm:$0xf0] }
 0x493   :  { %v3476_v44 = vpop.eup %3475 }
 0x494   :  { %v778_v45 = vsel %vm611_vm8, %v3476_v44, 0.0 }
 0x495   :  { %779 = vadd.xlane.f32.xlu0 %v778_v45  ;;  %v2865_v45 = vor.u32 %v3329_v43, %v2864_v42 }
 0x4a6   :  { %839 = vrot.lane.b32.xlu1 %v3928_v25, %s3728_s12 }
 0x500   :  { %v777_v46 = vpop.xlane.xlu1 %776 }
 0x501   :  { %3477 = vrcp.f32 %v777_v46  ;;  %v792_v51 = vand.u32 2147483648, %v777_v46  ;;  %v790_v53 = vand.u32 2147483647, %v777_v46  ;;  %vm786_vm2 = vweird.f32 %v777_v46 }
 0x503   :  { %v793_v56 = vor.u32 1.1754944e-38, %v792_v51  ;;  %vm791_vm4 = vcmp.eq.f32.partialorder %v790_v53, 8.507059e+37  ;;  %v2858_v51 = vld [vmem:[#allocation10 + $0x58] sm:$0xf0]  ;;  %v2848_v53 = vld [vmem:[#allocation10 + $0x40] sm:$0xf] }
 0x507   :  { %v3478_v47 = vpop.eup %3477 }
 0x508   :  { %v782_v48 = vmul.f32 %v3478_v47, %v777_v46  ;;  %v780_v49 = vpop.xlane.xlu0 %779  ;;  %vm787_vm1 = vweird.f32 %v3478_v47 }
 0x509   :  { %3479 = vrcp.f32 %v780_v49  ;;  %vm788_vm3 = vmor %vm786_vm2, %vm787_vm1  ;;  %v807_v61 = vand.u32 2147483648, %v780_v49  ;;  %v805_v63 = vand.u32 2147483647, %v780_v49  ;;  %vm801_vm6 = vweird.f32 %v780_v49 }
 0x50a   :  { %v783_v50 = vsub.f32 1.0, %v782_v48  ;;  %v3327_v48 = vld [vmem:[#allocation10 + $0x54] sm:$0xf0] }
 0x50b   :  { %v808_v1 = vor.u32 1.1754944e-38, %v807_v61  ;;  %vm806_vm10 = vcmp.eq.f32.partialorder %v805_v63, 8.507059e+37 }
 0x50c   :  { %v784_v52 = vmul.f32 %v3478_v47, %v783_v50 }
 0x50e   :  { %v785_v54 = vadd.f32 %v3478_v47, %v784_v52 }
 0x50f   :  { %v3480_v55 = vpop.eup %3479 }
 0x510   :  { %v797_v25 = vmul.f32 %v3480_v55, %v780_v49  ;;  %v789_v57 = vsel %vm788_vm3, %v3478_v47, %v785_v54  ;;  %vm802_vm5 = vweird.f32 %v3480_v55  ;;  %v2856_v47 = vld [vmem:[#allocation10 + $0x50] sm:$0xf]  ;;  %v3326_v49 = vld [vmem:[#allocation10 + $0x54] sm:$0xf]  ;;  %v3325_v54 = vld [vmem:[#allocation10 + $0x44] sm:$0xf0] }
 0x511   :  { %v794_v58 = vsel %vm791_vm4, %v793_v56, %v789_v57  ;;  %vm803_vm9 = vmor %vm801_vm6, %vm802_vm5  ;;  %v2857_v50 = vor.u32 %v3327_v48, %v2856_v47  ;;  %v2861_v52 = vor.u32 %v3326_v49, %v2858_v51  ;;  %v2849_v56 = vor.u32 %v3325_v54, %v2848_v53  ;;  %v3447_v48 = vld [vmem:[%s4149_s11] ss:$0 sm:$0xff]  ;;  %v3347_v53 = vld [vmem:[#allocation12 + $0x78] sm:$0xff] }
 0x512   :  { %v798_v59 = vsub.f32 1.0, %v797_v25  ;;  %v795_v60 = vmul.f32 %v3474_v40, %v794_v58  ;;  %v2874_v40 = vld [vmem:[#allocation10 + $0x78] sm:$0xf0]  ;;  %v2850_v25 = vld [vmem:[#allocation10 + $0x48] sm:$0xf0]  ;;  %1323 = vmatpush.bf16.msrb.mxu3 %v3347_v53  ;;  %v3346_v54 = vld [vmem:[#allocation12 + $0x70] sm:$0xff] }
 0x513   :  { %v2877_v41 = vor.u32 %v3330_v38, %v2874_v40  ;;  %v2840_v58 = vld [vmem:[#allocation10 + $0x30] sm:$0xf] }
 0x514   :  { %v799_v62 = vmul.f32 %v3480_v55, %v798_v59  ;;  %2778 = vmatmul.msk.f32.vlgmr.msrb.gmra.mxu1 %vm611_vm8, %v795_v60  ;;  %v3323_v59 = vld [vmem:[#allocation10 + $0x34] sm:$0xf0]  ;;  %v3322_v60 = vld [vmem:[#allocation10 + $0x34] sm:$0xf] }
 0x515   :  { %v2841_v61 = vor.u32 %v3323_v59, %v2840_v58  ;;  %v3335_v58 = vld [vmem:[#allocation12 + $0x18] sm:$0xff] }
 0x516   :  { %v800_v0 = vadd.f32 %v3480_v55, %v799_v62  ;;  %v2842_v62 = vld [vmem:[#allocation10 + $0x38] sm:$0xf0]  ;;  %1324 = vmatpush.bf16.msrb.mxu3 %v3346_v54 }
 0x517   :  { %v2845_v63 = vor.u32 %v3322_v60, %v2842_v62  ;;  %v3343_v59 = vld [vmem:[#allocation12 + $0x58] sm:$0xff]  ;;  %v3334_v60 = vld [vmem:[#allocation12 + $0x10] sm:$0xff]  ;;  %v3333_v62 = vld [vmem:[#allocation12 + $0x8] sm:$0xff] }
 0x518   :  { %v804_v2 = vsel %vm803_vm9, %v3480_v55, %v800_v0  ;;  %v840_v3 = vpop.permute.xlu1 %839  ;;  %v3324_v55 = vld [vmem:[#allocation10 + $0x44] sm:$0xf]  ;;  %v2832_v0 = vld [vmem:[#allocation10 + $0x20] sm:$0xf] }
 0x519   :  { %v809_v4 = vsel %vm806_vm10, %v808_v1, %v804_v2  ;;  %860 = vmatpush.msra.mxu1 %v840_v3  ;;  %v2853_v57 = vor.u32 %v3324_v55, %v2850_v25  ;;  %v3321_v1 = vld [vmem:[#allocation10 + $0x24] sm:$0xf0]  ;;  %v3320_v2 = vld [vmem:[#allocation10 + $0x24] sm:$0xf] }
 0x51a   :  { %v810_v5 = vmul.f32 %v3476_v44, %v809_v4  ;;  %v3328_v44 = vld [vmem:[#allocation10 + $0x64] sm:$0xf]  ;;  %v2833_v3 = vor.u32 %v3321_v1, %v2832_v0  ;;  %v2834_v4 = vld [vmem:[#allocation10 + $0x28] sm:$0xf0]  ;;  %v1024_v0 = vld [vmem:[%s4151_s13] sm:$0x3] }
 0x51b   :  { %1125 = vmatpush.bf16.msrb.mxu1 %v2877_v41  ;;  %v2869_v46 = vor.u32 %v3328_v44, %v2866_v22  ;;  %v3446_v44 = vld [vmem:[%s4148_s10] ss:$0 sm:$0xff]  ;;  %v3337_v55 = vld [vmem:[#allocation12 + $0x28] sm:$0xff]  ;;  %v3336_v25 = vld [vmem:[#allocation12 + $0x20] sm:$0xff] }
 0x51c   :  { %2779 = vmatmul.msk.f32.vlgmr.msra.gmra.mxu1 %vm611_vm8, %v810_v5  ;;  %v2837_v5 = vor.u32 %v3320_v2, %v2834_v4  ;;  %v3332_v1 = vld [vmem:[#allocation12] sm:$0xff]  ;;  %v1028_v4 = vperm.slane %v1024_v0, 1 }
 0x51d   :  { %v3340_v2 = vld [vmem:[#allocation12 + $0x40] sm:$0xff] }
 0x51f   :  { %1126 = vmatpush.bf16.msrb.mxu1 %v2869_v46 }
 0x523   :  { %1127 = vmatpush.bf16.msrb.mxu1 %v2861_v52  ;;  %v3339_v52 = vld [vmem:[#allocation12 + $0x38] sm:$0xff] }
 0x524   :  { %1309 = vmatpush.bf16.msra.mxu2 %v3339_v52 }
 0x527   :  { %1128 = vmatpush.bf16.msrb.mxu1 %v2853_v57  ;;  %v3344_v57 = vld [vmem:[#allocation12 + $0x60] sm:$0xff] }
 0x52b   :  { %1129 = vmatpush.bf16.msrb.mxu1 %v2845_v63  ;;  %v3341_v63 = vld [vmem:[#allocation12 + $0x48] sm:$0xff] }
 0x52f   :  { %1130 = vmatpush.bf16.msrb.mxu1 %v2837_v5 }
 0x591   :  { %v835_v30 = vpop.f32.mrf.mxu1 }
 0x599   :  { %v862_v34 = vpop.f32.mrf.mxu1 }
 0x59a   :  { %v865_v11 = vpack.c.bf16 %v862_v34, %v835_v30  ;;  %v2825_v30 = vor.u32 %v3319_v7, %v2824_v6  ;;  %v2826_v34 = vld [vmem:[#allocation10 + $0x18] sm:$0xf0] }
 0x59c   :  { %2796 = vmatmul.msk.bf16.vlgmr.msrb.gmra.mxu2 %vm558_vm7, %v865_v11  ;;  %v2816_v11 = vld [vmem:[#allocation10] sm:$0xf] }
 0x61f   :  { %v902_v14 = vpop.f32.mrf.mxu2 }
 0x620   :  { %v944_v15 = vadd.f32 %v943_v12, %v902_v14  ;;  %v3317_v12 = vld [vmem:[#allocation10 + $0x4] sm:$0xf0]  ;;  %v2829_v14 = vor.u32 %v3318_v8, %v2826_v34 }
 0x622   :  { %v952_v16 = vadd.f32 %v3445_v13, %v944_v15  ;;  %v3316_v15 = vld [vmem:[#allocation10 + $0x4] sm:$0xf]  ;;  %1131 = vmatpush.bf16.msrb.mxu1 %v2829_v14 }
 0x624   :  { %v954_v17 = vadd.f32 %v952_v16, %v3912_v9  ;;  %v2818_v16 = vld [vmem:[#allocation10 + $0x8] sm:$0xf0] }
 0x626   :  { %958 = vadd.xlane.f32.xlu0 %v954_v17 }
 0x627   :  { %v904_v19 = vpop.f32.mrf.mxu2 }
 0x628   :  { %v946_v20 = vadd.f32 %v945_v18, %v904_v19  ;;  %v2817_v18 = vor.u32 %v3317_v12, %v2816_v11  ;;  %v2821_v19 = vor.u32 %v3316_v15, %v2818_v16 }
 0x62a   :  { %v953_v21 = vadd.f32 %v3445_v13, %v946_v20  ;;  %1132 = vmatpush.bf16.msrb.mxu1 %v2821_v19 }
 0x62c   :  { %v955_v23 = vadd.f32 %v953_v21, %v3914_v10  ;;  %v2872_v10 = vld [vmem:[#allocation10 + $0x70] sm:$0xf] }
 0x62d   :  { %v2873_v39 = vor.u32 %v3331_v36, %v2872_v10 }
 0x62e   :  { %960 = vadd.xlane.f32.xlu0 %v955_v23 }
 0x62f   :  { %1111 = vmatpush.bf16.msrb.mxu0 %v2873_v39 }
 0x633   :  { %1112 = vmatpush.bf16.msrb.mxu0 %v2865_v45 }
 0x637   :  { %1113 = vmatpush.bf16.msrb.mxu0 %v2857_v50 }
 0x63b   :  { %1114 = vmatpush.bf16.msrb.mxu0 %v2849_v56  ;;  %v3345_v56 = vld [vmem:[#allocation12 + $0x68] sm:$0xff] }
 0x63c   :  { %1325 = vmatpush.bf16.msrb.mxu3 %v3345_v56 }
 0x63f   :  { %1115 = vmatpush.bf16.msrb.mxu0 %v2841_v61  ;;  %v3342_v61 = vld [vmem:[#allocation12 + $0x50] sm:$0xff] }
 0x640   :  { %1326 = vmatpush.bf16.msrb.mxu3 %v3344_v57 }
 0x643   :  { %1116 = vmatpush.bf16.msrb.mxu0 %v2833_v3  ;;  %v1027_v3 = vperm.slane %v1024_v0, 0 }
 0x644   :  { %1327 = vmatpush.bf16.msrb.mxu3 %v3343_v59 }
 0x647   :  { %1117 = vmatpush.bf16.msrb.mxu0 %v2825_v30 }
 0x648   :  { %1328 = vmatpush.bf16.msrb.mxu3 %v3342_v61 }
 0x64b   :  { %1118 = vmatpush.bf16.msrb.mxu0 %v2817_v18 }
 0x64c   :  { %1329 = vmatpush.bf16.msrb.mxu3 %v3341_v63 }
 0x650   :  { %1330 = vmatpush.bf16.msrb.mxu3 %v3340_v2 }
 0x699   :  { %v959_v24 = vpop.xlane.xlu0 %958 }
 0x69a   :  { %v962_v26 = vmul.f32 %v959_v24, %v3890_v27 }
 0x69c   :  { %v3974_v28 = vsub.f32 %v954_v17, %v962_v26 }
 0x69e   :  { %v966_v29 = vmul.f32 %v3974_v28, %v3974_v28 }
 0x6a0   :  { %968 = vadd.xlane.f32.xlu0 %v966_v29 }
 0x6a1   :  { %v961_v32 = vpop.xlane.xlu0 %960 }
 0x6a2   :  { %v963_v9 = vmul.f32 %v961_v32, %v3890_v27 }
 0x6a4   :  { %v3979_v33 = vsub.f32 %v955_v23, %v963_v9 }
 0x6a6   :  { %v967_v35 = vmul.f32 %v3979_v33, %v3979_v33 }
 0x6a8   :  { %970 = vadd.xlane.f32.xlu2 %v967_v35 }
 0x713   :  { %v969_v13 = vpop.xlane.xlu0 %968 }
 0x714   :  { %v972_v17 = vmul.f32 %v969_v13, %v3890_v27 }
 0x716   :  { %v974_v20 = vadd.f32 1e-12, %v972_v17 }
 0x718   :  { %3481 = vrsqrt.f32 %v974_v20  ;;  %vm982_vm12 = vweird.f32 %v974_v20 }
 0x71b   :  { %v971_v21 = vpop.xlane.xlu2 %970 }
 0x71c   :  { %v973_v23 = vmul.f32 %v971_v21, %v3890_v27 }
 0x71e   :  { %v3482_v24 = vpop.eup %3481  ;;  %v975_v26 = vadd.f32 1e-12, %v973_v23 }
 0x71f   :  { %v977_v29 = vmul.f32 %v3482_v24, %v974_v20  ;;  %vm983_vm11 = vweird.f32 %v3482_v24 }
 0x720   :  { %3483 = vrsqrt.f32 %v975_v26  ;;  %vm984_vm13 = vmor %vm982_vm12, %vm983_vm11  ;;  %vm992_vm15 = vweird.f32 %v975_v26 }
 0x721   :  { %v978_v32 = vmul.f32 %v3482_v24, %v977_v29 }
 0x723   :  { %v979_v9 = vmul.f32 0.5, %v978_v32 }
 0x725   :  { %v980_v35 = vsub.f32 1.5, %v979_v9 }
 0x726   :  { %v3484_v10 = vpop.eup %3483 }
 0x727   :  { %v981_v36 = vmul.f32 %v3482_v24, %v980_v35  ;;  %v987_v38 = vmul.f32 %v3484_v10, %v975_v26  ;;  %vm993_vm14 = vweird.f32 %v3484_v10 }
 0x728   :  { %vm994_vm0 = vmor %vm992_vm15, %vm993_vm14 }
 0x729   :  { %v988_v39 = vmul.f32 %v3484_v10, %v987_v38  ;;  %v985_v40 = vsel %vm984_vm13, %v3482_v24, %v981_v36 }
 0x72a   :  { %v996_v43 = vmul.f32 %v985_v40, %v3974_v28 }
 0x72b   :  { %v989_v41 = vmul.f32 0.5, %v988_v39 }
 0x72c   :  { %v1001_v47 = vmul.f32 %v3446_v44, %v996_v43 }
 0x72d   :  { %v990_v42 = vsub.f32 1.5, %v989_v41 }
 0x72e   :  { %v3993_v50 = vadd.f32 %v3447_v48, %v1001_v47 }
 0x72f   :  { %v991_v45 = vmul.f32 %v3484_v10, %v990_v42 }
 0x731   :  { %v995_v22 = vsel %vm994_vm0, %v3484_v10, %v991_v45 }
 0x732   :  { %v997_v46 = vmul.f32 %v995_v22, %v3979_v33  ;;  %v3338_v33 = vld [vmem:[#allocation12 + $0x30] sm:$0xff] }
 0x733   :  { %1310 = vmatpush.bf16.msra.mxu2 %v3338_v33 }
 0x734   :  { %v1002_v49 = vmul.f32 %v3446_v44, %v997_v46 }
 0x736   :  { %v3995_v51 = vadd.f32 %v3447_v48, %v1002_v49 }
 0x737   :  { %1311 = vmatpush.bf16.msra.mxu2 %v3337_v55 }
 0x738   :  { %v1025_v28 = vpack.c.bf16 %v3995_v51, %v3993_v50 }
 0x73a   :  { %1119 = vmatmul.bf16.vlgmr.msrb.gmra.mxu0 %v1025_v28  ;;  %1133 = vmatmul.bf16.vlgmr.msrb.gmra.mxu1 %v1025_v28 }
 0x73b   :  { %1312 = vmatpush.bf16.msra.mxu2 %v3336_v25  ;;  %v3448_v25 = vld [vmem:[%s4153_s15] ss:$0 sm:$0xff] }
 0x73f   :  { %1313 = vmatpush.bf16.msra.mxu2 %v3335_v58 }
 0x743   :  { %1314 = vmatpush.bf16.msra.mxu2 %v3334_v60 }
 0x747   :  { %1315 = vmatpush.bf16.msra.mxu2 %v3333_v62 }
 0x74b   :  { %1316 = vmatpush.bf16.msra.mxu2 %v3332_v1 }
 0x7b7   :  { %v1120_v5 = vpop.f32.mrf.mxu0  ;;  %v1134_v6 = vpop.f32.mrf.mxu1 }
 0x7b8   :  { %v1121_v7 = vadd.f32 %v1120_v5, %v1027_v3  ;;  %v1135_v8 = vadd.f32 %v1134_v6, %v1028_v4 }
 0x7ba   :  { %v1143_v30 = vmul.f32 0.044715, %v1121_v7  ;;  %v1144_v34 = vmul.f32 0.044715, %v1135_v8  ;;  %v1139_v22 = vmul.f32 0.5, %v1121_v7  ;;  %v1140_v48 = vmul.f32 0.5, %v1135_v8 }
 0x7bc   :  { %v1147_v11 = vmul.f32 %v1143_v30, %v1121_v7  ;;  %v1148_v12 = vmul.f32 %v1144_v34, %v1135_v8  ;;  %v3370_v34 = vld [vmem:[#allocation7 + $0x170] sm:$0xf0] }
 0x7be   :  { %v1151_v13 = vmul.f32 %v1147_v11, %v1121_v7  ;;  %v1152_v14 = vmul.f32 %v1148_v12, %v1135_v8  ;;  %v3369_v11 = vld [vmem:[#allocation7 + $0x16c] sm:$0xf] }
 0x7bf   :  { %v1122_v15 = vpop.f32.mrf.mxu0  ;;  %v1136_v16 = vpop.f32.mrf.mxu1 }
 0x7c0   :  { %v1155_v17 = vadd.f32 %v1151_v13, %v1121_v7  ;;  %v1123_v18 = vadd.f32 %v1122_v15, %v1027_v3  ;;  %v1137_v19 = vadd.f32 %v1136_v16, %v1028_v4  ;;  %v1156_v20 = vadd.f32 %v1152_v14, %v1135_v8  ;;  %v3031_v13 = vld [vmem:[#allocation7 + $0x174] sm:$0xf0]  ;;  %v3037_v14 = vld [vmem:[#allocation7 + $0x170] sm:$0xf]  ;;  %v3371_v15 = vld [vmem:[#allocation7 + $0x178] sm:$0xf0] }
 0x7c1   :  { %v3034_v16 = vor.u32 %v3369_v11, %v3031_v13 }
 0x7c2   :  { %v1145_v21 = vmul.f32 0.044715, %v1123_v18  ;;  %v1146_v23 = vmul.f32 0.044715, %v1137_v19  ;;  %v1159_v24 = vmul.f32 0.7978846, %v1155_v17  ;;  %v3038_v17 = vor.u32 %v3371_v15, %v3037_v14 }
 0x7c3   :  { %v1160_v29 = vmul.f32 0.7978846, %v1156_v20  ;;  %v1141_v46 = vmul.f32 0.5, %v1123_v18  ;;  %v1142_v49 = vmul.f32 0.5, %v1137_v19  ;;  %1576 = vmatpush.bf16.msra.mxu1 %v3034_v16  ;;  %v3366_v20 = vld [vmem:[#allocation7 + $0x154] sm:$0xf] }
 0x7c4   :  { %v1149_v26 = vmul.f32 %v1145_v21, %v1123_v18  ;;  %v1150_v32 = vmul.f32 %v1146_v23, %v1137_v19  ;;  %3485 = vtanh.f32 %v1159_v24  ;;  %1590 = vmatpush.bf16.msrb.mxu2 %v3038_v17  ;;  %v3019_v23 = vld [vmem:[#allocation7 + $0x15c] sm:$0xf0]  ;;  %v3025_v24 = vld [vmem:[#allocation7 + $0x158] sm:$0xf]  ;;  %v3349_v15 = vld [vmem:[#allocation7 + $0xc8] sm:$0xf0] }
 0x7c5   :  { %3487 = vtanh.f32 %v1160_v29  ;;  %v3022_v29 = vor.u32 %v3366_v20, %v3019_v23  ;;  %v2945_v14 = vld [vmem:[#allocation7 + $0xc0] sm:$0xf]  ;;  %v3348_v16 = vld [vmem:[#allocation7 + $0xc4] sm:$0xf]  ;;  %v2953_v20 = vld [vmem:[#allocation7 + $0xc8] sm:$0xf] }
 0x7c6   :  { %v1153_v9 = vmul.f32 %v1149_v26, %v1123_v18  ;;  %v1154_v35 = vmul.f32 %v1150_v32, %v1137_v19  ;;  %v3368_v26 = vld [vmem:[#allocation7 + $0x160] sm:$0xf0] }
 0x7c7   :  { %v3026_v32 = vor.u32 %v3368_v26, %v3025_v24  ;;  %1577 = vmatpush.bf16.msra.mxu1 %v3022_v29 }
 0x7c8   :  { %v1157_v10 = vadd.f32 %v1153_v9, %v1123_v18  ;;  %v1158_v36 = vadd.f32 %v1154_v35, %v1137_v19  ;;  %v3017_v18 = vld [vmem:[#allocation7 + $0x150] sm:$0xf]  ;;  %v3367_v19 = vld [vmem:[#allocation7 + $0x158] sm:$0xf0]  ;;  %v3005_v9 = vld [vmem:[#allocation7 + $0x138] sm:$0xf] }
 0x7c9   :  { %v3018_v21 = vor.u32 %v3367_v19, %v3017_v18  ;;  %1591 = vmatpush.bf16.msrb.mxu2 %v3026_v32  ;;  %v3364_v35 = vld [vmem:[#allocation7 + $0x140] sm:$0xf0]  ;;  %v2946_v18 = vor.u32 %v3349_v15, %v2945_v14  ;;  %v2947_v19 = vld [vmem:[#allocation7 + $0xcc] sm:$0xf0] }
 0x7ca   :  { %v1161_v38 = vmul.f32 0.7978846, %v1157_v10  ;;  %v1162_v39 = vmul.f32 0.7978846, %v1158_v36  ;;  %v3486_v40 = vpop.eup %3485  ;;  %v3363_v10 = vld [vmem:[#allocation7 + $0x13c] sm:$0xf]  ;;  %v3006_v36 = vor.u32 %v3364_v35, %v3005_v9  ;;  %v2950_v23 = vor.u32 %v3348_v16, %v2947_v19 }
 0x7cb   :  { %v3488_v41 = vpop.eup %3487  ;;  %v1167_v42 = vadd.f32 1.0, %v3486_v40  ;;  %v3365_v40 = vld [vmem:[#allocation7 + $0x148] sm:$0xf0] }
 0x7cc   :  { %3489 = vtanh.f32 %v1161_v38  ;;  %v1168_v44 = vadd.f32 1.0, %v3488_v41  ;;  %v3007_v38 = vld [vmem:[#allocation7 + $0x144] sm:$0xf0] }
 0x7cd   :  { %3491 = vtanh.f32 %v1162_v39  ;;  %v1171_v52 = vmul.f32 %v1167_v42, %v1139_v22  ;;  %v3013_v39 = vld [vmem:[#allocation7 + $0x140] sm:$0xf]  ;;  %v3010_v41 = vor.u32 %v3363_v10, %v3007_v38 }
 0x7ce   :  { %v1172_v33 = vmul.f32 %v1168_v44, %v1140_v48  ;;  %v3014_v42 = vor.u32 %v3365_v40, %v3013_v39  ;;  %v3361_v44 = vld [vmem:[#allocation7 + $0x128] sm:$0xf0]  ;;  %v3362_v48 = vld [vmem:[#allocation7 + $0x130] sm:$0xf0] }
 0x7cf   :  { %1578 = vmatpush.bf16.msra.mxu1 %v3010_v41 }
 0x7d0   :  { %1592 = vmatpush.bf16.msrb.mxu2 %v3014_v42 }
 0x7d2   :  { %v3490_v43 = vpop.eup %3489 }
 0x7d3   :  { %v3492_v45 = vpop.eup %3491  ;;  %v1169_v47 = vadd.f32 1.0, %v3490_v43  ;;  %v2993_v43 = vld [vmem:[#allocation7 + $0x120] sm:$0xf] }
 0x7d4   :  { %v1170_v28 = vadd.f32 1.0, %v3492_v45  ;;  %v3360_v45 = vld [vmem:[#allocation7 + $0x124] sm:$0xf]  ;;  %v2994_v22 = vor.u32 %v3361_v44, %v2993_v43 }
 0x7d5   :  { %v1173_v53 = vmul.f32 %v1169_v47, %v1141_v46  ;;  %v2995_v46 = vld [vmem:[#allocation7 + $0x12c] sm:$0xf0]  ;;  %v3001_v47 = vld [vmem:[#allocation7 + $0x128] sm:$0xf] }
 0x7d6   :  { %v1174_v54 = vmul.f32 %v1170_v28, %v1142_v49  ;;  %v2998_v49 = vor.u32 %v3360_v45, %v2995_v46  ;;  %v3002_v28 = vor.u32 %v3362_v48, %v3001_v47  ;;  %v3449_v47 = vld [vmem:[%s4154_s16] ss:$0 sm:$0xff] }
 0x7d7   :  { %v1208_v55 = vpack.c.bf16 %v1173_v53, %v1171_v52  ;;  %v2981_v52 = vld [vmem:[#allocation7 + $0x108] sm:$0xf]  ;;  %v3358_v53 = vld [vmem:[#allocation7 + $0x110] sm:$0xf0] }
 0x7d8   :  { %v1209_v56 = vpack.c.bf16 %v1174_v54, %v1172_v33  ;;  %1579 = vmatpush.bf16.msra.mxu1 %v2998_v49  ;;  %1593 = vmatpush.bf16.msrb.mxu2 %v3002_v28  ;;  %v3357_v33 = vld [vmem:[#allocation7 + $0x10c] sm:$0xf]  ;;  %v2982_v54 = vor.u32 %v3358_v53, %v2981_v52  ;;  %v3450_v53 = vld [vmem:[%s4155_s17] ss:$0 sm:$0xff] }
 0x7d9   :  { %1317 = vmatmul.bf16.vlgmr.msra.gmra.mxu2 %v1208_v55  ;;  %v2983_v55 = vld [vmem:[#allocation7 + $0x114] sm:$0xf0] }
 0x7da   :  { %1331 = vmatmul.bf16.vlgmr.msrb.gmra.mxu3 %v1209_v56  ;;  %v2989_v56 = vld [vmem:[#allocation7 + $0x110] sm:$0xf] }
 0x85c   :  { %v1318_v57 = vpop.f32.mrf.mxu2 }
 0x85d   :  { %v1319_v58 = vadd.f32 %v3448_v25, %v1318_v57  ;;  %v1332_v59 = vpop.f32.mrf.mxu3  ;;  %v2986_v57 = vor.u32 %v3357_v33, %v2983_v55 }
 0x85f   :  { %v1333_v60 = vadd.f32 %v1332_v59, %v1319_v58  ;;  %1580 = vmatpush.bf16.msra.mxu1 %v2986_v57  ;;  %v2969_v59 = vld [vmem:[#allocation7 + $0xf0] sm:$0xf] }
 0x861   :  { %v1337_v61 = vadd.f32 %v1333_v60, %v3993_v50  ;;  %v3355_v60 = vld [vmem:[#allocation7 + $0xf8] sm:$0xf0] }
 0x863   :  { %1341 = vadd.xlane.f32.xlu1 %v1337_v61 }
 0x864   :  { %v1320_v62 = vpop.f32.mrf.mxu2 }
 0x865   :  { %v1321_v63 = vadd.f32 %v3448_v25, %v1320_v62  ;;  %v1334_v0 = vpop.f32.mrf.mxu3  ;;  %v3359_v25 = vld [vmem:[#allocation7 + $0x118] sm:$0xf0]  ;;  %v2970_v62 = vor.u32 %v3355_v60, %v2969_v59 }
 0x866   :  { %v2990_v58 = vor.u32 %v3359_v25, %v2989_v56 }
 0x867   :  { %v1335_v1 = vadd.f32 %v1334_v0, %v1321_v63  ;;  %v2971_v63 = vld [vmem:[#allocation7 + $0xfc] sm:$0xf0]  ;;  %v2977_v0 = vld [vmem:[#allocation7 + $0xf8] sm:$0xf] }
 0x868   :  { %1594 = vmatpush.bf16.msrb.mxu2 %v2990_v58 }
 0x869   :  { %v1338_v2 = vadd.f32 %v1335_v1, %v3995_v51  ;;  %v3029_v51 = vld [vmem:[#allocation7 + $0x168] sm:$0xf]  ;;  %v3356_v1 = vld [vmem:[#allocation7 + $0x100] sm:$0xf0] }
 0x86a   :  { %v3030_v12 = vor.u32 %v3370_v34, %v3029_v51  ;;  %v2965_v51 = vld [vmem:[#allocation7 + $0xe0] sm:$0xf]  ;;  %v3353_v34 = vld [vmem:[#allocation7 + $0xe8] sm:$0xf0] }
 0x86b   :  { %1343 = vadd.xlane.f32.xlu0 %v1338_v2  ;;  %v2966_v13 = vor.u32 %v3353_v34, %v2965_v51 }
 0x86c   :  { %1562 = vmatpush.bf16.msra.mxu0 %v3030_v12 }
 0x870   :  { %1563 = vmatpush.bf16.msra.mxu0 %v3018_v21  ;;  %v3350_v21 = vld [vmem:[#allocation7 + $0xd0] sm:$0xf0] }
 0x871   :  { %v2954_v24 = vor.u32 %v3350_v21, %v2953_v20 }
 0x874   :  { %1564 = vmatpush.bf16.msra.mxu0 %v3006_v36 }
 0x878   :  { %1565 = vmatpush.bf16.msra.mxu0 %v2994_v22 }
 0x87c   :  { %1566 = vmatpush.bf16.msra.mxu0 %v2982_v54 }
 0x880   :  { %1567 = vmatpush.bf16.msra.mxu0 %v2970_v62 }
 0x8d6   :  { %v1342_v3 = vpop.xlane.xlu1 %1341 }
 0x8d7   :  { %v1345_v4 = vmul.f32 %v1342_v3, %v3890_v27  ;;  %v2978_v3 = vor.u32 %v3356_v1, %v2977_v0 }
 0x8d9   :  { %v4008_v5 = vsub.f32 %v1337_v61, %v1345_v4  ;;  %v3354_v61 = vld [vmem:[#allocation7 + $0xf4] sm:$0xf]  ;;  %1595 = vmatpush.bf16.msrb.mxu2 %v2978_v3  ;;  %v2957_v4 = vld [vmem:[#allocation7 + $0xd8] sm:$0xf] }
 0x8db   :  { %v1349_v6 = vmul.f32 %v4008_v5, %v4008_v5 }
 0x8dd   :  { %1351 = vadd.xlane.f32.xlu0 %v1349_v6  ;;  %v3352_v6 = vld [vmem:[#allocation7 + $0xe0] sm:$0xf0]  ;;  %1596 = vmatpush.bf16.msrb.mxu2 %v2966_v13 }
 0x8de   :  { %v1344_v7 = vpop.xlane.xlu0 %1343 }
 0x8df   :  { %v1346_v50 = vmul.f32 %v1344_v7, %v3890_v27  ;;  %v3351_v7 = vld [vmem:[#allocation7 + $0xdc] sm:$0xf] }
 0x8e1   :  { %v4013_v8 = vsub.f32 %v1338_v2, %v1346_v50  ;;  %v2974_v2 = vor.u32 %v3354_v61, %v2971_v63  ;;  %v2958_v50 = vor.u32 %v3352_v6, %v2957_v4  ;;  %1597 = vmatpush.bf16.msrb.mxu2 %v2954_v24 }
 0x8e3   :  { %v1350_v30 = vmul.f32 %v4013_v8, %v4013_v8  ;;  %1581 = vmatpush.bf16.msra.mxu1 %v2974_v2  ;;  %1568 = vmatpush.bf16.msra.mxu0 %v2958_v50 }
 0x8e5   :  { %1353 = vadd.xlane.f32.xlu0 %v1350_v30  ;;  %v2959_v30 = vld [vmem:[#allocation7 + $0xe4] sm:$0xf0] }
 0x8e6   :  { %v2962_v12 = vor.u32 %v3351_v7, %v2959_v30 }
 0x8e7   :  { %1569 = vmatpush.bf16.msra.mxu0 %v2946_v18 }
 0x8e8   :  { %1582 = vmatpush.bf16.msra.mxu1 %v2962_v12 }
 0x8ec   :  { %1583 = vmatpush.bf16.msra.mxu1 %v2950_v23 }
 0x950   :  { %v1352_v11 = vpop.xlane.xlu0 %1351 }
 0x951   :  { %v1355_v17 = vmul.f32 %v1352_v11, %v3890_v27 }
 0x953   :  { %v1357_v26 = vadd.f32 1e-12, %v1355_v17 }
 0x955   :  { %3493 = vrsqrt.f32 %v1357_v26  ;;  %vm1365_vm2 = vweird.f32 %v1357_v26 }
 0x958   :  { %v1354_v29 = vpop.xlane.xlu0 %1353 }
 0x959   :  { %v1356_v32 = vmul.f32 %v1354_v29, %v3890_v27 }
 0x95b   :  { %v3494_v9 = vpop.eup %3493  ;;  %v1358_v35 = vadd.f32 1e-12, %v1356_v32 }
 0x95c   :  { %v1360_v10 = vmul.f32 %v3494_v9, %v1357_v26  ;;  %vm1366_vm1 = vweird.f32 %v3494_v9 }
 0x95d   :  { %3495 = vrsqrt.f32 %v1358_v35  ;;  %vm1367_vm3 = vmor %vm1365_vm2, %vm1366_vm1  ;;  %vm1375_vm5 = vweird.f32 %v1358_v35 }
 0x95e   :  { %v1361_v36 = vmul.f32 %v3494_v9, %v1360_v10 }
 0x960   :  { %v1362_v38 = vmul.f32 0.5, %v1361_v36 }
 0x962   :  { %v1363_v39 = vsub.f32 1.5, %v1362_v38 }
 0x963   :  { %v3496_v40 = vpop.eup %3495 }
 0x964   :  { %v1364_v41 = vmul.f32 %v3494_v9, %v1363_v39  ;;  %v1370_v42 = vmul.f32 %v3496_v40, %v1358_v35  ;;  %vm1376_vm4 = vweird.f32 %v3496_v40 }
 0x965   :  { %vm1377_vm6 = vmor %vm1375_vm5, %vm1376_vm4 }
 0x966   :  { %v1371_v43 = vmul.f32 %v3496_v40, %v1370_v42  ;;  %v1368_v44 = vsel %vm1367_vm3, %v3494_v9, %v1364_v41 }
 0x967   :  { %v1379_v46 = vmul.f32 %v1368_v44, %v4008_v5 }
 0x968   :  { %v1372_v45 = vmul.f32 0.5, %v1371_v43 }
 0x969   :  { %v1384_v52 = vmul.f32 %v3449_v47, %v1379_v46 }
 0x96a   :  { %v1373_v22 = vsub.f32 1.5, %v1372_v45 }
 0x96b   :  { %v4027_v54 = vadd.f32 %v3450_v53, %v1384_v52 }
 0x96c   :  { %v1374_v48 = vmul.f32 %v3496_v40, %v1373_v22 }
 0x96e   :  { %v1378_v49 = vsel %vm1377_vm6, %v3496_v40, %v1374_v48 }
 0x96f   :  { %v1380_v28 = vmul.f32 %v1378_v49, %v4013_v8  ;;  %v2942_v8 = vld [vmem:[%s4145_s7 + $0x3] sm:$0x7] }
 0x970   :  { %v1428_v56 = vperm.slane %v2942_v8, 0  ;;  %v1429_v25 = vperm.slane %v2942_v8, 1  ;;  %v1430_v61 = vperm.slane %v2942_v8, 2 }
 0x971   :  { %v1385_v33 = vmul.f32 %v3449_v47, %v1380_v28 }
 0x973   :  { %v4029_v55 = vadd.f32 %v3450_v53, %v1385_v33 }
 0x975   :  { %v1426_v5 = vpack.c.bf16 %v4029_v55, %v4027_v54 }
 0x977   :  { %1570 = vmatmul.bf16.vlgmr.msra.gmra.mxu0 %v1426_v5  ;;  %1584 = vmatmul.bf16.vlgmr.msra.gmra.mxu1 %v1426_v5 }
 0x978   :  { %1598 = vmatmul.bf16.vlgmr.msrb.gmra.mxu2 %v1426_v5 }
 0x9f4   :  { %v1571_v57 = vpop.f32.mrf.mxu0  ;;  %v1585_v58 = vpop.f32.mrf.mxu1 }
 0x9f5   :  { %v1572_v59 = vadd.f32 %v1571_v57, %v1428_v56  ;;  %v1586_v60 = vadd.f32 %v1585_v58, %v1429_v25 }
 0x9f7   :  { %1770 = vrot.lane.b32.xlu0 %v1586_v60, %s3728_s12  ;;  %3039 = vmatpush.xpose.msk.msra.mxu2 %vm558_vm7, %v1586_v60 }
 0x9f8   :  { %1768 = vrot.lane.b32.xlu1 %v1572_v59, %s3728_s12 }
 0x9fa   :  { %3040 = vmatmul.msk.f32.vlgmr.msra.gmra.mxu2 %vm558_vm7, %v1572_v59 }
 0x9fb   :  { %v1599_v62 = vpop.f32.mrf.mxu2 }
 0x9fc   :  { %v1573_v63 = vpop.f32.mrf.mxu0  ;;  %v1587_v0 = vpop.f32.mrf.mxu1  ;;  %v1600_v3 = vadd.f32 %v1599_v62, %v1430_v61 }
 0x9fd   :  { %v1574_v1 = vadd.f32 %v1573_v63, %v1428_v56  ;;  %v1588_v2 = vadd.f32 %v1587_v0, %v1429_v25 }
 0x9ff   :  { %1798 = vrot.lane.b32.xlu2 %v1588_v2, %s3728_s12  ;;  %3041 = vmatpush.xpose.msk.msra.mxu3 %vm558_vm7, %v1588_v2 }
 0xa00   :  { %1796 = vrot.lane.b32.xlu0 %v1574_v1, %s3728_s12 }
 0xa02   :  { %3042 = vmatmul.msk.f32.vlgmr.msra.gmra.mxu3 %vm558_vm7, %v1574_v1 }
 0xa03   :  { %1739 = vmatpush.msrb.mxu3 %v1600_v3  ;;  %v1601_v4 = vpop.f32.mrf.mxu2 }
 0xa04   :  { %v4044_v6 = vadd.f32 %v1601_v4, %v1430_v61 }
 0xa06   :  { %1762 = vmatpush.msrb.mxu0 %v4044_v6 }
 0xa59   :  { %v1799_v7 = vpop.permute.xlu2 %1798 }
 0xa5a   :  { %3047 = vmatpush.xpose.msk.msrb.mxu2 %vm558_vm7, %v1799_v7 }
 0xa69   :  { %v1771_v50 = vpop.permute.xlu0 %1770 }
 0xa6a   :  { %3045 = vmatpush.xpose.msk.msrb.mxu1 %vm558_vm7, %v1771_v50  ;;  %v1769_v30 = vpop.permute.xlu1 %1768  ;;  %v3375_v50 = vld [vmem:[#allocation9 + $0x58] sm:$0xff] }
 0xa6b   :  { %1999 = vmatpush.bf16.msra.mxu2 %v3375_v50 }
 0xa6d   :  { %3046 = vmatmul.msk.f32.vlgmr.msrb.gmra.mxu1 %vm558_vm7, %v1769_v30 }
 0xa72   :  { %v1797_v51 = vpop.permute.xlu0 %1796 }
 0xa73   :  { %3048 = vmatmul.msk.f32.vlgmr.msrb.gmra.mxu2 %vm558_vm7, %v1797_v51  ;;  %v3373_v51 = vld [vmem:[#allocation9 + $0x48] sm:$0xff] }
 0xa7d   :  { %v1644_v34 = vpop.f32.mrf.mxu2 }
 0xa7e   :  { %v1645_v11 = vadd.f32 %v1644_v34, %v3934_v31 }
 0xa80   :  { %v1673_v12 = vsel %vm611_vm8, %v1645_v11, -inf }
 0xa81   :  { %1674 = vmax.xlane.f32.xlu0 %v1673_v12 }
 0xa85   :  { %v1670_v13 = vpop.f32.mrf.mxu3 }
 0xa86   :  { %v1671_v14 = vadd.f32 %v1670_v13, %v3938_v37 }
 0xa88   :  { %v1676_v15 = vsel %vm611_vm8, %v1671_v14, -inf }
 0xa89   :  { %1677 = vmax.xlane.f32.xlu2 %v1676_v15 }
 0xaea   :  { %v1793_v16 = vpop.f32.mrf.mxu1 }
 0xaeb   :  { %v1794_v17 = vadd.f32 %v1793_v16, %v3934_v31 }
 0xaed   :  { %v1824_v18 = vsel %vm611_vm8, %v1794_v17, -inf }
 0xaee   :  { %1825 = vmax.xlane.f32.xlu1 %v1824_v18 }
 0xaf4   :  { %v1675_v19 = vpop.xlane.xlu0 %1674 }
 0xaf5   :  { %v1679_v20 = vsub.f32 %v1645_v11, %v1675_v19 }
 0xaf6   :  { %v1821_v21 = vpop.f32.mrf.mxu2 }
 0xaf7   :  { %v1681_v23 = vmul.f32 1.442695, %v1679_v20  ;;  %v1822_v24 = vadd.f32 %v1821_v21, %v3938_v37  ;;  %v3379_v20 = vld [vmem:[#allocation9 + $0x78] sm:$0xff] }
 0xaf8   :  { %1958 = vmatpush.bf16.msra.mxu1 %v3379_v20  ;;  %v3389_v20 = vld [vmem:[#allocation10 + $0xc4] sm:$0xf0] }
 0xaf9   :  { %3497 = vpow2.f32 %v1681_v23  ;;  %v1827_v26 = vsel %vm611_vm8, %v1822_v24, -inf }
 0xafa   :  { %1828 = vmax.xlane.f32.xlu0 %v1827_v26 }
 0xafc   :  { %v1678_v29 = vpop.xlane.xlu2 %1677 }
 0xafd   :  { %v1680_v32 = vsub.f32 %v1671_v14, %v1678_v29  ;;  %v3372_v14 = vld [vmem:[#allocation9 + $0x40] sm:$0xff] }
 0xaff   :  { %v3498_v9 = vpop.eup %3497  ;;  %v1683_v35 = vmul.f32 1.442695, %v1680_v32 }
 0xb00   :  { %v1685_v10 = vsel %vm611_vm8, %v3498_v9, 0.0 }
 0xb01   :  { %3499 = vpow2.f32 %v1683_v35  ;;  %1686 = vadd.xlane.f32.xlu2 %v1685_v10 }
 0xb07   :  { %v3500_v31 = vpop.eup %3499 }
 0xb08   :  { %v1688_v36 = vsel %vm611_vm8, %v3500_v31, 0.0 }
 0xb09   :  { %1689 = vadd.xlane.f32.xlu0 %v1688_v36 }
 0xb1d   :  { %1873 = vrot.lane.b32.xlu0 %v1600_v3, %s3728_s12 }
 0xb61   :  { %v1826_v38 = vpop.xlane.xlu1 %1825 }
 0xb62   :  { %v1830_v37 = vsub.f32 %v1794_v17, %v1826_v38 }
 0xb64   :  { %v1832_v39 = vmul.f32 1.442695, %v1830_v37 }
 0xb66   :  { %3501 = vpow2.f32 %v1832_v39 }
 0xb6c   :  { %v4062_v40 = vpop.eup %3501 }
 0xb6d   :  { %v1829_v41 = vpop.xlane.xlu0 %1828  ;;  %v1836_v42 = vsel %vm611_vm8, %v4062_v40, 0.0 }
 0xb6e   :  { %v1831_v43 = vsub.f32 %v1822_v24, %v1829_v41  ;;  %1837 = vadd.xlane.f32.xlu1 %v1836_v42  ;;  %v3378_v24 = vld [vmem:[#allocation9 + $0x70] sm:$0xff] }
 0xb6f   :  { %1959 = vmatpush.bf16.msra.mxu1 %v3378_v24  ;;  %v3125_v24 = vld [vmem:[#allocation10 + $0xc8] sm:$0xf0] }
 0xb70   :  { %v1834_v44 = vmul.f32 1.442695, %v1831_v43 }
 0xb72   :  { %3503 = vpow2.f32 %v1834_v44 }
 0xb74   :  { %v1687_v45 = vpop.xlane.xlu2 %1686 }
 0xb75   :  { %3505 = vrcp.f32 %v1687_v45  ;;  %v1702_v52 = vand.u32 2147483648, %v1687_v45  ;;  %v1700_v33 = vand.u32 2147483647, %v1687_v45  ;;  %vm1696_vm10 = vweird.f32 %v1687_v45 }
 0xb77   :  { %v1703_v56 = vor.u32 1.1754944e-38, %v1702_v52  ;;  %vm1701_vm12 = vcmp.eq.f32.partialorder %v1700_v33, 8.507059e+37 }
 0xb78   :  { %v4066_v22 = vpop.eup %3503 }
 0xb79   :  { %v1839_v46 = vsel %vm611_vm8, %v4066_v22, 0.0 }
 0xb7a   :  { %1840 = vadd.xlane.f32.xlu2 %v1839_v46  ;;  %v3376_v46 = vld [vmem:[#allocation9 + $0x60] sm:$0xff] }
 0xb7b   :  { %v3506_v47 = vpop.eup %3505 }
 0xb7c   :  { %v1692_v48 = vmul.f32 %v3506_v47, %v1687_v45  ;;  %v1690_v49 = vpop.xlane.xlu0 %1689  ;;  %vm1697_vm9 = vweird.f32 %v3506_v47  ;;  %v3377_v45 = vld [vmem:[#allocation9 + $0x68] sm:$0xff] }
 0xb7d   :  { %3507 = vrcp.f32 %v1690_v49  ;;  %vm1698_vm11 = vmor %vm1696_vm10, %vm1697_vm9  ;;  %v1717_v61 = vand.u32 2147483648, %v1690_v49  ;;  %v1715_v63 = vand.u32 2147483647, %v1690_v49  ;;  %vm1711_vm14 = vweird.f32 %v1690_v49  ;;  %1960 = vmatpush.bf16.msra.mxu1 %v3377_v45 }
 0xb7e   :  { %v1693_v28 = vsub.f32 1.0, %v1692_v48 }
 0xb7f   :  { %v1718_v1 = vor.u32 1.1754944e-38, %v1717_v61  ;;  %vm1716_vm0 = vcmp.eq.f32.partialorder %v1715_v63, 8.507059e+37 }
 0xb80   :  { %v1694_v53 = vmul.f32 %v3506_v47, %v1693_v28 }
 0xb81   :  { %1961 = vmatpush.bf16.msra.mxu1 %v3376_v46  ;;  %v3101_v46 = vld [vmem:[#allocation10 + $0x98] sm:$0xf0] }
 0xb82   :  { %v1695_v5 = vadd.f32 %v3506_v47, %v1694_v53 }
 0xb83   :  { %v3508_v8 = vpop.eup %3507 }
 0xb84   :  { %v1699_v25 = vsel %vm1698_vm11, %v3506_v47, %v1695_v5  ;;  %v1707_v57 = vmul.f32 %v3508_v8, %v1690_v49  ;;  %vm1712_vm13 = vweird.f32 %v3508_v8 }
 0xb85   :  { %v1704_v58 = vsel %vm1701_vm12, %v1703_v56, %v1699_v25  ;;  %vm1713_vm15 = vmor %vm1711_vm14, %vm1712_vm13 }
 0xb86   :  { %v1708_v59 = vsub.f32 1.0, %v1707_v57  ;;  %v1705_v60 = vmul.f32 %v3498_v9, %v1704_v58 }
 0xb87   :  { %1900 = vrot.lane.b32.xlu1 %v4044_v6, %s3728_s12  ;;  %v3374_v6 = vld [vmem:[#allocation9 + $0x50] sm:$0xff] }
 0xb88   :  { %v1709_v62 = vmul.f32 %v3508_v8, %v1708_v59  ;;  %3043 = vmatmul.msk.f32.vlgmr.msrb.gmra.mxu3 %vm611_vm8, %v1705_v60  ;;  %2000 = vmatpush.bf16.msra.mxu2 %v3374_v6  ;;  %v3393_v6 = vld [vmem:[#allocation10 + $0xe4] sm:$0xf0] }
 0xb8a   :  { %v1710_v0 = vadd.f32 %v3508_v8, %v1709_v62 }
 0xb8c   :  { %v1714_v2 = vsel %vm1713_vm15, %v3508_v8, %v1710_v0  ;;  %2001 = vmatpush.bf16.msra.mxu2 %v3373_v51  ;;  %v3392_v51 = vld [vmem:[#allocation10 + $0xe4] sm:$0xf] }
 0xb8d   :  { %v1719_v3 = vsel %vm1716_vm0, %v1718_v1, %v1714_v2  ;;  %v3395_v2 = vld [vmem:[#allocation10 + $0xf4] sm:$0xf0] }
 0xb8e   :  { %v1720_v4 = vmul.f32 %v3500_v31, %v1719_v3  ;;  %v3394_v3 = vld [vmem:[#allocation10 + $0xf4] sm:$0xf] }
 0xb8f   :  { %v1874_v7 = vpop.permute.xlu0 %1873 }
 0xb90   :  { %3044 = vmatmul.msk.f32.vlgmr.msrb.gmra.mxu0 %vm611_vm8, %v1720_v4  ;;  %1894 = vmatpush.msra.mxu3 %v1874_v7  ;;  %v3149_v7 = vld [vmem:[#allocation10 + $0xf8] sm:$0xf0] }
 0xb91   :  { %2002 = vmatpush.bf16.msra.mxu2 %v3372_v14  ;;  %v3152_v50 = vor.u32 %v3394_v3, %v3149_v7  ;;  %v3391_v14 = vld [vmem:[#allocation10 + $0xd4] sm:$0xf0] }
 0xbe1   :  { %v1838_v30 = vpop.xlane.xlu1 %1837 }
 0xbe2   :  { %3509 = vrcp.f32 %v1838_v30  ;;  %v1853_v13 = vand.u32 2147483648, %v1838_v30  ;;  %v1851_v16 = vand.u32 2147483647, %v1838_v30  ;;  %vm1847_vm2 = vweird.f32 %v1838_v30 }
 0xbe4   :  { %v1854_v19 = vor.u32 1.1754944e-38, %v1853_v13  ;;  %vm1852_vm4 = vcmp.eq.f32.partialorder %v1851_v16, 8.507059e+37  ;;  %v3131_v13 = vld [vmem:[#allocation10 + $0xd0] sm:$0xf] }
 0xbe5   :  { %v3132_v16 = vor.u32 %v3391_v14, %v3131_v13 }
 0xbe8   :  { %v3510_v34 = vpop.eup %3509 }
 0xbe9   :  { %v1843_v11 = vmul.f32 %v3510_v34, %v1838_v30  ;;  %vm1848_vm1 = vweird.f32 %v3510_v34  ;;  %v3139_v30 = vld [vmem:[#allocation10 + $0xe0] sm:$0xf] }
 0xbea   :  { %vm1849_vm3 = vmor %vm1847_vm2, %vm1848_vm1 }
 0xbeb   :  { %v1844_v12 = vsub.f32 1.0, %v1843_v11  ;;  %v3141_v11 = vld [vmem:[#allocation10 + $0xe8] sm:$0xf0] }
 0xbed   :  { %v1845_v15 = vmul.f32 %v3510_v34, %v1844_v12  ;;  %v1841_v17 = vpop.xlane.xlu2 %1840  ;;  %v3144_v12 = vor.u32 %v3392_v51, %v3141_v11 }
 0xbee   :  { %3511 = vrcp.f32 %v1841_v17  ;;  %v1868_v35 = vand.u32 2147483648, %v1841_v17  ;;  %v1866_v31 = vand.u32 2147483647, %v1841_v17  ;;  %vm1862_vm6 = vweird.f32 %v1841_v17 }
 0xbef   :  { %v1846_v18 = vadd.f32 %v3510_v34, %v1845_v15  ;;  %v3390_v15 = vld [vmem:[#allocation10 + $0xd4] sm:$0xf] }
 0xbf0   :  { %v1869_v37 = vor.u32 1.1754944e-38, %v1868_v35  ;;  %vm1867_vm10 = vcmp.eq.f32.partialorder %v1866_v31, 8.507059e+37 }
 0xbf1   :  { %v1850_v21 = vsel %vm1849_vm3, %v3510_v34, %v1846_v18  ;;  %v3140_v34 = vor.u32 %v3393_v6, %v3139_v30  ;;  %v3452_v30 = vld [vmem:[%s4148_s10 + $0x1] ss:$0 sm:$0xff] }
 0xbf2   :  { %v1855_v23 = vsel %vm1852_vm4, %v1854_v19, %v1850_v21  ;;  %v3123_v19 = vld [vmem:[#allocation10 + $0xc0] sm:$0xf]  ;;  %v3388_v21 = vld [vmem:[#allocation10 + $0xc4] sm:$0xf] }
 0xbf3   :  { %v1856_v26 = vmul.f32 %v4062_v40, %v1855_v23  ;;  %v3124_v23 = vor.u32 %v3389_v20, %v3123_v19  ;;  %v3402_v19 = vld [vmem:[#allocation12 + $0xb0] sm:$0xff]  ;;  %v3408_v20 = vld [vmem:[#allocation12 + $0xe0] sm:$0xff] }
 0xbf4   :  { %v3512_v29 = vpop.eup %3511 }
 0xbf5   :  { %v1858_v32 = vmul.f32 %v3512_v29, %v1841_v17  ;;  %3049 = vmatmul.msk.f32.vlgmr.msra.gmra.mxu3 %vm611_vm8, %v1856_v26  ;;  %vm1863_vm5 = vweird.f32 %v3512_v29  ;;  %v3133_v17 = vld [vmem:[#allocation10 + $0xd8] sm:$0xf0]  ;;  %v3128_v26 = vor.u32 %v3388_v21, %v3125_v24  ;;  %v3401_v21 = vld [vmem:[#allocation12 + $0xa8] sm:$0xff]  ;;  %v3400_v24 = vld [vmem:[#allocation12 + $0xa0] sm:$0xff] }
 0xbf6   :  { %vm1864_vm9 = vmor %vm1862_vm6, %vm1863_vm5  ;;  %v3136_v18 = vor.u32 %v3390_v15, %v3133_v17  ;;  %v3410_v17 = vld [vmem:[#allocation12 + $0xf0] sm:$0xff]  ;;  %vm2464_vm5 = vcmask 1040384  }
 0xbf7   :  { %v1859_v9 = vsub.f32 1.0, %v1858_v32  ;;  %v3387_v32 = vld [vmem:[#allocation10 + $0xb4] sm:$0xf0] }
 0xbf9   :  { %v1860_v10 = vmul.f32 %v3512_v29, %v1859_v9  ;;  %v1901_v36 = vpop.permute.xlu1 %1900  ;;  %v3386_v9 = vld [vmem:[#allocation10 + $0xb4] sm:$0xf] }
 0xbfa   :  { %1921 = vmatpush.msra.mxu0 %v1901_v36  ;;  %v3107_v36 = vld [vmem:[#allocation10 + $0xa0] sm:$0xf] }
 0xbfb   :  { %v1861_v38 = vadd.f32 %v3512_v29, %v1860_v10  ;;  %v3117_v10 = vld [vmem:[#allocation10 + $0xb8] sm:$0xf0] }
 0xbfc   :  { %2191 = vmatpush.bf16.msrb.mxu0 %v3152_v50  ;;  %v3120_v31 = vor.u32 %v3386_v9, %v3117_v10  ;;  %v3398_v9 = vld [vmem:[#allocation12 + $0x90] sm:$0xff]  ;;  %v3404_v10 = vld [vmem:[#allocation12 + $0xc0] sm:$0xff] }
 0xbfd   :  { %v1865_v39 = vsel %vm1864_vm9, %v3512_v29, %v1861_v38  ;;  %v3115_v29 = vld [vmem:[#allocation10 + $0xb0] sm:$0xf]  ;;  %v3385_v38 = vld [vmem:[#allocation10 + $0xa4] sm:$0xf0] }
 0xbfe   :  { %v1870_v41 = vsel %vm1867_vm10, %v1869_v37, %v1865_v39  ;;  %v3116_v35 = vor.u32 %v3387_v32, %v3115_v29  ;;  %v3384_v37 = vld [vmem:[#allocation10 + $0xa4] sm:$0xf]  ;;  %v3108_v39 = vor.u32 %v3385_v38, %v3107_v36  ;;  %v3399_v29 = vld [vmem:[#allocation12 + $0x98] sm:$0xff]  ;;  %v3405_v32 = vld [vmem:[#allocation12 + $0xc8] sm:$0xff] }
 0xbff   :  { %v1871_v40 = vmul.f32 %v4066_v22, %v1870_v41  ;;  %v3451_v22 = vld [vmem:[%s4147_s9 + $0x1] ss:$0 sm:$0xff]  ;;  %v3109_v41 = vld [vmem:[#allocation10 + $0xa8] sm:$0xf0] }
 0xc00   :  { %2192 = vmatpush.bf16.msrb.mxu0 %v3144_v12  ;;  %v3453_v12 = vld [vmem:[%s4149_s11 + $0x1] ss:$0 sm:$0xff]  ;;  %v3397_v36 = vld [vmem:[#allocation12 + $0x88] sm:$0xff] }
 0xc01   :  { %3050 = vmatmul.msk.f32.vlgmr.msra.gmra.mxu0 %vm611_vm8, %v1871_v40  ;;  %v3112_v40 = vor.u32 %v3384_v37, %v3109_v41 }
 0xc04   :  { %2193 = vmatpush.bf16.msrb.mxu0 %v3136_v18  ;;  %v3409_v18 = vld [vmem:[#allocation12 + $0xe8] sm:$0xff] }
 0xc08   :  { %2194 = vmatpush.bf16.msrb.mxu0 %v3128_v26  ;;  %v3406_v26 = vld [vmem:[#allocation12 + $0xd0] sm:$0xff] }
 0xc0b   :  { %v1741_v42 = vpop.f32.mrf.mxu3 }
 0xc0c   :  { %2195 = vmatpush.bf16.msrb.mxu0 %v3120_v31 }
 0xc0d   :  { %v1764_v43 = vpop.f32.mrf.mxu0 }
 0xc0e   :  { %v1767_v44 = vpack.c.bf16 %v1764_v43, %v1741_v42  ;;  %v3099_v42 = vld [vmem:[#allocation10 + $0x90] sm:$0xf]  ;;  %v3383_v43 = vld [vmem:[#allocation10 + $0x94] sm:$0xf0] }
 0xc0f   :  { %v3100_v45 = vor.u32 %v3383_v43, %v3099_v42 }
 0xc10   :  { %3084 = vmatmul.msk.bf16.vlgmr.msra.gmra.mxu2 %vm558_vm7, %v1767_v44  ;;  %2196 = vmatpush.bf16.msrb.mxu0 %v3112_v40  ;;  %v3382_v44 = vld [vmem:[#allocation10 + $0x94] sm:$0xf] }
 0xc78   :  { %v1896_v47 = vpop.f32.mrf.mxu3 }
 0xc7e   :  { %v1923_v48 = vpop.f32.mrf.mxu0 }
 0xc7f   :  { %v1926_v49 = vpack.c.bf16 %v1923_v48, %v1896_v47  ;;  %v3104_v47 = vor.u32 %v3382_v44, %v3101_v46  ;;  %v3091_v48 = vld [vmem:[#allocation10 + $0x80] sm:$0xf] }
 0xc81   :  { %3067 = vmatmul.msk.bf16.vlgmr.msra.gmra.mxu1 %vm558_vm7, %v1926_v49  ;;  %v3381_v49 = vld [vmem:[#allocation10 + $0x84] sm:$0xf0]  ;;  %2197 = vmatpush.bf16.msrb.mxu0 %v3104_v47 }
 0xc93   :  { %v2004_v28 = vpop.f32.mrf.mxu2 }
 0xc9b   :  { %v2006_v8 = vpop.f32.mrf.mxu2 }
 0xcfe   :  { %v1963_v52 = vpop.f32.mrf.mxu1 }
 0xcff   :  { %v2005_v53 = vadd.f32 %v2004_v28, %v1963_v52  ;;  %v3380_v28 = vld [vmem:[#allocation10 + $0x84] sm:$0xf]  ;;  %v3092_v52 = vor.u32 %v3381_v49, %v3091_v48 }
 0xd01   :  { %v2014_v33 = vadd.f32 %v3451_v22, %v2005_v53  ;;  %v3093_v53 = vld [vmem:[#allocation10 + $0x88] sm:$0xf0] }
 0xd03   :  { %v2016_v5 = vadd.f32 %v2014_v33, %v4027_v54 }
 0xd05   :  { %2022 = vadd.xlane.f32.xlu2 %v2016_v5 }
 0xd06   :  { %v1965_v56 = vpop.f32.mrf.mxu1 }
 0xd07   :  { %v2007_v25 = vadd.f32 %v2006_v8, %v1965_v56 }
 0xd09   :  { %v2015_v57 = vadd.f32 %v3451_v22, %v2007_v25 }
 0xd0b   :  { %v2017_v58 = vadd.f32 %v2015_v57, %v4029_v55  ;;  %v3147_v55 = vld [vmem:[#allocation10 + $0xf0] sm:$0xf] }
 0xd0c   :  { %v3148_v4 = vor.u32 %v3395_v2, %v3147_v55 }
 0xd0d   :  { %2024 = vadd.xlane.f32.xlu2 %v2017_v58 }
 0xd0e   :  { %2177 = vmatpush.bf16.msrb.mxu3 %v3148_v4 }
 0xd12   :  { %2178 = vmatpush.bf16.msrb.mxu3 %v3140_v34 }
 0xd16   :  { %2179 = vmatpush.bf16.msrb.mxu3 %v3132_v16  ;;  %v3411_v16 = vld [vmem:[#allocation12 + $0xf8] sm:$0xff] }
 0xd17   :  { %2391 = vmatpush.bf16.msrb.mxu2 %v3411_v16 }
 0xd1a   :  { %2180 = vmatpush.bf16.msrb.mxu3 %v3124_v23  ;;  %v3407_v23 = vld [vmem:[#allocation12 + $0xd8] sm:$0xff] }
 0xd1b   :  { %2392 = vmatpush.bf16.msrb.mxu2 %v3410_v17 }
 0xd1e   :  { %2181 = vmatpush.bf16.msrb.mxu3 %v3116_v35  ;;  %v3088_v35 = vld [vmem:[%s4151_s13 + $0x2] sm:$0x3] }
 0xd1f   :  { %2393 = vmatpush.bf16.msrb.mxu2 %v3409_v18  ;;  %v2094_v31 = vperm.slane %v3088_v35, 1  ;;  %v2093_v40 = vperm.slane %v3088_v35, 0 }
 0xd22   :  { %2182 = vmatpush.bf16.msrb.mxu3 %v3108_v39  ;;  %v3396_v39 = vld [vmem:[#allocation12 + $0x80] sm:$0xff] }
 0xd23   :  { %2394 = vmatpush.bf16.msrb.mxu2 %v3408_v20 }
 0xd26   :  { %2183 = vmatpush.bf16.msrb.mxu3 %v3100_v45 }
 0xd27   :  { %2395 = vmatpush.bf16.msrb.mxu2 %v3407_v23 }
 0xd2a   :  { %2184 = vmatpush.bf16.msrb.mxu3 %v3092_v52 }
 0xd2b   :  { %2396 = vmatpush.bf16.msrb.mxu2 %v3406_v26 }
 0xd2f   :  { %2397 = vmatpush.bf16.msrb.mxu2 %v3405_v32 }
 0xd33   :  { %2398 = vmatpush.bf16.msrb.mxu2 %v3404_v10 }
 0xd78   :  { %v2023_v59 = vpop.xlane.xlu2 %2022 }
 0xd79   :  { %v2026_v60 = vmul.f32 %v2023_v59, %v3890_v27 }
 0xd7b   :  { %v4086_v61 = vsub.f32 %v2016_v5, %v2026_v60  ;;  %v3096_v5 = vor.u32 %v3380_v28, %v3093_v53 }
 0xd7d   :  { %v2030_v62 = vmul.f32 %v4086_v61, %v4086_v61  ;;  %2198 = vmatpush.bf16.msrb.mxu0 %v3096_v5 }
 0xd7f   :  { %2032 = vadd.xlane.f32.xlu0 %v2030_v62 }
 0xd80   :  { %v2025_v63 = vpop.xlane.xlu2 %2024 }
 0xd81   :  { %v2027_v54 = vmul.f32 %v2025_v63, %v3890_v27 }
 0xd83   :  { %v4091_v0 = vsub.f32 %v2017_v58, %v2027_v54 }
 0xd85   :  { %v2031_v1 = vmul.f32 %v4091_v0, %v4091_v0 }
 0xd87   :  { %2034 = vadd.xlane.f32.xlu2 %v2031_v1 }
 0xdf2   :  { %v2033_v22 = vpop.xlane.xlu0 %2032 }
 0xdf3   :  { %v2036_v33 = vmul.f32 %v2033_v22, %v3890_v27 }
 0xdf5   :  { %v2038_v8 = vadd.f32 1e-12, %v2036_v33 }
 0xdf7   :  { %3513 = vrsqrt.f32 %v2038_v8  ;;  %vm2046_vm8 = vweird.f32 %v2038_v8 }
 0xdfa   :  { %v2035_v56 = vpop.xlane.xlu2 %2034 }
 0xdfb   :  { %v2037_v25 = vmul.f32 %v2035_v56, %v3890_v27 }
 0xdfd   :  { %v3514_v57 = vpop.eup %3513  ;;  %v2039_v58 = vadd.f32 1e-12, %v2037_v25 }
 0xdfe   :  { %v2041_v59 = vmul.f32 %v3514_v57, %v2038_v8  ;;  %vm2047_vm7 = vweird.f32 %v3514_v57 }
 0xdff   :  { %3515 = vrsqrt.f32 %v2039_v58  ;;  %vm2048_vm11 = vmor %vm2046_vm8, %vm2047_vm7  ;;  %vm2056_vm13 = vweird.f32 %v2039_v58 }
 0xe00   :  { %v2042_v60 = vmul.f32 %v3514_v57, %v2041_v59 }
 0xe02   :  { %v2043_v62 = vmul.f32 0.5, %v2042_v60 }
 0xe04   :  { %v2044_v63 = vsub.f32 1.5, %v2043_v62 }
 0xe05   :  { %v3516_v54 = vpop.eup %3515 }
 0xe06   :  { %v2045_v1 = vmul.f32 %v3514_v57, %v2044_v63  ;;  %v2051_v55 = vmul.f32 %v3516_v54, %v2039_v58  ;;  %vm2057_vm12 = vweird.f32 %v3516_v54 }
 0xe07   :  { %vm2058_vm14 = vmor %vm2056_vm13, %vm2057_vm12 }
 0xe08   :  { %v2052_v2 = vmul.f32 %v3516_v54, %v2051_v55  ;;  %v2049_v3 = vsel %vm2048_vm11, %v3514_v57, %v2045_v1 }
 0xe09   :  { %v2060_v50 = vmul.f32 %v2049_v3, %v4086_v61 }
 0xe0a   :  { %v2053_v4 = vmul.f32 0.5, %v2052_v2 }
 0xe0b   :  { %v2065_v11 = vmul.f32 %v3452_v30, %v2060_v50 }
 0xe0c   :  { %v2054_v7 = vsub.f32 1.5, %v2053_v4 }
 0xe0d   :  { %v4105_v14 = vadd.f32 %v3453_v12, %v2065_v11 }
 0xe0e   :  { %v2055_v6 = vmul.f32 %v3516_v54, %v2054_v7 }
 0xe10   :  { %v2059_v51 = vsel %vm2058_vm14, %v3516_v54, %v2055_v6 }
 0xe11   :  { %v2061_v34 = vmul.f32 %v2059_v51, %v4091_v0  ;;  %v3403_v0 = vld [vmem:[#allocation12 + $0xb8] sm:$0xff] }
 0xe12   :  { %2377 = vmatpush.bf16.msrb.mxu1 %v3403_v0 }
 0xe13   :  { %v2066_v13 = vmul.f32 %v3452_v30, %v2061_v34 }
 0xe15   :  { %v4107_v15 = vadd.f32 %v3453_v12, %v2066_v13 }
 0xe16   :  { %2378 = vmatpush.bf16.msrb.mxu1 %v3402_v19  ;;  %v3454_v19 = vld [vmem:[%s4153_s15 + $0x1] ss:$0 sm:$0xff] }
 0xe17   :  { %v2091_v61 = vpack.c.bf16 %v4107_v15, %v4105_v14 }
 0xe19   :  { %2185 = vmatmul.bf16.vlgmr.msrb.gmra.mxu3 %v2091_v61  ;;  %2199 = vmatmul.bf16.vlgmr.msrb.gmra.mxu0 %v2091_v61 }
 0xe1a   :  { %2379 = vmatpush.bf16.msrb.mxu1 %v3401_v21 }
 0xe1e   :  { %2380 = vmatpush.bf16.msrb.mxu1 %v3400_v24 }
 0xe22   :  { %2381 = vmatpush.bf16.msrb.mxu1 %v3399_v29 }
 0xe26   :  { %2382 = vmatpush.bf16.msrb.mxu1 %v3398_v9 }
 0xe2a   :  { %2383 = vmatpush.bf16.msrb.mxu1 %v3397_v36 }
 0xe2e   :  { %2384 = vmatpush.bf16.msrb.mxu1 %v3396_v39 }
 0xe96   :  { %v2200_v38 = vpop.f32.mrf.mxu0 }
 0xe97   :  { %v2201_v37 = vadd.f32 %v2200_v38, %v2094_v31 }
 0xe99   :  { %v2210_v41 = vmul.f32 0.044715, %v2201_v37  ;;  %v2206_v4 = vmul.f32 0.5, %v2201_v37 }
 0xe9b   :  { %v2214_v42 = vmul.f32 %v2210_v41, %v2201_v37 }
 0xe9c   :  { %v2186_v43 = vpop.f32.mrf.mxu3 }
 0xe9d   :  { %v2218_v44 = vmul.f32 %v2214_v42, %v2201_v37  ;;  %v2187_v45 = vadd.f32 %v2186_v43, %v2093_v40  ;;  %v3418_v43 = vld [vmem:[#allocation13 + $0x30] sm:$0xff] }
 0xe9e   :  { %v2202_v46 = vpop.f32.mrf.mxu0 }
 0xe9f   :  { %v2222_v47 = vadd.f32 %v2218_v44, %v2201_v37  ;;  %v2209_v48 = vmul.f32 0.044715, %v2187_v45  ;;  %v2203_v49 = vadd.f32 %v2202_v46, %v2094_v31  ;;  %v2205_v13 = vmul.f32 0.5, %v2187_v45  ;;  %v3417_v44 = vld [vmem:[#allocation13 + $0x28] sm:$0xff]  ;;  %v3414_v46 = vld [vmem:[#allocation13 + $0x10] sm:$0xff] }
 0xea1   :  { %v2213_v28 = vmul.f32 %v2209_v48, %v2187_v45  ;;  %v2212_v22 = vmul.f32 0.044715, %v2203_v49  ;;  %v2226_v52 = vmul.f32 0.7978846, %v2222_v47  ;;  %v2208_v7 = vmul.f32 0.5, %v2203_v49  ;;  %v3413_v47 = vld [vmem:[#allocation13 + $0x8] sm:$0xff] }
 0xea3   :  { %v2217_v53 = vmul.f32 %v2213_v28, %v2187_v45  ;;  %v2216_v33 = vmul.f32 %v2212_v22, %v2203_v49  ;;  %3517 = vtanh.f32 %v2226_v52  ;;  %v3412_v28 = vld [vmem:[#allocation13] sm:$0xff] }
 0xea4   :  { %v2188_v5 = vpop.f32.mrf.mxu3 }
 0xea5   :  { %v2221_v8 = vadd.f32 %v2217_v53, %v2187_v45  ;;  %v2220_v56 = vmul.f32 %v2216_v33, %v2203_v49  ;;  %v2189_v25 = vadd.f32 %v2188_v5, %v2093_v40  ;;  %v3415_v45 = vld [vmem:[#allocation13 + $0x18] sm:$0xff]  ;;  %v3426_v5 = vld [vmem:[#allocation15 + $0x30] sm:$0xff] }
 0xea6   :  { %v3427_v53 = vld [vmem:[#allocation15 + $0x38] sm:$0xff] }
 0xea7   :  { %v2224_v57 = vadd.f32 %v2220_v56, %v2203_v49  ;;  %v2211_v58 = vmul.f32 0.044715, %v2189_v25  ;;  %v2225_v59 = vmul.f32 0.7978846, %v2221_v8  ;;  %v2207_v61 = vmul.f32 0.5, %v2189_v25  ;;  %2618 = vmatpush.bf16.msra.mxu0 %v3427_v53 }
 0xea9   :  { %v2228_v60 = vmul.f32 0.7978846, %v2224_v57  ;;  %v2215_v62 = vmul.f32 %v2211_v58, %v2189_v25  ;;  %v3518_v54 = vpop.eup %3517  ;;  %v3425_v58 = vld [vmem:[#allocation15 + $0x28] sm:$0xff] }
 0xeaa   :  { %v2234_v2 = vadd.f32 1.0, %v3518_v54 }
 0xeab   :  { %v2219_v63 = vmul.f32 %v2215_v62, %v2189_v25  ;;  %3519 = vtanh.f32 %v2228_v60  ;;  %2619 = vmatpush.bf16.msra.mxu0 %v3426_v5  ;;  %v3424_v62 = vld [vmem:[#allocation15 + $0x20] sm:$0xff] }
 0xeac   :  { %3521 = vtanh.f32 %v2225_v59  ;;  %v2238_v6 = vmul.f32 %v2234_v2, %v2206_v4  ;;  %v3423_v2 = vld [vmem:[#allocation15 + $0x18] sm:$0xff] }
 0xead   :  { %v2223_v1 = vadd.f32 %v2219_v63, %v2189_v25 }
 0xeaf   :  { %v2227_v55 = vmul.f32 0.7978846, %v2223_v1  ;;  %2620 = vmatpush.bf16.msra.mxu0 %v3425_v58 }
 0xeb1   :  { %v3520_v3 = vpop.eup %3519  ;;  %3523 = vtanh.f32 %v2227_v55 }
 0xeb2   :  { %v2236_v50 = vadd.f32 1.0, %v3520_v3  ;;  %v3522_v30 = vpop.eup %3521  ;;  %v3455_v3 = vld [vmem:[%s4154_s16 + $0x1] ss:$0 sm:$0xff] }
 0xeb3   :  { %v2233_v11 = vadd.f32 1.0, %v3522_v30  ;;  %2621 = vmatpush.bf16.msra.mxu0 %v3424_v62 }
 0xeb4   :  { %v2240_v51 = vmul.f32 %v2236_v50, %v2208_v7 }
 0xeb5   :  { %v2237_v17 = vmul.f32 %v2233_v11, %v2205_v13 }
 0xeb6   :  { %v2277_v34 = vpack.c.bf16 %v2240_v51, %v2238_v6  ;;  %v3456_v6 = vld [vmem:[%s4155_s17 + $0x1] ss:$0 sm:$0xff] }
 0xeb7   :  { %v3524_v12 = vpop.eup %3523  ;;  %2622 = vmatpush.bf16.msra.mxu0 %v3423_v2 }
 0xeb8   :  { %2399 = vmatmul.bf16.vlgmr.msrb.gmra.mxu2 %v2277_v34  ;;  %v2235_v16 = vadd.f32 1.0, %v3524_v12 }
 0xeba   :  { %v2239_v0 = vmul.f32 %v2235_v16, %v2207_v61 }
 0xebc   :  { %v2276_v18 = vpack.c.bf16 %v2239_v0, %v2237_v17 }
 0xebe   :  { %2385 = vmatmul.bf16.vlgmr.msrb.gmra.mxu1 %v2276_v18  ;;  %v3422_v18 = vld [vmem:[#allocation15 + $0x10] sm:$0xff] }
 0xebf   :  { %2623 = vmatpush.bf16.msra.mxu0 %v3422_v18 }
 0xf3b   :  { %v2386_v20 = vpop.f32.mrf.mxu1  ;;  %v2400_v21 = vpop.f32.mrf.mxu2 }
 0xf3c   :  { %v2387_v23 = vadd.f32 %v3454_v19, %v2386_v20  ;;  %v3420_v20 = vld [vmem:[#allocation15] sm:$0xff] }
 0xf3e   :  { %v2401_v24 = vadd.f32 %v2400_v21, %v2387_v23  ;;  %v3457_v21 = vld [vmem:[%s4157_s19] ss:$0 sm:$0xff] }
 0xf40   :  { %v2405_v26 = vadd.f32 %v2401_v24, %v4105_v14  ;;  %v3419_v14 = vld [vmem:[#allocation13 + $0x38] sm:$0xff] }
 0xf41   :  { %2535 = vmatpush.bf16.msra.mxu3 %v3419_v14 }
 0xf42   :  { %2411 = vadd.xlane.f32.xlu2 %v2405_v26 }
 0xf43   :  { %v2388_v29 = vpop.f32.mrf.mxu1  ;;  %v2402_v9 = vpop.f32.mrf.mxu2 }
 0xf44   :  { %v2389_v32 = vadd.f32 %v3454_v19, %v2388_v29  ;;  %v3421_v19 = vld [vmem:[#allocation15 + $0x8] sm:$0xff] }
 0xf45   :  { %2536 = vmatpush.bf16.msra.mxu3 %v3418_v43  ;;  %2624 = vmatpush.bf16.msra.mxu0 %v3421_v19 }
 0xf46   :  { %v2403_v35 = vadd.f32 %v2402_v9, %v2389_v32  ;;  %v3458_v9 = vld [vmem:[%s4177_s5] ss:$0 sm:$0xff] }
 0xf48   :  { %v2406_v10 = vadd.f32 %v2403_v35, %v4107_v15  ;;  %v3416_v15 = vld [vmem:[#allocation13 + $0x20] sm:$0xff] }
 0xf49   :  { %2537 = vmatpush.bf16.msra.mxu3 %v3417_v44  ;;  %2625 = vmatpush.bf16.msra.mxu0 %v3420_v20 }
 0xf4a   :  { %2413 = vadd.xlane.f32.xlu1 %v2406_v10 }
 0xf4d   :  { %2538 = vmatpush.bf16.msra.mxu3 %v3416_v15 }
 0xf51   :  { %2539 = vmatpush.bf16.msra.mxu3 %v3415_v45 }
 0xf55   :  { %2540 = vmatpush.bf16.msra.mxu3 %v3414_v46 }
 0xf59   :  { %2541 = vmatpush.bf16.msra.mxu3 %v3413_v47 }
 0xf5d   :  { %2542 = vmatpush.bf16.msra.mxu3 %v3412_v28 }
 0xfb5   :  { %v2412_v38 = vpop.xlane.xlu2 %2411 }
 0xfb6   :  { %v2415_v39 = vmul.f32 %v2412_v38, %v3890_v27 }
 0xfb8   :  { %v2417_v40 = vsub.f32 %v2405_v26, %v2415_v39 }
 0xfba   :  { %v2419_v42 = vmul.f32 %v2417_v40, %v2417_v40 }
 0xfbd   :  { %v2414_v31 = vpop.xlane.xlu1 %2413 }
 0xfbe   :  { %v2416_v36 = vmul.f32 %v2414_v31, %v3890_v27 }
 0xfc0   :  { %v2418_v37 = vsub.f32 %v2406_v10, %v2416_v36 }
 0xfc2   :  { %v2420_v41 = vmul.f32 %v2418_v37, %v2418_v37 }
 0xfc4   :  { %2423 = vadd.xlane.f32.xlu2 %v2420_v41 }
 0xfcc   :  { %2421 = vadd.xlane.f32.xlu2 %v2419_v42 }
0x1037   :  { %v2424_v48 = vpop.xlane.xlu2 %2423 }
0x1038   :  { %v2426_v49 = vmul.f32 %v2424_v48, %v3890_v27 }
0x103a   :  { %v2428_v22 = vadd.f32 1e-12, %v2426_v49 }
0x103c   :  { %3525 = vrsqrt.f32 %v2428_v22  ;;  %vm2445_vm0 = vweird.f32 %v2428_v22 }
0x103f   :  { %v2422_v52 = vpop.xlane.xlu2 %2421 }
0x1040   :  { %v2425_v33 = vmul.f32 %v2422_v52, %v3890_v27 }
0x1042   :  { %v3526_v8 = vpop.eup %3525  ;;  %v2427_v56 = vadd.f32 1e-12, %v2425_v33 }
0x1043   :  { %v2440_v25 = vmul.f32 %v3526_v8, %v2428_v22  ;;  %vm2446_vm15 = vweird.f32 %v3526_v8 }
0x1044   :  { %3527 = vrsqrt.f32 %v2427_v56  ;;  %vm2447_vm1 = vmor %vm2445_vm0, %vm2446_vm15  ;;  %vm2435_vm3 = vweird.f32 %v2427_v56 }
0x1045   :  { %v2441_v57 = vmul.f32 %v3526_v8, %v2440_v25 }
0x1047   :  { %v2442_v59 = vmul.f32 0.5, %v2441_v57 }
0x1049   :  { %v2443_v60 = vsub.f32 1.5, %v2442_v59 }
0x104a   :  { %v3528_v63 = vpop.eup %3527 }
0x104b   :  { %v2444_v54 = vmul.f32 %v3526_v8, %v2443_v60  ;;  %v2430_v1 = vmul.f32 %v3528_v63, %v2427_v56  ;;  %vm2436_vm2 = vweird.f32 %v3528_v63 }
0x104c   :  { %vm2437_vm4 = vmor %vm2435_vm3, %vm2436_vm2 }
0x104d   :  { %v2448_v27 = vsel %vm2447_vm1, %v3526_v8, %v2444_v54  ;;  %v2431_v55 = vmul.f32 %v3528_v63, %v2430_v1 }
0x104e   :  { %v2450_v4 = vmul.f32 %v2448_v27, %v2418_v37 }
0x104f   :  { %v2432_v7 = vmul.f32 0.5, %v2431_v55 }
0x1050   :  { %v2455_v30 = vmul.f32 %v3455_v3, %v2450_v4 }
0x1051   :  { %v2433_v50 = vsub.f32 1.5, %v2432_v7 }
0x1052   :  { %v2460_v12 = vadd.f32 %v3456_v6, %v2455_v30 }
0x1053   :  { %v2434_v51 = vmul.f32 %v3528_v63, %v2433_v50 }
0x1054   :  { %v2462_v16 = vrot.slane %v2460_v12, 7 }
0x1055   :  { %v2438_v34 = vsel %vm2437_vm4, %v3528_v63, %v2434_v51 }
0x1056   :  { %v2449_v11 = vmul.f32 %v2438_v34, %v2417_v40 }
0x1058   :  { %v2454_v13 = vmul.f32 %v3455_v3, %v2449_v11 }
0x105a   :  { %v2459_v61 = vadd.f32 %v3456_v6, %v2454_v13 }
0x105c   :  { %v2465_v17 = vsel %vm2464_vm5, %v2459_v61, %v2462_v16 }
0x105d   :  { %v2483_v0 = vpack.c.bf16 %v2465_v17, %v2465_v17 }
0x105f   :  { %2543 = vmatmul.bf16.vlgmr.msra.gmra.mxu3 %v2483_v0 }
0x10e2   :  { %v2544_v23 = vpop.f32.mrf.mxu3 }
0x10e3   :  { %v2545_v24 = vadd.f32 %v3457_v21, %v2544_v23 }
0x10e5   :  { %3529 = vtanh.f32 %v2545_v24 }
0x10ea   :  { %v2546_v26 = vpop.f32.mrf.mxu3 }
0x10eb   :  { %v3530_v29 = vpop.eup %3529 }
0x10ec   :  { %v2566_v32 = vpack.c.bf16 %v3530_v29, %v3530_v29 }
0x10ee   :  { %2626 = vmatmul.bf16.vlgmr.msra.gmra.mxu0 %v2566_v32 }
0x116b   :  { %v2627_v35 = vpop.f32.mrf.mxu0 }
0x116c   :  { %v2628_v10 = vadd.f32 %v3458_v9, %v2627_v35 }
0x116e   :  { %2631 = vst [vmem:[%s4178_s22] sm:$0x3] %v2628_v10 }
0x1173   :  { %v2629_v31 = vpop.f32.mrf.mxu0 }
0x1174   :  { %2636 = vsyncpa [#allocation4], 1 }
0x1175   :  { %2637 = vsyncpa [#allocation8], 1 }
0x1176   :  { %2638 = vsyncpa [#allocation11], 1 }
0x1177   :  { %2639 = vsyncpa [#allocation14], 1 }
0x1178   :  { %2640 = vsyncpa [#allocation5], 1 }

</bundles_post_ra>
